<compile_context>
chip_gen: v5e
topology: v5e:2x2
jax: 0.10.0
libtpu: 0.0.40
codegen_flags: <defaults>
</compile_context>

<pallas_src>
import jax
import jax.numpy as jnp
from jax import lax
from jax.experimental import pallas as pl
from jax.experimental.pallas import tpu as pltpu

EPS = 1e-5
_VMEM_LIMIT = 48 * 1024 * 1024      # explicit scoped-VMEM budget (headroom on v5e/v7x)
_BLOCK_BUDGET = 4 * 1024 * 1024     # target bytes for one grid step's blocks


def _choose_rows_tile(rows, bytes_per_row, mult=1):
    """Largest divisor of `rows` whose per-step blocks stay under the byte budget.

    Prefers >= 2 grid steps (v7x megacore + DMA/compute overlap).  When `mult` is
    given, the tile must be a multiple of it (sublane-aligned 2-D blocks) unless
    it equals the full extent, which is always a legal block shape.
    """
    cap = max(1, _BLOCK_BUDGET // max(int(bytes_per_row), 1))
    if rows >= 16:
        cap = min(cap, rows // 2)
    best = None
    for t in range(1, rows + 1):
        if rows % t == 0 and t <= cap and (t % mult == 0 or t == rows):
            best = t
    return best if best is not None else rows


# ---------------------------------------------------------------------------
# Pallas kernels
# ---------------------------------------------------------------------------
def _conv1d_bn_stats_pallas(xr, w, b):
    """Fused 1-D conv (axis 1) + bias + per-block BatchNorm partial statistics.

    xr: (rows, L, Cin) float32, channels-last, UN-padded.
    w : (ks, Cin, Cout); b: (Cout,)
    Returns:
      z     : (rows, L, Cout)   conv output (pre-BN)
      stats : (nblk, 2, Cout)   per row-block [sum(z), sum(z*z)] over (rows, L)
    """
    rows, L, Cin = xr.shape
    ks, _, Cout = w.shape
    P = ks // 2
    Lp = L + 2 * P
    bytes_per_row = 4 * (L * Cin + Lp * Cin + L * Cout)   # in + pad scratch + out
    TR = _choose_rows_tile(rows, bytes_per_row)
    nblk = rows // TR
    wcol = w.reshape(ks * Cin, Cout)        # im2col weight: tap-major, channel-minor
    b2 = b.reshape(1, Cout)

    def kernel(x_ref, w_ref, b_ref, z_ref, st_ref, pad_ref):
        # Build the zero-padded window in VMEM (halo handled in-kernel, no XLA pad).
        pad_ref[...] = jnp.zeros((TR, Lp, Cin), jnp.float32)
        pad_ref[:, P:P + L, :] = x_ref[...]
        # im2col: ks shifted windows concatenated along channels -> one MXU matmul.
        cols = [pad_ref[:, k:k + L, :] for k in range(ks)]
        xcol = jnp.concatenate(cols, axis=-1).reshape(TR * L, ks * Cin)
        # TODO(synk): bf16 cast of xcol/w (f32 accumulate) would halve traffic on
        # v6e/v7x; kept f32 here to stay bit-close to the f32 reference.
        z = jnp.dot(xcol, w_ref[...], preferred_element_type=jnp.float32) + b_ref[...]
        z_ref[...] = z.reshape(TR, L, Cout)
        # Fused BN partial statistics (single pass while z is still in VMEM).
        ssum = jnp.sum(z, axis=0, keepdims=True)
        ssq = jnp.sum(z * z, axis=0, keepdims=True)
        st_ref[...] = jnp.concatenate([ssum, ssq], axis=0).reshape(1, 2, Cout)

    z, stats = pl.pallas_call(
        kernel,
        out_shape=(jax.ShapeDtypeStruct((rows, L, Cout), jnp.float32),
                   jax.ShapeDtypeStruct((nblk, 2, Cout), jnp.float32)),
        grid=(nblk,),
        in_specs=[
            pl.BlockSpec((TR, L, Cin), lambda i: (i, 0, 0)),
            pl.BlockSpec((ks * Cin, Cout), lambda i: (0, 0)),
            pl.BlockSpec((1, Cout), lambda i: (0, 0)),
        ],
        out_specs=(
            pl.BlockSpec((TR, L, Cout), lambda i: (i, 0, 0)),
            pl.BlockSpec((1, 2, Cout), lambda i: (i, 0, 0)),
        ),
        scratch_shapes=[pltpu.VMEM((TR, Lp, Cin), jnp.float32)],
        compiler_params=pltpu.CompilerParams(
            dimension_semantics=("parallel",),
            vmem_limit_bytes=_VMEM_LIMIT),
    )(xr, wcol, b2)
    return z, stats


def _bn_relu_pallas(z, scale, shift, residual=None):
    """y = relu(z * scale + shift) [+ residual]; scale/shift per channel.

    Runs on a lane-dense flattened (rows, L*C) view so output stores are not
    lane-masked when L*C >= 128.  `residual` fuses GCN's final branch add.
    """
    rows, L, C = z.shape
    M = L * C
    z2 = z.reshape(rows, M)
    s2 = jnp.tile(scale, L).reshape(1, M)   # index l*C + c -> scale[c]
    t2 = jnp.tile(shift, L).reshape(1, M)
    n_streams = 3 if residual is None else 4
    TR = _choose_rows_tile(rows, 4 * M * n_streams, mult=8)
    nblk = rows // TR
    row_spec = pl.BlockSpec((TR, M), lambda i: (i, 0))
    vec_spec = pl.BlockSpec((1, M), lambda i: (0, 0))

    if residual is None:
        def kernel(z_ref, s_ref, t_ref, o_ref):
            o_ref[...] = jnp.maximum(z_ref[...] * s_ref[...] + t_ref[...], 0.0)
        operands = (z2, s2, t2)
        in_specs = [row_spec, vec_spec, vec_spec]
    else:
        r2 = residual.reshape(rows, M)

        def kernel(z_ref, s_ref, t_ref, r_ref, o_ref):
            o_ref[...] = (jnp.maximum(z_ref[...] * s_ref[...] + t_ref[...], 0.0)
                          + r_ref[...])
        operands = (z2, s2, t2, r2)
        in_specs = [row_spec, vec_spec, vec_spec, row_spec]

    out = pl.pallas_call(
        kernel,
        out_shape=jax.ShapeDtypeStruct((rows, M), jnp.float32),
        grid=(nblk,),
        in_specs=in_specs,
        out_specs=row_spec,
        compiler_params=pltpu.CompilerParams(
            dimension_semantics=("parallel",),
            vmem_limit_bytes=_VMEM_LIMIT),
    )(*operands)
    return out.reshape(rows, L, C)


# ---------------------------------------------------------------------------
# CNA stage / GCN wrapper (layout plumbing + tiny stats fold)
# ---------------------------------------------------------------------------
def _cna_stage(xr, params, residual=None):
    """One CNA block in channels-last layout: Conv1d + BatchNorm3d(training) + ReLU.

    xr: (rows, L, Cin) -> (rows, L, Cout).  `residual` (same shape as the output),
    if given, is added after the ReLU (fuses GCN's final x_l + x_r).
    """
    w, b, gamma, beta = params
    z, stats = _conv1d_bn_stats_pallas(xr, w, b)
    rows, L, _ = z.shape
    cnt = float(rows * L)
    ssum = jnp.sum(stats[:, 0, :], axis=0)
    ssq = jnp.sum(stats[:, 1, :], axis=0)
    mean = ssum / cnt
    var = jnp.maximum(ssq / cnt - mean * mean, 0.0)   # biased (training-mode) variance
    scale = gamma * lax.rsqrt(var + EPS)
    shift = beta - mean * scale
    return _bn_relu_pallas(z, scale, shift, residual)


def init_gcn_params(key, in_c, out_c, ks):
    keys = jax.random.split(key, 8)

    def conv_init(kw, kb, cin, cout):
        fan_in = cin * ks
        bound = 1.0 / jnp.sqrt(float(fan_in))
        w = jax.random.uniform(kw, (ks, cin, cout), jnp.float32, -bound, bound)
        b = jax.random.uniform(kb, (cout,), jnp.float32, -bound, bound)
        gamma = jnp.ones((cout,), jnp.float32)   # BatchNorm3d default affine init
        beta = jnp.zeros((cout,), jnp.float32)
        return (w, b, gamma, beta)

    return {
        "l1": conv_init(keys[0], keys[1], in_c, out_c),
        "l2": conv_init(keys[2], keys[3], out_c, out_c),
        "r1": conv_init(keys[4], keys[5], in_c, out_c),
        "r2": conv_init(keys[6], keys[7], out_c, out_c),
    }


def gcn_forward(x, params):
    """x: (N, C, D, H, W) float32 -> (N, out_c, D, H, W)."""
    N, Cin, D, H, W = x.shape
    Co = params["l1"][0].shape[2]

    # Channels-last views: conv over D needs (N,H,W,D,C); conv over H needs (N,D,W,H,C).
    x_d = jnp.transpose(x, (0, 3, 4, 2, 1)).reshape(N * H * W, D, Cin)
    x_h = jnp.transpose(x, (0, 2, 4, 3, 1)).reshape(N * D * W, H, Cin)

    # Left branch: conv over D (ks,1,1) then conv over H (1,ks,1); stays channels-last.
    l1 = _cna_stage(x_d, params["l1"])                                    # (N,H,W,D,Co)
    l1t = jnp.transpose(l1.reshape(N, H, W, D, Co), (0, 3, 2, 1, 4)).reshape(N * D * W, H, Co)
    x_l = _cna_stage(l1t, params["l2"])                                   # (N,D,W,H,Co)

    # Right branch: conv over H then conv over D; branch add fused into the last stage.
    r1 = _cna_stage(x_h, params["r1"])                                    # (N,D,W,H,Co)
    r1t = jnp.transpose(r1.reshape(N, D, W, H, Co), (0, 3, 2, 1, 4)).reshape(N * H * W, D, Co)
    xl_d = jnp.transpose(x_l.reshape(N, D, W, H, Co), (0, 3, 2, 1, 4)).reshape(N * H * W, D, Co)
    y = _cna_stage(r1t, params["r2"], residual=xl_d)                      # (N,H,W,D,Co)

    return jnp.transpose(y.reshape(N, H, W, D, Co), (0, 4, 3, 1, 2))      # -> NCDHW


# ---------------------------------------------------------------------------
# Pure-JAX reference (for correctness check)
# ---------------------------------------------------------------------------
def _conv_ref(x, w, b, axis):
    ks = w.shape[0]
    p = ks // 2
    L = x.shape[axis]
    pad = [(0, 0)] * 5
    pad[axis] = (p, p)
    xp = jnp.pad(x, pad)
    out = jnp.zeros(x.shape[:1] + (w.shape[2],) + x.shape[2:], jnp.float32)
    for k in range(ks):
        xs = lax.slice_in_dim(xp, k, k + L, axis=axis)
        out = out + jnp.einsum('ncdhw,co->nodhw', xs, w[k])
    return out + b[None, :, None, None, None]


def _cna_ref(x, params, axis):
    w, b, gamma, beta = params
    z = _conv_ref(x, w, b, axis)
    mean = jnp.mean(z, axis=(0, 2, 3, 4), keepdims=True)
    var = jnp.mean(jnp.square(z - mean), axis=(0, 2, 3, 4), keepdims=True)
    y = (z - mean) * lax.rsqrt(var + EPS)
    y = y * gamma[None, :, None, None, None] + beta[None, :, None, None, None]
    return jnp.maximum(y, 0.0)


def gcn_ref(x, params):
    x_l = _cna_ref(x, params["l1"], 2)
    x_l = _cna_ref(x_l, params["l2"], 3)
    x_r = _cna_ref(x, params["r1"], 3)
    x_r = _cna_ref(x_r, params["r2"], 2)
    return x_l + x_r


# TODO(synk): BatchNorm3d running_mean/running_var buffer updates (training side
# effect with no forward-output impact) are not reproduced.

if __name__ == "__main__":
    key = jax.random.PRNGKey(0)
    kx, kp = jax.random.split(key)
    N, in_c, out_c, D, H, W, ks = 2, 4, 8, 8, 8, 8, 7
    x = jax.random.normal(kx, (N, in_c, D, H, W), jnp.float32)
    params = init_gcn_params(kp, in_c, out_c, ks)

    out = gcn_forward(x, params)
    out = jax.block_until_ready(out)

    ref = gcn_ref(x, params)
    assert out.shape == (N, out_c, D, H, W), out.shape
    assert jnp.allclose(out, ref, rtol=1e-3, atol=1e-3), float(jnp.max(jnp.abs(out - ref)))
    print("KERNEL_OK")
</pallas_src>

<mosaic_0001>
module attributes {stable_mosaic.version = 11 : i64} {
  func.func @kernel(%arg0: i32, %arg1: memref<64x8x4xf32, #tpu.memory_space<vmem>>, %arg2: memref<28x8xf32, #tpu.memory_space<vmem>>, %arg3: memref<1x8xf32, #tpu.memory_space<vmem>>, %arg4: memref<64x8x8xf32, #tpu.memory_space<vmem>>, %arg5: memref<1x2x8xf32, #tpu.memory_space<vmem>>, %arg6: memref<64x14x4xf32, #tpu.memory_space<vmem>>) attributes {dimension_semantics = [#tpu.dimension_semantics<parallel>], iteration_bounds = array<i64: 2>, scalar_prefetch = 0 : i64, scratch_operands = 1 : i64, tpu.core_type = #tpu.core_type<tc>, window_params = [{transform_indices = @transform_0, window_bounds = array<i64: 64, 8, 4>}, {pipeline_mode = #tpu.pipeline_mode<synchronous>, transform_indices = @transform_1, window_bounds = array<i64: 28, 8>}, {pipeline_mode = #tpu.pipeline_mode<synchronous>, transform_indices = @transform_2, window_bounds = array<i64: 1, 8>}, {transform_indices = @transform_3, window_bounds = array<i64: 64, 8, 8>}, {transform_indices = @transform_4, window_bounds = array<i64: 1, 2, 8>}]} {
    %cst = arith.constant 0.000000e+00 : f32
    %0 = vector.broadcast %cst : f32 to vector<64x14x4xf32>
    %c0 = arith.constant 0 : index
    %c0_0 = arith.constant 0 : index
    %c0_1 = arith.constant 0 : index
    %1 = vector.load %arg6[%c0, %c0_0, %c0_1] : memref<64x14x4xf32, #tpu.memory_space<vmem>>, vector<64x14x4xf32>
    tpu.vector_store %arg6[%c0, %c0_0, %c0_1], %0 {strides = array<i32>} : memref<64x14x4xf32, #tpu.memory_space<vmem>>, vector<64x14x4xf32>,
    %c0_2 = arith.constant 0 : index
    %c0_3 = arith.constant 0 : index
    %c0_4 = arith.constant 0 : index
    %2 = vector.load %arg1[%c0_2, %c0_3, %c0_4] : memref<64x8x4xf32, #tpu.memory_space<vmem>>, vector<64x8x4xf32>
    %c0_5 = arith.constant 0 : index
    %c3 = arith.constant 3 : index
    %c0_6 = arith.constant 0 : index
    %3 = vector.load %arg6[%c0_5, %c3, %c0_6] : memref<64x14x4xf32, #tpu.memory_space<vmem>>, vector<64x8x4xf32>
    tpu.vector_store %arg6[%c0_5, %c3, %c0_6], %2 {strides = array<i32>} : memref<64x14x4xf32, #tpu.memory_space<vmem>>, vector<64x8x4xf32>,
    %c0_7 = arith.constant 0 : index
    %c0_8 = arith.constant 0 : index
    %c0_9 = arith.constant 0 : index
    %4 = vector.load %arg6[%c0_7, %c0_8, %c0_9] : memref<64x14x4xf32, #tpu.memory_space<vmem>>, vector<64x8x4xf32>
    %c0_10 = arith.constant 0 : index
    %c1 = arith.constant 1 : index
    %c0_11 = arith.constant 0 : index
    %5 = vector.load %arg6[%c0_10, %c1, %c0_11] : memref<64x14x4xf32, #tpu.memory_space<vmem>>, vector<64x8x4xf32>
    %c0_12 = arith.constant 0 : index
    %c2 = arith.constant 2 : index
    %c0_13 = arith.constant 0 : index
    %6 = vector.load %arg6[%c0_12, %c2, %c0_13] : memref<64x14x4xf32, #tpu.memory_space<vmem>>, vector<64x8x4xf32>
    %c0_14 = arith.constant 0 : index
    %c3_15 = arith.constant 3 : index
    %c0_16 = arith.constant 0 : index
    %7 = vector.load %arg6[%c0_14, %c3_15, %c0_16] : memref<64x14x4xf32, #tpu.memory_space<vmem>>, vector<64x8x4xf32>
    %c0_17 = arith.constant 0 : index
    %c4 = arith.constant 4 : index
    %c0_18 = arith.constant 0 : index
    %8 = vector.load %arg6[%c0_17, %c4, %c0_18] : memref<64x14x4xf32, #tpu.memory_space<vmem>>, vector<64x8x4xf32>
    %c0_19 = arith.constant 0 : index
    %c5 = arith.constant 5 : index
    %c0_20 = arith.constant 0 : index
    %9 = vector.load %arg6[%c0_19, %c5, %c0_20] : memref<64x14x4xf32, #tpu.memory_space<vmem>>, vector<64x8x4xf32>
    %c0_21 = arith.constant 0 : index
    %c6 = arith.constant 6 : index
    %c0_22 = arith.constant 0 : index
    %10 = vector.load %arg6[%c0_21, %c6, %c0_22] : memref<64x14x4xf32, #tpu.memory_space<vmem>>, vector<64x8x4xf32>
    %11 = tpu.concatenate %4, %5, %6, %7, %8, %9, %10 in 2 : vector<64x8x4xf32>, vector<64x8x4xf32>, vector<64x8x4xf32>, vector<64x8x4xf32>, vector<64x8x4xf32>, vector<64x8x4xf32>, vector<64x8x4xf32> -> vector<64x8x28xf32>
    %12 = vector.shape_cast %11 : vector<64x8x28xf32> to vector<512x28xf32>
    %c0_23 = arith.constant 0 : index
    %c0_24 = arith.constant 0 : index
    %13 = vector.load %arg2[%c0_23, %c0_24] : memref<28x8xf32, #tpu.memory_space<vmem>>, vector<28x8xf32>
    %cst_25 = arith.constant dense<0.000000e+00> : vector<512x8xf32>
    %14 = tpu.matmul %12, %13, %cst_25 {dimension_numbers = #tpu.dot_dimension_numbers<[1], [0], [0], [1], [0, 0, 1, 1], [], []>} : vector<512x28xf32>, vector<28x8xf32>, vector<512x8xf32> -> vector<512x8xf32>
    %c0_26 = arith.constant 0 : index
    %c0_27 = arith.constant 0 : index
    %15 = vector.load %arg3[%c0_26, %c0_27] : memref<1x8xf32, #tpu.memory_space<vmem>>, vector<1x8xf32>
    %16 = vector.broadcast %15 : vector<1x8xf32> to vector<512x8xf32>
    %17 = arith.addf %14, %16 : vector<512x8xf32>
    %18 = vector.shape_cast %17 : vector<512x8xf32> to vector<64x8x8xf32>
    %c0_28 = arith.constant 0 : index
    %c0_29 = arith.constant 0 : index
    %c0_30 = arith.constant 0 : index
    %19 = vector.load %arg4[%c0_28, %c0_29, %c0_30] : memref<64x8x8xf32, #tpu.memory_space<vmem>>, vector<64x8x8xf32>
    tpu.vector_store %arg4[%c0_28, %c0_29, %c0_30], %18 {strides = array<i32>} : memref<64x8x8xf32, #tpu.memory_space<vmem>>, vector<64x8x8xf32>,
    %cst_31 = arith.constant dense<0.000000e+00> : vector<8xf32>
    %20 = vector.multi_reduction <add>, %17, %cst_31 [0] : vector<512x8xf32> to vector<8xf32>
    %21 = vector.shape_cast %20 : vector<8xf32> to vector<1x8xf32>
    %22 = arith.mulf %17, %17 : vector<512x8xf32>
    %cst_32 = arith.constant dense<0.000000e+00> : vector<8xf32>
    %23 = vector.multi_reduction <add>, %22, %cst_32 [0] : vector<512x8xf32> to vector<8xf32>
    %24 = vector.shape_cast %23 : vector<8xf32> to vector<1x8xf32>
    %25 = tpu.concatenate %21, %24 in 0 : vector<1x8xf32>, vector<1x8xf32> -> vector<2x8xf32>
    %26 = vector.shape_cast %25 : vector<2x8xf32> to vector<1x2x8xf32>
    %c0_33 = arith.constant 0 : index
    %c0_34 = arith.constant 0 : index
    %c0_35 = arith.constant 0 : index
    %27 = vector.load %arg5[%c0_33, %c0_34, %c0_35] : memref<1x2x8xf32, #tpu.memory_space<vmem>>, vector<1x2x8xf32>
    tpu.vector_store %arg5[%c0_33, %c0_34, %c0_35], %26 {strides = array<i32>} : memref<1x2x8xf32, #tpu.memory_space<vmem>>, vector<1x2x8xf32>,
    return
  }
  func.func @transform_0(%arg0: i32) -> (i32, i32, i32) {
    %c0_i32 = arith.constant 0 : i32
    %c0_i32_0 = arith.constant 0 : i32
    %c0_i32_1 = arith.constant 0 : i32
    return %arg0, %c0_i32, %c0_i32_0 : i32, i32, i32
  }
  func.func @transform_1(%arg0: i32) -> (i32, i32) {
    %c0_i32 = arith.constant 0 : i32
    %c0_i32_0 = arith.constant 0 : i32
    %c0_i32_1 = arith.constant 0 : i32
    return %c0_i32, %c0_i32_0 : i32, i32
  }
  func.func @transform_2(%arg0: i32) -> (i32, i32) {
    %c0_i32 = arith.constant 0 : i32
    %c0_i32_0 = arith.constant 0 : i32
    %c0_i32_1 = arith.constant 0 : i32
    return %c0_i32, %c0_i32_0 : i32, i32
  }
  func.func @transform_3(%arg0: i32) -> (i32, i32, i32) {
    %c0_i32 = arith.constant 0 : i32
    %c0_i32_0 = arith.constant 0 : i32
    %c0_i32_1 = arith.constant 0 : i32
    return %arg0, %c0_i32, %c0_i32_0 : i32, i32, i32
  }
  func.func @transform_4(%arg0: i32) -> (i32, i32, i32) {
    %c0_i32 = arith.constant 0 : i32
    %c0_i32_0 = arith.constant 0 : i32
    %c0_i32_1 = arith.constant 0 : i32
    return %arg0, %c0_i32, %c0_i32_0 : i32, i32, i32
  }
}

</mosaic_0001>

<bundles_post_ra>
// kernel: tpu_custom_call.1
= control target key start
LH: loop header
LB: loop body
LE: loop exit
PB: predicated region body
PF: predicated region fallthrough
CT: control target
= control target key end

     0   :  { %10 = vsyncpa [#allocation4], 0  ;;  %s6731_s0 = inlined_call_operand.vmem [shape: f32[128,8,4], index: 0, kind: input, shape index: {}]   ;;  %s6732_s1 = inlined_call_operand.vmem [shape: f32[28,8], index: 1, kind: input, shape index: {}]   ;;  %s6733_s2 = inlined_call_operand.vmem [shape: f32[1,8], index: 2, kind: input, shape index: {}]   ;;  %s6734_s3 = inlined_call_operand.vmem [shape: f32[128,8,8], index: 3, kind: output, shape index: {0}]   ;;  %s6735_s4 = inlined_call_operand.hbm [shape: f32[2,2,8], index: 4, kind: output, shape index: {1}]  }
   0x1   :  { %12 = vsyncpa [#allocation4 + $0x1], 0  ;;  %s3998_s15 = smov 0   ;;  %s4000_s16 = smov 0  }
   0x2   :  { %s4002_s17 = smov 0   ;;  %s4004_s18 = smov 0  }
   0x3 LB: > { %s4019_s19 = sadd.s32 4294967295, %s3964_s18   ;;  %s3764_s20 = sadd.s32 4294967294, %s3964_s18   ;;  %s3964_s18 = sphi %s4004_s18, %s7137_s18   ;;  %s3960_s17 = sphi %s4002_s17, %s7136_s17   ;;  %s3956_s16 = sphi %s4000_s16, %s7135_s16   ;;  %s3952_s15 = sphi %s3998_s15, %s7134_s15  }
   0x4   : > { %s4023_s21 = sadd.s32 1, %s3964_s18   ;;  %s119_s22 = sadd.s32 1, %s3960_s17 }
   0x5   : > { %s116_s23 = ssub.s32 %s3964_s18, %s4023_s21  ;;  %p129_p0 = scmp.ne.s32.totalorder %s3960_s17, %s3956_s16 }
   0x6   : > { %p117_p1 = scmp.eq.s32.totalorder %s116_s23, 0  ;;  %p130_p2 = scmp.eq.s32.totalorder %s4019_s19, 1 }
   0x7   : > { %p135_p3 = scmp.ne.s32.totalorder %s3956_s16, %s3952_s15  ;;  %p136_p4 = scmp.eq.s32.totalorder %s3764_s20, 1 }
   0x8   : > { %s4034_s24 = scalar_select %p117_p1, %s3960_s17, %s119_s22  }
   0x9   : > { %p4036_p5 = por %p130_p2, %p129_p0  ;;  %p4040_p6 = por %p136_p4, %p135_p3 }
   0xa   : > { %p3767_p7 = scmp.ge.s32.totalorder %s3964_s18, 1  ;;  %p169_p8 = scmp.lt.s32.totalorder %s3964_s18, 3 }
   0xc   : > { %p170_p9 = pnand %p3767_p7, %p169_p8 }
   0xe   : > { %173 = sbr.rel (%p170_p9) target bundleno = 1448 (0x5a8), region = 32 }
  0x13   : > { %s3769_s27 = sshll.u32 %s4019_s19, 6  ;;  %vm212_vm0 = vcmask 31744   ;;  %vm214_vm1 = vcmask 29696   ;;  %v3966_v0 = vmov 0.0   ;;  %s3967_s6 = smov 4   ;;  %vm3044_vm2 = vcmask 1043456  }
  0x14   : > { %p201_p10 = scmp.lt.s32.totalorder %s3769_s27, 127  ;;  %222 = vst.msk [vmem:[#allocation2 + $0x40] sm:$0xff] %vm212_vm0, %v3966_v0  ;;  %s3968_s7 = smov 8   ;;  %vm2583_vm3 = vcmask 97280   ;;  %vm2518_vm4 = vcmask 64512   ;;  %vm2713_vm5 = vcmask 162816  }
  0x15   : > { %223 = vst.msk [vmem:[#allocation2 + $0x48] sm:$0x3f] %vm214_vm1, %v3966_v0  ;;  %s3969_s8 = smov 12   ;;  %s3970_s9 = smov 16   ;;  %vm2648_vm6 = vcmask 130048   ;;  %vm2778_vm7 = vcmask 195584  }
  0x16   : > { %s7139_s27 = smov (!%p201_p10, %s3769_s27), 127  ;;  %213 = vst.msk [vmem:[#allocation2] sm:$0xff] %vm212_vm0, %v3966_v0  ;;  %s3971_s10 = smov 24   ;;  %vm2851_vm8 = vcmask 228352   ;;  %vm3651_vm9 = vcmask 1040384   ;;  %vm3653_vm10 = vcmask 58368  }
  0x17   : > { %215 = vst.msk [vmem:[#allocation2 + $0x8] sm:$0x3f] %vm214_vm1, %v3966_v0  ;;  %s3770_s28 = sshll.u32 %s7139_s27, 3  ;;  %s3972_s11 = smov 20  }
  0x18   : > { %216 = vst.msk [vmem:[#allocation2 + $0x10] sm:$0xff] %vm212_vm0, %v3966_v0  ;;  %s4065_s5 = scalar_lea.vmem %s6731_s0, %s3770_s28  ;;  %s5613_s12 = scalar_lea.vmem %s6734_s3, %s3770_s28 }
  0x19   : > { %217 = vst.msk [vmem:[#allocation2 + $0x18] sm:$0x3f] %vm214_vm1, %v3966_v0  ;;  %v346_v1 = vld [vmem:[%s4065_s5 + $0x20] sm:$0xff]  ;;  %v344_v3 = vld [vmem:[%s4065_s5 + $0x10] sm:$0xff]  ;;  %v347_v5 = vld [vmem:[%s4065_s5 + $0x28] sm:$0xff] }
  0x1a   : > { %218 = vst.msk [vmem:[#allocation2 + $0x20] sm:$0xff] %vm212_vm0, %v3966_v0  ;;  %v342_v4 = vld [vmem:[%s4065_s5] sm:$0xff]  ;;  %v345_v6 = vld [vmem:[%s4065_s5 + $0x18] sm:$0xff]  ;;  %v343_v7 = vld [vmem:[%s4065_s5 + $0x8] sm:$0xff] }
  0x1b   : > { %410 = vst.msk [vmem:[#allocation2 + $0x43] sm:$0xff] %vm212_vm0, %v346_v1  ;;  %v350_v8 = vld [vmem:[%s4065_s5 + $0x40] sm:$0xff]  ;;  %v349_v9 = vld [vmem:[%s4065_s5 + $0x38] sm:$0xff]  ;;  %v348_v10 = vld [vmem:[%s4065_s5 + $0x30] sm:$0xff] }
  0x1c   : > { %219 = vst.msk [vmem:[#allocation2 + $0x28] sm:$0x3f] %vm214_vm1, %v3966_v0  ;;  %v353_v11 = vld [vmem:[%s4065_s5 + $0x58] sm:$0xff]  ;;  %v352_v12 = vld [vmem:[%s4065_s5 + $0x50] sm:$0xff]  ;;  %v351_v14 = vld [vmem:[%s4065_s5 + $0x48] sm:$0xff] }
  0x1d   : > { %220 = vst.msk [vmem:[#allocation2 + $0x30] sm:$0xff] %vm212_vm0, %v3966_v0  ;;  %v356_v16 = vld [vmem:[%s4065_s5 + $0x70] sm:$0xff]  ;;  %v355_v18 = vld [vmem:[%s4065_s5 + $0x68] sm:$0xff]  ;;  %v354_v19 = vld [vmem:[%s4065_s5 + $0x60] sm:$0xff] }
  0x1e   : > { %221 = vst.msk [vmem:[#allocation2 + $0x38] sm:$0x3f] %vm214_vm1, %v3966_v0  ;;  %v359_v20 = vld [vmem:[%s4065_s5 + $0x88] sm:$0xff]  ;;  %v358_v21 = vld [vmem:[%s4065_s5 + $0x80] sm:$0xff]  ;;  %v357_v23 = vld [vmem:[%s4065_s5 + $0x78] sm:$0xff] }
  0x1f   : > { %224 = vst.msk [vmem:[#allocation2 + $0x50] sm:$0xff] %vm212_vm0, %v3966_v0  ;;  %v362_v26 = vld [vmem:[%s4065_s5 + $0xa0] sm:$0xff]  ;;  %v361_v27 = vld [vmem:[%s4065_s5 + $0x98] sm:$0xff]  ;;  %v360_v28 = vld [vmem:[%s4065_s5 + $0x90] sm:$0xff] }
  0x20   : > { %225 = vst.msk [vmem:[#allocation2 + $0x58] sm:$0x3f] %vm214_vm1, %v3966_v0  ;;  %v365_v32 = vld [vmem:[%s4065_s5 + $0xb8] sm:$0xff]  ;;  %v364_v33 = vld [vmem:[%s4065_s5 + $0xb0] sm:$0xff]  ;;  %v363_v34 = vld [vmem:[%s4065_s5 + $0xa8] sm:$0xff] }
  0x21   : > { %226 = vst.msk [vmem:[#allocation2 + $0x60] sm:$0xff] %vm212_vm0, %v3966_v0  ;;  %v368_v38 = vld [vmem:[%s4065_s5 + $0xd0] sm:$0xff]  ;;  %v367_v39 = vld [vmem:[%s4065_s5 + $0xc8] sm:$0xff]  ;;  %v366_v40 = vld [vmem:[%s4065_s5 + $0xc0] sm:$0xff] }
  0x22   : > { %v538_v2 = vld [vmem:[#allocation2 + $0x41] sm:$0xff]  ;;  %227 = vst.msk [vmem:[#allocation2 + $0x68] sm:$0x3f] %vm214_vm1, %v3966_v0  ;;  %v369_v46 = vld [vmem:[%s4065_s5 + $0xd8] sm:$0xff]  ;;  %v372_v52 = vld [vmem:[%s4065_s5 + $0xf0] sm:$0xff] }
  0x23   : > { %990 = vrot.lane.b32.xlu2 %v538_v2, %s3967_s6  ;;  %228 = vst.msk [vmem:[#allocation2 + $0x70] sm:$0xff] %vm212_vm0, %v3966_v0  ;;  %v371_v44 = vld [vmem:[%s4065_s5 + $0xe8] sm:$0xff]  ;;  %v370_v45 = vld [vmem:[%s4065_s5 + $0xe0] sm:$0xff]  ;;  %v373_v51 = vld [vmem:[%s4065_s5 + $0xf8] sm:$0xff] }
  0x24   : > { %229 = vst.msk [vmem:[#allocation2 + $0x78] sm:$0x3f] %vm214_vm1, %v3966_v0  ;;  %v374_v50 = vld [vmem:[%s4065_s5 + $0x100] sm:$0xff]  ;;  %v377_v56 = vld [vmem:[%s4065_s5 + $0x118] sm:$0xff]  ;;  %v376_v57 = vld [vmem:[%s4065_s5 + $0x110] sm:$0xff] }
  0x25   : > { %230 = vst.msk [vmem:[#allocation2 + $0x80] sm:$0xff] %vm212_vm0, %v3966_v0  ;;  %v375_v58 = vld [vmem:[%s4065_s5 + $0x108] sm:$0xff]  ;;  %v380_v62 = vld [vmem:[%s4065_s5 + $0x130] sm:$0xff] }
  0x26   : > { %231 = vst.msk [vmem:[#allocation2 + $0x88] sm:$0x3f] %vm214_vm1, %v3966_v0  ;;  %v379_v63 = vld [vmem:[%s4065_s5 + $0x128] sm:$0xff] }
  0x27   : > { %232 = vst.msk [vmem:[#allocation2 + $0x90] sm:$0xff] %vm212_vm0, %v3966_v0 }
  0x28   : > { %233 = vst.msk [vmem:[#allocation2 + $0x98] sm:$0x3f] %vm214_vm1, %v3966_v0 }
  0x29   : > { %234 = vst.msk [vmem:[#allocation2 + $0xa0] sm:$0xff] %vm212_vm0, %v3966_v0 }
  0x2a   : > { %235 = vst.msk [vmem:[#allocation2 + $0xa8] sm:$0x3f] %vm214_vm1, %v3966_v0 }
  0x2b   : > { %236 = vst.msk [vmem:[#allocation2 + $0xb0] sm:$0xff] %vm212_vm0, %v3966_v0 }
  0x2c   : > { %237 = vst.msk [vmem:[#allocation2 + $0xb8] sm:$0x3f] %vm214_vm1, %v3966_v0 }
  0x2d   : > { %238 = vst.msk [vmem:[#allocation2 + $0xc0] sm:$0xff] %vm212_vm0, %v3966_v0 }
  0x2e   : > { %239 = vst.msk [vmem:[#allocation2 + $0xc8] sm:$0x3f] %vm214_vm1, %v3966_v0 }
  0x2f   : > { %240 = vst.msk [vmem:[#allocation2 + $0xd0] sm:$0xff] %vm212_vm0, %v3966_v0 }
  0x30   : > { %241 = vst.msk [vmem:[#allocation2 + $0xd8] sm:$0x3f] %vm214_vm1, %v3966_v0 }
  0x31   : > { %242 = vst.msk [vmem:[#allocation2 + $0xe0] sm:$0xff] %vm212_vm0, %v3966_v0 }
  0x32   : > { %243 = vst.msk [vmem:[#allocation2 + $0xe8] sm:$0x3f] %vm214_vm1, %v3966_v0 }
  0x33   : > { %244 = vst.msk [vmem:[#allocation2 + $0xf0] sm:$0xff] %vm212_vm0, %v3966_v0 }
  0x34   : > { %245 = vst.msk [vmem:[#allocation2 + $0xf8] sm:$0x3f] %vm214_vm1, %v3966_v0 }
  0x35   : > { %246 = vst.msk [vmem:[#allocation2 + $0x100] sm:$0xff] %vm212_vm0, %v3966_v0 }
  0x36   : > { %247 = vst.msk [vmem:[#allocation2 + $0x108] sm:$0x3f] %vm214_vm1, %v3966_v0 }
  0x37   : > { %248 = vst.msk [vmem:[#allocation2 + $0x110] sm:$0xff] %vm212_vm0, %v3966_v0 }
  0x38   : > { %249 = vst.msk [vmem:[#allocation2 + $0x118] sm:$0x3f] %vm214_vm1, %v3966_v0 }
  0x39   : > { %250 = vst.msk [vmem:[#allocation2 + $0x120] sm:$0xff] %vm212_vm0, %v3966_v0 }
  0x3a   : > { %251 = vst.msk [vmem:[#allocation2 + $0x128] sm:$0x3f] %vm214_vm1, %v3966_v0 }
  0x3b   : > { %252 = vst.msk [vmem:[#allocation2 + $0x130] sm:$0xff] %vm212_vm0, %v3966_v0 }
  0x3c   : > { %253 = vst.msk [vmem:[#allocation2 + $0x138] sm:$0x3f] %vm214_vm1, %v3966_v0 }
  0x3d   : > { %254 = vst.msk [vmem:[#allocation2 + $0x140] sm:$0xff] %vm212_vm0, %v3966_v0 }
  0x3e   : > { %255 = vst.msk [vmem:[#allocation2 + $0x148] sm:$0x3f] %vm214_vm1, %v3966_v0 }
  0x3f   : > { %256 = vst.msk [vmem:[#allocation2 + $0x150] sm:$0xff] %vm212_vm0, %v3966_v0 }
  0x40   : > { %257 = vst.msk [vmem:[#allocation2 + $0x158] sm:$0x3f] %vm214_vm1, %v3966_v0 }
  0x41   : > { %258 = vst.msk [vmem:[#allocation2 + $0x160] sm:$0xff] %vm212_vm0, %v3966_v0 }
  0x42   : > { %259 = vst.msk [vmem:[#allocation2 + $0x168] sm:$0x3f] %vm214_vm1, %v3966_v0 }
  0x43   : > { %260 = vst.msk [vmem:[#allocation2 + $0x170] sm:$0xff] %vm212_vm0, %v3966_v0 }
  0x44   : > { %261 = vst.msk [vmem:[#allocation2 + $0x178] sm:$0x3f] %vm214_vm1, %v3966_v0 }
  0x45   : > { %262 = vst.msk [vmem:[#allocation2 + $0x180] sm:$0xff] %vm212_vm0, %v3966_v0 }
  0x46   : > { %263 = vst.msk [vmem:[#allocation2 + $0x188] sm:$0x3f] %vm214_vm1, %v3966_v0 }
  0x47   : > { %264 = vst.msk [vmem:[#allocation2 + $0x190] sm:$0xff] %vm212_vm0, %v3966_v0 }
  0x48   : > { %265 = vst.msk [vmem:[#allocation2 + $0x198] sm:$0x3f] %vm214_vm1, %v3966_v0 }
  0x49   : > { %266 = vst.msk [vmem:[#allocation2 + $0x1a0] sm:$0xff] %vm212_vm0, %v3966_v0 }
  0x4a   : > { %267 = vst.msk [vmem:[#allocation2 + $0x1a8] sm:$0x3f] %vm214_vm1, %v3966_v0 }
  0x4b   : > { %268 = vst.msk [vmem:[#allocation2 + $0x1b0] sm:$0xff] %vm212_vm0, %v3966_v0 }
  0x4c   : > { %269 = vst.msk [vmem:[#allocation2 + $0x1b8] sm:$0x3f] %vm214_vm1, %v3966_v0 }
  0x4d   : > { %270 = vst.msk [vmem:[#allocation2 + $0x1c0] sm:$0xff] %vm212_vm0, %v3966_v0 }
  0x4e   : > { %271 = vst.msk [vmem:[#allocation2 + $0x1c8] sm:$0x3f] %vm214_vm1, %v3966_v0 }
  0x4f   : > { %272 = vst.msk [vmem:[#allocation2 + $0x1d0] sm:$0xff] %vm212_vm0, %v3966_v0 }
  0x50   : > { %273 = vst.msk [vmem:[#allocation2 + $0x1d8] sm:$0x3f] %vm214_vm1, %v3966_v0 }
  0x51   : > { %274 = vst.msk [vmem:[#allocation2 + $0x1e0] sm:$0xff] %vm212_vm0, %v3966_v0 }
  0x52   : > { %275 = vst.msk [vmem:[#allocation2 + $0x1e8] sm:$0x3f] %vm214_vm1, %v3966_v0 }
  0x53   : > { %276 = vst.msk [vmem:[#allocation2 + $0x1f0] sm:$0xff] %vm212_vm0, %v3966_v0 }
  0x54   : > { %277 = vst.msk [vmem:[#allocation2 + $0x1f8] sm:$0x3f] %vm214_vm1, %v3966_v0 }
  0x55   : > { %278 = vst.msk [vmem:[#allocation2 + $0x200] sm:$0xff] %vm212_vm0, %v3966_v0 }
  0x56   : > { %279 = vst.msk [vmem:[#allocation2 + $0x208] sm:$0x3f] %vm214_vm1, %v3966_v0 }
  0x57   : > { %280 = vst.msk [vmem:[#allocation2 + $0x210] sm:$0xff] %vm212_vm0, %v3966_v0 }
  0x58   : > { %281 = vst.msk [vmem:[#allocation2 + $0x218] sm:$0x3f] %vm214_vm1, %v3966_v0 }
  0x59   : > { %282 = vst.msk [vmem:[#allocation2 + $0x220] sm:$0xff] %vm212_vm0, %v3966_v0 }
  0x5a   : > { %283 = vst.msk [vmem:[#allocation2 + $0x228] sm:$0x3f] %vm214_vm1, %v3966_v0 }
  0x5b   : > { %284 = vst.msk [vmem:[#allocation2 + $0x230] sm:$0xff] %vm212_vm0, %v3966_v0 }
  0x5c   : > { %285 = vst.msk [vmem:[#allocation2 + $0x238] sm:$0x3f] %vm214_vm1, %v3966_v0 }
  0x5d   : > { %286 = vst.msk [vmem:[#allocation2 + $0x240] sm:$0xff] %vm212_vm0, %v3966_v0 }
  0x5e   : > { %287 = vst.msk [vmem:[#allocation2 + $0x248] sm:$0x3f] %vm214_vm1, %v3966_v0 }
  0x5f   : > { %288 = vst.msk [vmem:[#allocation2 + $0x250] sm:$0xff] %vm212_vm0, %v3966_v0 }
  0x60   : > { %289 = vst.msk [vmem:[#allocation2 + $0x258] sm:$0x3f] %vm214_vm1, %v3966_v0 }
  0x61   : > { %290 = vst.msk [vmem:[#allocation2 + $0x260] sm:$0xff] %vm212_vm0, %v3966_v0 }
  0x62   : > { %291 = vst.msk [vmem:[#allocation2 + $0x268] sm:$0x3f] %vm214_vm1, %v3966_v0 }
  0x63   : > { %292 = vst.msk [vmem:[#allocation2 + $0x270] sm:$0xff] %vm212_vm0, %v3966_v0 }
  0x64   : > { %293 = vst.msk [vmem:[#allocation2 + $0x278] sm:$0x3f] %vm214_vm1, %v3966_v0 }
  0x65   : > { %294 = vst.msk [vmem:[#allocation2 + $0x280] sm:$0xff] %vm212_vm0, %v3966_v0 }
  0x66   : > { %295 = vst.msk [vmem:[#allocation2 + $0x288] sm:$0x3f] %vm214_vm1, %v3966_v0 }
  0x67   : > { %296 = vst.msk [vmem:[#allocation2 + $0x290] sm:$0xff] %vm212_vm0, %v3966_v0 }
  0x68   : > { %297 = vst.msk [vmem:[#allocation2 + $0x298] sm:$0x3f] %vm214_vm1, %v3966_v0 }
  0x69   : > { %298 = vst.msk [vmem:[#allocation2 + $0x2a0] sm:$0xff] %vm212_vm0, %v3966_v0 }
  0x6a   : > { %299 = vst.msk [vmem:[#allocation2 + $0x2a8] sm:$0x3f] %vm214_vm1, %v3966_v0 }
  0x6b   : > { %300 = vst.msk [vmem:[#allocation2 + $0x2b0] sm:$0xff] %vm212_vm0, %v3966_v0 }
  0x6c   : > { %301 = vst.msk [vmem:[#allocation2 + $0x2b8] sm:$0x3f] %vm214_vm1, %v3966_v0 }
  0x6d   : > { %302 = vst.msk [vmem:[#allocation2 + $0x2c0] sm:$0xff] %vm212_vm0, %v3966_v0 }
  0x6e   : > { %303 = vst.msk [vmem:[#allocation2 + $0x2c8] sm:$0x3f] %vm214_vm1, %v3966_v0 }
  0x6f   : > { %304 = vst.msk [vmem:[#allocation2 + $0x2d0] sm:$0xff] %vm212_vm0, %v3966_v0 }
  0x70   : > { %305 = vst.msk [vmem:[#allocation2 + $0x2d8] sm:$0x3f] %vm214_vm1, %v3966_v0 }
  0x71   : > { %306 = vst.msk [vmem:[#allocation2 + $0x2e0] sm:$0xff] %vm212_vm0, %v3966_v0 }
  0x72   : > { %307 = vst.msk [vmem:[#allocation2 + $0x2e8] sm:$0x3f] %vm214_vm1, %v3966_v0 }
  0x73   : > { %308 = vst.msk [vmem:[#allocation2 + $0x2f0] sm:$0xff] %vm212_vm0, %v3966_v0 }
  0x74   : > { %309 = vst.msk [vmem:[#allocation2 + $0x2f8] sm:$0x3f] %vm214_vm1, %v3966_v0 }
  0x75   : > { %310 = vst.msk [vmem:[#allocation2 + $0x300] sm:$0xff] %vm212_vm0, %v3966_v0 }
  0x76   : > { %311 = vst.msk [vmem:[#allocation2 + $0x308] sm:$0x3f] %vm214_vm1, %v3966_v0 }
  0x77   : > { %312 = vst.msk [vmem:[#allocation2 + $0x310] sm:$0xff] %vm212_vm0, %v3966_v0 }
  0x78   : > { %313 = vst.msk [vmem:[#allocation2 + $0x318] sm:$0x3f] %vm214_vm1, %v3966_v0 }
  0x79   : > { %314 = vst.msk [vmem:[#allocation2 + $0x320] sm:$0xff] %vm212_vm0, %v3966_v0 }
  0x7a   : > { %315 = vst.msk [vmem:[#allocation2 + $0x328] sm:$0x3f] %vm214_vm1, %v3966_v0 }
  0x7b   : > { %316 = vst.msk [vmem:[#allocation2 + $0x330] sm:$0xff] %vm212_vm0, %v3966_v0 }
  0x7c   : > { %317 = vst.msk [vmem:[#allocation2 + $0x338] sm:$0x3f] %vm214_vm1, %v3966_v0 }
  0x7d   : > { %318 = vst.msk [vmem:[#allocation2 + $0x340] sm:$0xff] %vm212_vm0, %v3966_v0 }
  0x7e   : > { %319 = vst.msk [vmem:[#allocation2 + $0x348] sm:$0x3f] %vm214_vm1, %v3966_v0 }
  0x7f   : > { %320 = vst.msk [vmem:[#allocation2 + $0x350] sm:$0xff] %vm212_vm0, %v3966_v0 }
  0x80   : > { %321 = vst.msk [vmem:[#allocation2 + $0x358] sm:$0x3f] %vm214_vm1, %v3966_v0 }
  0x81   : > { %322 = vst.msk [vmem:[#allocation2 + $0x360] sm:$0xff] %vm212_vm0, %v3966_v0 }
  0x82   : > { %323 = vst.msk [vmem:[#allocation2 + $0x368] sm:$0x3f] %vm214_vm1, %v3966_v0 }
  0x83   : > { %324 = vst.msk [vmem:[#allocation2 + $0x370] sm:$0xff] %vm212_vm0, %v3966_v0 }
  0x84   : > { %325 = vst.msk [vmem:[#allocation2 + $0x378] sm:$0x3f] %vm214_vm1, %v3966_v0 }
  0x85   : > { %326 = vst.msk [vmem:[#allocation2 + $0x380] sm:$0xff] %vm212_vm0, %v3966_v0 }
  0x86   : > { %327 = vst.msk [vmem:[#allocation2 + $0x388] sm:$0x3f] %vm214_vm1, %v3966_v0 }
  0x87   : > { %328 = vst.msk [vmem:[#allocation2 + $0x390] sm:$0xff] %vm212_vm0, %v3966_v0 }
  0x88   : > { %329 = vst.msk [vmem:[#allocation2 + $0x398] sm:$0x3f] %vm214_vm1, %v3966_v0 }
  0x89   : > { %330 = vst.msk [vmem:[#allocation2 + $0x3a0] sm:$0xff] %vm212_vm0, %v3966_v0 }
  0x8a   : > { %331 = vst.msk [vmem:[#allocation2 + $0x3a8] sm:$0x3f] %vm214_vm1, %v3966_v0 }
  0x8b   : > { %332 = vst.msk [vmem:[#allocation2 + $0x3b0] sm:$0xff] %vm212_vm0, %v3966_v0 }
  0x8c   : > { %333 = vst.msk [vmem:[#allocation2 + $0x3b8] sm:$0x3f] %vm214_vm1, %v3966_v0 }
  0x8d   : > { %334 = vst.msk [vmem:[#allocation2 + $0x3c0] sm:$0xff] %vm212_vm0, %v3966_v0 }
  0x8e   : > { %335 = vst.msk [vmem:[#allocation2 + $0x3c8] sm:$0x3f] %vm214_vm1, %v3966_v0 }
  0x8f   : > { %336 = vst.msk [vmem:[#allocation2 + $0x3d0] sm:$0xff] %vm212_vm0, %v3966_v0 }
  0x90   : > { %337 = vst.msk [vmem:[#allocation2 + $0x3d8] sm:$0x3f] %vm214_vm1, %v3966_v0 }
  0x91   : > { %338 = vst.msk [vmem:[#allocation2 + $0x3e0] sm:$0xff] %vm212_vm0, %v3966_v0 }
  0x92   : > { %339 = vst.msk [vmem:[#allocation2 + $0x3e8] sm:$0x3f] %vm214_vm1, %v3966_v0 }
  0x93   : > { %340 = vst.msk [vmem:[#allocation2 + $0x3f0] sm:$0xff] %vm212_vm0, %v3966_v0 }
  0x94   : > { %341 = vst.msk [vmem:[#allocation2 + $0x3f8] sm:$0x3f] %vm214_vm1, %v3966_v0  ;;  %v378_v0 = vld [vmem:[%s4065_s5 + $0x120] sm:$0xff] }
  0x95   : > { %408 = vst.msk [vmem:[#allocation2 + $0x23] sm:$0xff] %vm212_vm0, %v344_v3 }
  0x96   : > { %406 = vst.msk [vmem:[#allocation2 + $0x3] sm:$0xff] %vm212_vm0, %v342_v4  ;;  %v383_v4 = vld [vmem:[%s4065_s5 + $0x148] sm:$0xff] }
  0x97   : > { %411 = vst.msk [vmem:[#allocation2 + $0x53] sm:$0xff] %vm212_vm0, %v347_v5  ;;  %v382_v5 = vld [vmem:[%s4065_s5 + $0x140] sm:$0xff] }
  0x98   : > { %409 = vst.msk [vmem:[#allocation2 + $0x33] sm:$0xff] %vm212_vm0, %v345_v6  ;;  %v381_v6 = vld [vmem:[%s4065_s5 + $0x138] sm:$0xff] }
  0x99   : > { %407 = vst.msk [vmem:[#allocation2 + $0x13] sm:$0xff] %vm212_vm0, %v343_v7 }
  0x9a   : > { %414 = vst.msk [vmem:[#allocation2 + $0x83] sm:$0xff] %vm212_vm0, %v350_v8 }
  0x9b   : > { %413 = vst.msk [vmem:[#allocation2 + $0x73] sm:$0xff] %vm212_vm0, %v349_v9 }
  0x9c   : > { %v536_v13 = vld [vmem:[#allocation2 + $0x21] sm:$0xff]  ;;  %412 = vst.msk [vmem:[#allocation2 + $0x63] sm:$0xff] %vm212_vm0, %v348_v10 }
  0x9d   : > { %986 = vrot.lane.b32.xlu1 %v536_v13, %s3967_s6  ;;  %v534_v15 = vld [vmem:[#allocation2 + $0x1] sm:$0xff]  ;;  %417 = vst.msk [vmem:[#allocation2 + $0xb3] sm:$0xff] %vm212_vm0, %v353_v11  ;;  %v385_v11 = vld [vmem:[%s4065_s5 + $0x158] sm:$0xff] }
  0x9e   : > { %982 = vrot.lane.b32.xlu0 %v534_v15, %s3967_s6  ;;  %v539_v17 = vld [vmem:[#allocation2 + $0x51] sm:$0xff]  ;;  %416 = vst.msk [vmem:[#allocation2 + $0xa3] sm:$0xff] %vm212_vm0, %v352_v12  ;;  %v386_v10 = vld [vmem:[%s4065_s5 + $0x160] sm:$0xff] }
  0x9f   : > { %992 = vrot.lane.b32.xlu2 %v539_v17, %s3967_s6  ;;  %415 = vst.msk [vmem:[#allocation2 + $0x93] sm:$0xff] %vm212_vm0, %v351_v14  ;;  %v537_v22 = vld [vmem:[#allocation2 + $0x31] sm:$0xff] }
  0xa0   : > { %420 = vst.msk [vmem:[#allocation2 + $0xe3] sm:$0xff] %vm212_vm0, %v356_v16  ;;  %v535_v24 = vld [vmem:[#allocation2 + $0x11] sm:$0xff] }
  0xa1   : > { %419 = vst.msk [vmem:[#allocation2 + $0xd3] sm:$0xff] %vm212_vm0, %v355_v18  ;;  %v542_v25 = vld [vmem:[#allocation2 + $0x81] sm:$0xff]  ;;  %v384_v12 = vld [vmem:[%s4065_s5 + $0x150] sm:$0xff]  ;;  %v389_v16 = vld [vmem:[%s4065_s5 + $0x178] sm:$0xff] }
  0xa2   : > { %418 = vst.msk [vmem:[#allocation2 + $0xc3] sm:$0xff] %vm212_vm0, %v354_v19  ;;  %v541_v29 = vld [vmem:[#allocation2 + $0x71] sm:$0xff]  ;;  %v387_v18 = vld [vmem:[%s4065_s5 + $0x168] sm:$0xff]  ;;  %v4441_v19 = vpop.permute.xlu2 %990 }
  0xa3   : > { %423 = vst.msk [vmem:[#allocation2 + $0x113] sm:$0xff] %vm212_vm0, %v359_v20  ;;  %v540_v30 = vld [vmem:[#allocation2 + $0x61] sm:$0xff]  ;;  %v388_v17 = vld [vmem:[%s4065_s5 + $0x170] sm:$0xff] }
  0xa4   : > { %422 = vst.msk [vmem:[#allocation2 + $0x103] sm:$0xff] %vm212_vm0, %v358_v21  ;;  %v545_v31 = vld [vmem:[#allocation2 + $0xb1] sm:$0xff] }
  0xa5   : > { %988 = vrot.lane.b32.xlu1 %v537_v22, %s3967_s6  ;;  %421 = vst.msk [vmem:[#allocation2 + $0xf3] sm:$0xff] %vm212_vm0, %v357_v23  ;;  %v544_v35 = vld [vmem:[#allocation2 + $0xa1] sm:$0xff]  ;;  %v392_v23 = vld [vmem:[%s4065_s5 + $0x190] sm:$0xff] }
  0xa6   : > { %984 = vrot.lane.b32.xlu0 %v535_v24, %s3967_s6  ;;  %426 = vst.msk [vmem:[#allocation2 + $0x143] sm:$0xff] %vm212_vm0, %v362_v26  ;;  %v543_v36 = vld [vmem:[#allocation2 + $0x91] sm:$0xff]  ;;  %v391_v24 = vld [vmem:[%s4065_s5 + $0x188] sm:$0xff] }
  0xa7   : > { %998 = vrot.lane.b32.xlu2 %v542_v25, %s3967_s6  ;;  %425 = vst.msk [vmem:[#allocation2 + $0x133] sm:$0xff] %vm212_vm0, %v361_v27  ;;  %v548_v37 = vld [vmem:[#allocation2 + $0xe1] sm:$0xff] }
  0xa8   : > { %424 = vst.msk [vmem:[#allocation2 + $0x123] sm:$0xff] %vm212_vm0, %v360_v28  ;;  %v547_v41 = vld [vmem:[#allocation2 + $0xd1] sm:$0xff]  ;;  %v390_v25 = vld [vmem:[%s4065_s5 + $0x180] sm:$0xff] }
  0xa9   : > { %429 = vst.msk [vmem:[#allocation2 + $0x173] sm:$0xff] %vm212_vm0, %v365_v32  ;;  %v546_v42 = vld [vmem:[#allocation2 + $0xc1] sm:$0xff]  ;;  %v393_v32 = vld [vmem:[%s4065_s5 + $0x198] sm:$0xff] }
  0xaa   : > { %428 = vst.msk [vmem:[#allocation2 + $0x163] sm:$0xff] %vm212_vm0, %v364_v33  ;;  %v551_v43 = vld [vmem:[#allocation2 + $0x111] sm:$0xff] }
  0xab   : > { %427 = vst.msk [vmem:[#allocation2 + $0x153] sm:$0xff] %vm212_vm0, %v363_v34  ;;  %v550_v47 = vld [vmem:[#allocation2 + $0x101] sm:$0xff] }
  0xac   : > { %432 = vst.msk [vmem:[#allocation2 + $0x1a3] sm:$0xff] %vm212_vm0, %v368_v38  ;;  %v549_v48 = vld [vmem:[#allocation2 + $0xf1] sm:$0xff] }
  0xad   : > { %996 = vrot.lane.b32.xlu1 %v541_v29, %s3967_s6  ;;  %431 = vst.msk [vmem:[#allocation2 + $0x193] sm:$0xff] %vm212_vm0, %v367_v39  ;;  %v554_v49 = vld [vmem:[#allocation2 + $0x141] sm:$0xff]  ;;  %v397_v38 = vld [vmem:[%s4065_s5 + $0x1b8] sm:$0xff]  ;;  %v396_v39 = vld [vmem:[%s4065_s5 + $0x1b0] sm:$0xff] }
  0xae   : > { %994 = vrot.lane.b32.xlu0 %v540_v30, %s3967_s6  ;;  %430 = vst.msk [vmem:[#allocation2 + $0x183] sm:$0xff] %vm212_vm0, %v366_v40  ;;  %v553_v53 = vld [vmem:[#allocation2 + $0x131] sm:$0xff]  ;;  %v395_v30 = vld [vmem:[%s4065_s5 + $0x1a8] sm:$0xff] }
  0xaf   : > { %1004 = vrot.lane.b32.xlu2 %v545_v31, %s3967_s6  ;;  %435 = vst.msk [vmem:[#allocation2 + $0x1d3] sm:$0xff] %vm212_vm0, %v371_v44  ;;  %v552_v54 = vld [vmem:[#allocation2 + $0x121] sm:$0xff]  ;;  %v401_v44 = vld [vmem:[%s4065_s5 + $0x1d8] sm:$0xff] }
  0xb0   : > { %434 = vst.msk [vmem:[#allocation2 + $0x1c3] sm:$0xff] %vm212_vm0, %v370_v45  ;;  %v557_v55 = vld [vmem:[#allocation2 + $0x171] sm:$0xff]  ;;  %v394_v31 = vld [vmem:[%s4065_s5 + $0x1a0] sm:$0xff] }
  0xb1   : > { %433 = vst.msk [vmem:[#allocation2 + $0x1b3] sm:$0xff] %vm212_vm0, %v369_v46  ;;  %v556_v59 = vld [vmem:[#allocation2 + $0x161] sm:$0xff]  ;;  %v400_v45 = vld [vmem:[%s4065_s5 + $0x1d0] sm:$0xff] }
  0xb2   : > { %438 = vst.msk [vmem:[#allocation2 + $0x203] sm:$0xff] %vm212_vm0, %v374_v50  ;;  %v555_v60 = vld [vmem:[#allocation2 + $0x151] sm:$0xff] }
  0xb3   : > { %437 = vst.msk [vmem:[#allocation2 + $0x1f3] sm:$0xff] %vm212_vm0, %v373_v51  ;;  %v560_v61 = vld [vmem:[#allocation2 + $0x1a1] sm:$0xff] }
  0xb4   : > { %436 = vst.msk [vmem:[#allocation2 + $0x1e3] sm:$0xff] %vm212_vm0, %v372_v52  ;;  %v559_v1 = vld [vmem:[#allocation2 + $0x191] sm:$0xff] }
  0xb5   : > { %1002 = vrot.lane.b32.xlu1 %v544_v35, %s3967_s6  ;;  %441 = vst.msk [vmem:[#allocation2 + $0x233] sm:$0xff] %vm212_vm0, %v377_v56  ;;  %v558_v2 = vld [vmem:[#allocation2 + $0x181] sm:$0xff] }
  0xb6   : > { %1000 = vrot.lane.b32.xlu0 %v543_v36, %s3967_s6  ;;  %440 = vst.msk [vmem:[#allocation2 + $0x223] sm:$0xff] %vm212_vm0, %v376_v57  ;;  %v563_v3 = vld [vmem:[#allocation2 + $0x1d1] sm:$0xff]  ;;  %v402_v56 = vld [vmem:[%s4065_s5 + $0x1e0] sm:$0xff] }
  0xb7   : > { %1010 = vrot.lane.b32.xlu2 %v548_v37, %s3967_s6  ;;  %439 = vst.msk [vmem:[#allocation2 + $0x213] sm:$0xff] %vm212_vm0, %v375_v58  ;;  %v562_v7 = vld [vmem:[#allocation2 + $0x1c1] sm:$0xff] }
  0xb8   : > { %444 = vst.msk [vmem:[#allocation2 + $0x263] sm:$0xff] %vm212_vm0, %v380_v62  ;;  %v561_v8 = vld [vmem:[#allocation2 + $0x1b1] sm:$0xff]  ;;  %v398_v37 = vld [vmem:[%s4065_s5 + $0x1c0] sm:$0xff] }
  0xb9   : > { %443 = vst.msk [vmem:[#allocation2 + $0x253] sm:$0xff] %vm212_vm0, %v379_v63  ;;  %v566_v9 = vld [vmem:[#allocation2 + $0x201] sm:$0xff]  ;;  %v405_v62 = vld [vmem:[%s4065_s5 + $0x1f8] sm:$0xff] }
  0xba   : > { %442 = vst.msk [vmem:[#allocation2 + $0x243] sm:$0xff] %vm212_vm0, %v378_v0  ;;  %v565_v13 = vld [vmem:[#allocation2 + $0x1f1] sm:$0xff] }
  0xbb   : > { %447 = vst.msk [vmem:[#allocation2 + $0x293] sm:$0xff] %vm212_vm0, %v383_v4  ;;  %v564_v14 = vld [vmem:[#allocation2 + $0x1e1] sm:$0xff] }
  0xbc   : > { %446 = vst.msk [vmem:[#allocation2 + $0x283] sm:$0xff] %vm212_vm0, %v382_v5  ;;  %v569_v15 = vld [vmem:[#allocation2 + $0x231] sm:$0xff] }
  0xbd   : > { %1008 = vrot.lane.b32.xlu1 %v547_v41, %s3967_s6  ;;  %445 = vst.msk [vmem:[#allocation2 + $0x273] sm:$0xff] %vm212_vm0, %v381_v6  ;;  %v568_v20 = vld [vmem:[#allocation2 + $0x221] sm:$0xff] }
  0xbe   : > { %1006 = vrot.lane.b32.xlu0 %v546_v42, %s3967_s6  ;;  %450 = vst.msk [vmem:[#allocation2 + $0x2c3] sm:$0xff] %vm212_vm0, %v386_v10  ;;  %v567_v21 = vld [vmem:[#allocation2 + $0x211] sm:$0xff] }
  0xbf   : > { %1016 = vrot.lane.b32.xlu2 %v551_v43, %s3967_s6  ;;  %449 = vst.msk [vmem:[#allocation2 + $0x2b3] sm:$0xff] %vm212_vm0, %v385_v11  ;;  %v572_v22 = vld [vmem:[#allocation2 + $0x261] sm:$0xff] }
  0xc0   : > { %448 = vst.msk [vmem:[#allocation2 + $0x2a3] sm:$0xff] %vm212_vm0, %v384_v12  ;;  %v571_v27 = vld [vmem:[#allocation2 + $0x251] sm:$0xff] }
  0xc1   : > { %453 = vst.msk [vmem:[#allocation2 + $0x2f3] sm:$0xff] %vm212_vm0, %v389_v16  ;;  %v570_v28 = vld [vmem:[#allocation2 + $0x241] sm:$0xff] }
  0xc2   : > { %452 = vst.msk [vmem:[#allocation2 + $0x2e3] sm:$0xff] %vm212_vm0, %v388_v17  ;;  %v575_v29 = vld [vmem:[#allocation2 + $0x291] sm:$0xff] }
  0xc3   : > { %451 = vst.msk [vmem:[#allocation2 + $0x2d3] sm:$0xff] %vm212_vm0, %v387_v18  ;;  %v574_v34 = vld [vmem:[#allocation2 + $0x281] sm:$0xff] }
  0xc4   : > { %456 = vst.msk [vmem:[#allocation2 + $0x323] sm:$0xff] %vm212_vm0, %v392_v23  ;;  %v573_v35 = vld [vmem:[#allocation2 + $0x271] sm:$0xff] }
  0xc5   : > { %1014 = vrot.lane.b32.xlu1 %v550_v47, %s3967_s6  ;;  %455 = vst.msk [vmem:[#allocation2 + $0x313] sm:$0xff] %vm212_vm0, %v391_v24  ;;  %v578_v36 = vld [vmem:[#allocation2 + $0x2c1] sm:$0xff]  ;;  %v599_v23 = vld [vmem:[#allocation2 + $0x12] sm:$0xff] }
  0xc6   : > { %1012 = vrot.lane.b32.xlu0 %v549_v48, %s3967_s6  ;;  %454 = vst.msk [vmem:[#allocation2 + $0x303] sm:$0xff] %vm212_vm0, %v390_v25  ;;  %v577_v41 = vld [vmem:[#allocation2 + $0x2b1] sm:$0xff]  ;;  %v399_v47 = vld [vmem:[%s4065_s5 + $0x1c8] sm:$0xff] }
  0xc7   : > { %1022 = vrot.lane.b32.xlu2 %v554_v49, %s3967_s6  ;;  %459 = vst.msk [vmem:[#allocation2 + $0x353] sm:$0xff] %vm212_vm0, %v395_v30  ;;  %v576_v42 = vld [vmem:[#allocation2 + $0x2a1] sm:$0xff] }
  0xc8   : > { %458 = vst.msk [vmem:[#allocation2 + $0x343] sm:$0xff] %vm212_vm0, %v394_v31  ;;  %v581_v43 = vld [vmem:[#allocation2 + $0x2f1] sm:$0xff]  ;;  %v602_v30 = vld [vmem:[#allocation2 + $0x42] sm:$0xff] }
  0xc9   : > { %457 = vst.msk [vmem:[#allocation2 + $0x333] sm:$0xff] %vm212_vm0, %v393_v32  ;;  %v580_v50 = vld [vmem:[#allocation2 + $0x2e1] sm:$0xff] }
  0xca   : > { %462 = vst.msk [vmem:[#allocation2 + $0x383] sm:$0xff] %vm212_vm0, %v398_v37  ;;  %v579_v51 = vld [vmem:[#allocation2 + $0x2d1] sm:$0xff] }
  0xcb   : > { %461 = vst.msk [vmem:[#allocation2 + $0x373] sm:$0xff] %vm212_vm0, %v397_v38  ;;  %v584_v52 = vld [vmem:[#allocation2 + $0x321] sm:$0xff]  ;;  %v605_v37 = vld [vmem:[#allocation2 + $0x72] sm:$0xff] }
  0xcc   : > { %460 = vst.msk [vmem:[#allocation2 + $0x363] sm:$0xff] %vm212_vm0, %v396_v39 }
  0xcd   : > { %1020 = vrot.lane.b32.xlu1 %v553_v53, %s3967_s6  ;;  %465 = vst.msk [vmem:[#allocation2 + $0x3b3] sm:$0xff] %vm212_vm0, %v401_v44  ;;  %v404_v53 = vld [vmem:[%s4065_s5 + $0x1f0] sm:$0xff]  ;;  %v608_v44 = vld [vmem:[#allocation2 + $0xa2] sm:$0xff] }
  0xce   : > { %1018 = vrot.lane.b32.xlu0 %v552_v54, %s3967_s6  ;;  %464 = vst.msk [vmem:[#allocation2 + $0x3a3] sm:$0xff] %vm212_vm0, %v400_v45  ;;  %v403_v54 = vld [vmem:[%s4065_s5 + $0x1e8] sm:$0xff] }
  0xcf   : > { %1028 = vrot.lane.b32.xlu2 %v557_v55, %s3967_s6  ;;  %463 = vst.msk [vmem:[#allocation2 + $0x393] sm:$0xff] %vm212_vm0, %v399_v47 }
  0xd0   : > { %468 = vst.msk [vmem:[#allocation2 + $0x3e3] sm:$0xff] %vm212_vm0, %v404_v53  ;;  %v611_v53 = vld [vmem:[#allocation2 + $0xd2] sm:$0xff] }
  0xd1   : > { %467 = vst.msk [vmem:[#allocation2 + $0x3d3] sm:$0xff] %vm212_vm0, %v403_v54  ;;  %v590_v4 = vld [vmem:[#allocation2 + $0x381] sm:$0xff] }
  0xd2   : > { %466 = vst.msk [vmem:[#allocation2 + $0x3c3] sm:$0xff] %vm212_vm0, %v402_v56 }
  0xd3   : > { %469 = vst.msk [vmem:[#allocation2 + $0x3f3] sm:$0xff] %vm212_vm0, %v405_v62  ;;  %v614_v62 = vld [vmem:[#allocation2 + $0x102] sm:$0xff] }
  0xd4   : > { %v593_v10 = vld [vmem:[#allocation2 + $0x3b1] sm:$0xff] }
  0xd5   : > { %1026 = vrot.lane.b32.xlu1 %v556_v59, %s3967_s6  ;;  %v583_v59 = vld [vmem:[#allocation2 + $0x311] sm:$0xff] }
  0xd6   : > { %1024 = vrot.lane.b32.xlu0 %v555_v60, %s3967_s6  ;;  %v582_v60 = vld [vmem:[#allocation2 + $0x301] sm:$0xff] }
  0xd7   : > { %1034 = vrot.lane.b32.xlu2 %v560_v61, %s3967_s6  ;;  %v587_v61 = vld [vmem:[#allocation2 + $0x351] sm:$0xff]  ;;  %v596_v16 = vld [vmem:[#allocation2 + $0x3e1] sm:$0xff] }
  0xdd   : > { %1032 = vrot.lane.b32.xlu1 %v559_v1, %s3967_s6 }
  0xde   : > { %1030 = vrot.lane.b32.xlu0 %v558_v2, %s3967_s6  ;;  %v586_v2 = vld [vmem:[#allocation2 + $0x341] sm:$0xff] }
  0xdf   : > { %1040 = vrot.lane.b32.xlu2 %v563_v3, %s3967_s6  ;;  %v585_v3 = vld [vmem:[#allocation2 + $0x331] sm:$0xff] }
  0xe5   : > { %1038 = vrot.lane.b32.xlu1 %v562_v7, %s3967_s6 }
  0xe6   : > { %1036 = vrot.lane.b32.xlu0 %v561_v8, %s3967_s6  ;;  %v589_v8 = vld [vmem:[#allocation2 + $0x371] sm:$0xff] }
  0xe7   : > { %1046 = vrot.lane.b32.xlu2 %v566_v9, %s3967_s6  ;;  %v588_v9 = vld [vmem:[#allocation2 + $0x361] sm:$0xff] }
  0xed   : > { %1044 = vrot.lane.b32.xlu1 %v565_v13, %s3967_s6 }
  0xee   : > { %1042 = vrot.lane.b32.xlu0 %v564_v14, %s3967_s6  ;;  %v592_v14 = vld [vmem:[#allocation2 + $0x3a1] sm:$0xff] }
  0xef   : > { %1052 = vrot.lane.b32.xlu2 %v569_v15, %s3967_s6  ;;  %v591_v15 = vld [vmem:[#allocation2 + $0x391] sm:$0xff] }
  0xf5   : > { %1050 = vrot.lane.b32.xlu1 %v568_v20, %s3967_s6 }
  0xf6   : > { %1048 = vrot.lane.b32.xlu0 %v567_v21, %s3967_s6  ;;  %v595_v21 = vld [vmem:[#allocation2 + $0x3d1] sm:$0xff] }
  0xf7   : > { %1058 = vrot.lane.b32.xlu2 %v572_v22, %s3967_s6  ;;  %v594_v22 = vld [vmem:[#allocation2 + $0x3c1] sm:$0xff] }
  0xf9   : > { %v4454_v26 = vpop.permute.xlu2 %992 }
  0xfd   : > { %1056 = vrot.lane.b32.xlu1 %v571_v27, %s3967_s6 }
  0xfe   : > { %1054 = vrot.lane.b32.xlu0 %v570_v28, %s3967_s6  ;;  %v598_v28 = vld [vmem:[#allocation2 + $0x2] sm:$0xff] }
  0xff   : > { %1064 = vrot.lane.b32.xlu2 %v575_v29, %s3967_s6  ;;  %v597_v29 = vld [vmem:[#allocation2 + $0x3f1] sm:$0xff] }
 0x101   : > { %v4465_v33 = vpop.permute.xlu2 %998 }
 0x102   : > { %6738 = vst [vmem:[#allocation6_spill] sm:$0xff] %v4465_v33  ;;  %v801_v33 = vld [vmem:[#allocation2 + $0xb5] sm:$0xff] }
 0x105   : > { %1062 = vrot.lane.b32.xlu1 %v574_v34, %s3967_s6 }
 0x106   : > { %1060 = vrot.lane.b32.xlu0 %v573_v35, %s3967_s6  ;;  %v601_v35 = vld [vmem:[#allocation2 + $0x32] sm:$0xff] }
 0x107   : > { %1070 = vrot.lane.b32.xlu2 %v578_v36, %s3967_s6  ;;  %v600_v36 = vld [vmem:[#allocation2 + $0x22] sm:$0xff] }
 0x109   : > { %v4476_v40 = vpop.permute.xlu2 %1004 }
 0x10a   : > { %6739 = vst [vmem:[#allocation7_spill] sm:$0xff] %v4476_v40  ;;  %v717_v40 = vld [vmem:[#allocation2 + $0x373] sm:$0xff] }
 0x10d   : > { %1068 = vrot.lane.b32.xlu1 %v577_v41, %s3967_s6 }
 0x10e   : > { %1066 = vrot.lane.b32.xlu0 %v576_v42, %s3967_s6  ;;  %v604_v42 = vld [vmem:[#allocation2 + $0x62] sm:$0xff] }
 0x10f   : > { %v4483_v46 = vpop.permute.xlu1 %986  ;;  %1076 = vrot.lane.b32.xlu2 %v581_v43, %s3967_s6  ;;  %v603_v43 = vld [vmem:[#allocation2 + $0x52] sm:$0xff] }
 0x110   : > { %v4488_v48 = vpop.permute.xlu0 %982 }
 0x111   : > { %v4491_v49 = vpop.permute.xlu2 %1010 }
 0x112   : > { %6740 = vst [vmem:[#allocation8_spill] sm:$0xff] %v4491_v49  ;;  %v668_v49 = vld [vmem:[#allocation2 + $0x63] sm:$0xff] }
 0x115   : > { %1074 = vrot.lane.b32.xlu1 %v580_v50, %s3967_s6 }
 0x116   : > { %1072 = vrot.lane.b32.xlu0 %v579_v51, %s3967_s6  ;;  %v607_v51 = vld [vmem:[#allocation2 + $0x92] sm:$0xff] }
 0x117   : > { %v4498_v55 = vpop.permute.xlu1 %988  ;;  %1082 = vrot.lane.b32.xlu2 %v584_v52, %s3967_s6  ;;  %v606_v52 = vld [vmem:[#allocation2 + $0x82] sm:$0xff] }
 0x118   : > { %v4503_v57 = vpop.permute.xlu0 %984 }
 0x119   : > { %v4506_v58 = vpop.permute.xlu2 %1016 }
 0x11d   : > { %1080 = vrot.lane.b32.xlu1 %v583_v59, %s3967_s6 }
 0x11e   : > { %1078 = vrot.lane.b32.xlu0 %v582_v60, %s3967_s6  ;;  %v610_v60 = vld [vmem:[#allocation2 + $0xc2] sm:$0xff] }
 0x11f   : > { %v4512_v63 = vpop.permute.xlu1 %996  ;;  %1088 = vrot.lane.b32.xlu2 %v587_v61, %s3967_s6  ;;  %v609_v61 = vld [vmem:[#allocation2 + $0xb2] sm:$0xff] }
 0x120   : > { %v4515_v0 = vpop.permute.xlu0 %994 }
 0x121   : > { %v4517_v1 = vpop.permute.xlu2 %1022 }
 0x122   : > { %6741 = vst [vmem:[#allocation9_spill] sm:$0xff] %v4517_v1 }
 0x125   : > { %1086 = vrot.lane.b32.xlu1 %v586_v2, %s3967_s6 }
 0x126   : > { %1084 = vrot.lane.b32.xlu0 %v585_v3, %s3967_s6 }
 0x127   : > { %v4521_v5 = vpop.permute.xlu1 %1002  ;;  %1094 = vrot.lane.b32.xlu2 %v590_v4, %s3967_s6 }
 0x128   : > { %6742 = vst [vmem:[#allocation10_spill] sm:$0xff] %v4521_v5  ;;  %v4524_v6 = vpop.permute.xlu0 %1000  ;;  %v734_v5 = vld [vmem:[#allocation2 + $0x84] sm:$0xff] }
 0x129   : > { %6743 = vst [vmem:[#allocation11_spill] sm:$0xff] %v4524_v6  ;;  %v4526_v7 = vpop.permute.xlu2 %1028  ;;  %v777_v6 = vld [vmem:[#allocation2 + $0x334] sm:$0xff] }
 0x12a   : > { %6744 = vst [vmem:[#allocation12_spill] sm:$0xff] %v4526_v7  ;;  %v719_v7 = vld [vmem:[#allocation2 + $0x393] sm:$0xff] }
 0x12d   : > { %1092 = vrot.lane.b32.xlu1 %v589_v8, %s3967_s6  ;;  %v613_v8 = vld [vmem:[#allocation2 + $0xf2] sm:$0xff] }
 0x12e   : > { %1090 = vrot.lane.b32.xlu0 %v588_v9, %s3967_s6  ;;  %v612_v9 = vld [vmem:[#allocation2 + $0xe2] sm:$0xff] }
 0x12f   : > { %v4530_v11 = vpop.permute.xlu1 %1008  ;;  %1100 = vrot.lane.b32.xlu2 %v593_v10, %s3967_s6  ;;  %v617_v10 = vld [vmem:[#allocation2 + $0x132] sm:$0xff] }
 0x130   : > { %6745 = vst [vmem:[#allocation13_spill] sm:$0xff] %v4530_v11  ;;  %v4533_v12 = vpop.permute.xlu0 %1006 }
 0x131   : > { %6746 = vst [vmem:[#allocation14_spill] sm:$0xff] %v4533_v12  ;;  %v4535_v13 = vpop.permute.xlu2 %1034 }
 0x132   : > { %6747 = vst [vmem:[#allocation15_spill] sm:$0xff] %v4535_v13  ;;  %v665_v13 = vld [vmem:[#allocation2 + $0x33] sm:$0xff] }
 0x135   : > { %1098 = vrot.lane.b32.xlu1 %v592_v14, %s3967_s6 }
 0x136   : > { %1096 = vrot.lane.b32.xlu0 %v591_v15, %s3967_s6 }
 0x137   : > { %v4539_v17 = vpop.permute.xlu1 %1014  ;;  %1106 = vrot.lane.b32.xlu2 %v596_v16, %s3967_s6 }
 0x138   : > { %v4542_v18 = vpop.permute.xlu0 %1012 }
 0x139   : > { %6748 = vst [vmem:[#allocation16_spill] sm:$0xff] %v4542_v18  ;;  %v4544_v20 = vpop.permute.xlu2 %1040 }
 0x13a   : > { %6749 = vst [vmem:[#allocation17_spill] sm:$0xff] %v4544_v20 }
 0x13d   : > { %1104 = vrot.lane.b32.xlu1 %v595_v21, %s3967_s6  ;;  %v616_v21 = vld [vmem:[#allocation2 + $0x122] sm:$0xff] }
 0x13e   : > { %1102 = vrot.lane.b32.xlu0 %v594_v22, %s3967_s6  ;;  %v615_v22 = vld [vmem:[#allocation2 + $0x112] sm:$0xff] }
 0x13f   : > { %v4548_v24 = vpop.permute.xlu1 %1020  ;;  %1240 = vrot.lane.b32.xlu2 %v599_v23, %s3968_s7  ;;  %v620_v23 = vld [vmem:[#allocation2 + $0x162] sm:$0xff] }
 0x140   : > { %v4551_v25 = vpop.permute.xlu0 %1018 }
 0x141   : > { %v4553_v27 = vpop.permute.xlu2 %1046 }
 0x145   : > { %1238 = vrot.lane.b32.xlu1 %v598_v28, %s3968_s7 }
 0x146   : > { %1108 = vrot.lane.b32.xlu0 %v597_v29, %s3967_s6 }
 0x147   : > { %v4557_v31 = vpop.permute.xlu1 %1026  ;;  %1246 = vrot.lane.b32.xlu2 %v602_v30, %s3968_s7 }
 0x148   : > { %6750 = vst [vmem:[#allocation18_spill] sm:$0xff] %v4557_v31  ;;  %v4560_v32 = vpop.permute.xlu0 %1024  ;;  %v731_v31 = vld [vmem:[#allocation2 + $0x54] sm:$0xff] }
 0x149   : > { %6751 = vst [vmem:[#allocation19_spill] sm:$0xff] %v4560_v32  ;;  %v4562_v34 = vpop.permute.xlu2 %1052  ;;  %v774_v32 = vld [vmem:[#allocation2 + $0x304] sm:$0xff] }
 0x14a   : > { %6752 = vst [vmem:[#allocation20_spill] sm:$0xff] %v4562_v34 }
 0x14d   : > { %1244 = vrot.lane.b32.xlu1 %v601_v35, %s3968_s7  ;;  %v619_v35 = vld [vmem:[#allocation2 + $0x152] sm:$0xff] }
 0x14e   : > { %1242 = vrot.lane.b32.xlu0 %v600_v36, %s3968_s7  ;;  %v618_v36 = vld [vmem:[#allocation2 + $0x142] sm:$0xff] }
 0x14f   : > { %v4566_v38 = vpop.permute.xlu1 %1032  ;;  %1252 = vrot.lane.b32.xlu2 %v605_v37, %s3968_s7  ;;  %v623_v37 = vld [vmem:[#allocation2 + $0x192] sm:$0xff] }
 0x150   : > { %6753 = vst [vmem:[#allocation21_spill] sm:$0xff] %v4566_v38  ;;  %v4569_v39 = vpop.permute.xlu0 %1030  ;;  %v669_v38 = vld [vmem:[#allocation2 + $0x73] sm:$0xff] }
 0x151   : > { %6754 = vst [vmem:[#allocation22_spill] sm:$0xff] %v4569_v39  ;;  %v4571_v41 = vpop.permute.xlu2 %1058 }
 0x152   : > { %6755 = vst [vmem:[#allocation23_spill] sm:$0xff] %v4571_v41  ;;  %v671_v41 = vld [vmem:[#allocation2 + $0x93] sm:$0xff] }
 0x155   : > { %1250 = vrot.lane.b32.xlu1 %v604_v42, %s3968_s7 }
 0x156   : > { %1248 = vrot.lane.b32.xlu0 %v603_v43, %s3968_s7 }
 0x157   : > { %v4575_v45 = vpop.permute.xlu1 %1038  ;;  %1258 = vrot.lane.b32.xlu2 %v608_v44, %s3968_s7 }
 0x158   : > { %6756 = vst [vmem:[#allocation24_spill] sm:$0xff] %v4575_v45  ;;  %v4578_v47 = vpop.permute.xlu0 %1036 }
 0x159   : > { %6757 = vst [vmem:[#allocation25_spill] sm:$0xff] %v4578_v47  ;;  %v4580_v50 = vpop.permute.xlu2 %1064  ;;  %v657_v47 = vld [vmem:[#allocation2 + $0x3b2] sm:$0xff] }
 0x15a   : > { %6758 = vst [vmem:[#allocation26_spill] sm:$0xff] %v4580_v50  ;;  %v656_v50 = vld [vmem:[#allocation2 + $0x3a2] sm:$0xff] }
 0x15d   : > { %1256 = vrot.lane.b32.xlu1 %v607_v51, %s3968_s7  ;;  %v622_v51 = vld [vmem:[#allocation2 + $0x182] sm:$0xff] }
 0x15e   : > { %1254 = vrot.lane.b32.xlu0 %v606_v52, %s3968_s7  ;;  %v621_v52 = vld [vmem:[#allocation2 + $0x172] sm:$0xff] }
 0x15f   : > { %v4584_v54 = vpop.permute.xlu1 %1044  ;;  %1264 = vrot.lane.b32.xlu2 %v611_v53, %s3968_s7  ;;  %v626_v53 = vld [vmem:[#allocation2 + $0x1c2] sm:$0xff] }
 0x160   : > { %6759 = vst [vmem:[#allocation27_spill] sm:$0xff] %v4584_v54  ;;  %v4587_v56 = vpop.permute.xlu0 %1042 }
 0x161   : > { %6760 = vst [vmem:[#allocation28_spill] sm:$0xff] %v4587_v56  ;;  %v4589_v59 = vpop.permute.xlu2 %1070 }
 0x162   : > { %6761 = vst [vmem:[#allocation29_spill] sm:$0xff] %v4589_v59 }
 0x165   : > { %1262 = vrot.lane.b32.xlu1 %v610_v60, %s3968_s7 }
 0x166   : > { %1260 = vrot.lane.b32.xlu0 %v609_v61, %s3968_s7 }
 0x167   : > { %v4593_v2 = vpop.permute.xlu1 %1050  ;;  %1270 = vrot.lane.b32.xlu2 %v614_v62, %s3968_s7 }
 0x168   : > { %6762 = vst [vmem:[#allocation30_spill] sm:$0xff] %v4593_v2  ;;  %v4596_v3 = vpop.permute.xlu0 %1048  ;;  %v741_v2 = vld [vmem:[#allocation2 + $0xf4] sm:$0xff] }
 0x169   : > { %6763 = vst [vmem:[#allocation31_spill] sm:$0xff] %v4596_v3  ;;  %v4598_v4 = vpop.permute.xlu2 %1076  ;;  %v780_v3 = vld [vmem:[#allocation2 + $0x364] sm:$0xff] }
 0x16a   : > { %6764 = vst [vmem:[#allocation32_spill] sm:$0xff] %v4598_v4  ;;  %v638_v4 = vld [vmem:[#allocation2 + $0x282] sm:$0xff] }
 0x16d   : > { %1268 = vrot.lane.b32.xlu1 %v613_v8, %s3968_s7  ;;  %v625_v8 = vld [vmem:[#allocation2 + $0x1b2] sm:$0xff] }
 0x16e   : > { %1266 = vrot.lane.b32.xlu0 %v612_v9, %s3968_s7  ;;  %v624_v9 = vld [vmem:[#allocation2 + $0x1a2] sm:$0xff] }
 0x16f   : > { %v4602_v14 = vpop.permute.xlu1 %1056  ;;  %1276 = vrot.lane.b32.xlu2 %v617_v10, %s3968_s7  ;;  %v629_v10 = vld [vmem:[#allocation2 + $0x1f2] sm:$0xff] }
 0x170   : > { %6765 = vst [vmem:[#allocation33_spill] sm:$0xff] %v4602_v14  ;;  %v4605_v15 = vpop.permute.xlu0 %1054  ;;  %v681_v14 = vld [vmem:[#allocation2 + $0x133] sm:$0xff] }
 0x171   : > { %6766 = vst [vmem:[#allocation34_spill] sm:$0xff] %v4605_v15  ;;  %v4607_v16 = vpop.permute.xlu2 %1082  ;;  %v716_v15 = vld [vmem:[#allocation2 + $0x363] sm:$0xff] }
 0x172   : > { %6767 = vst [vmem:[#allocation35_spill] sm:$0xff] %v4607_v16  ;;  %v666_v16 = vld [vmem:[#allocation2 + $0x43] sm:$0xff] }
 0x175   : > { %1274 = vrot.lane.b32.xlu1 %v616_v21, %s3968_s7 }
 0x176   : > { %1272 = vrot.lane.b32.xlu0 %v615_v22, %s3968_s7 }
 0x177   : > { %v4611_v28 = vpop.permute.xlu1 %1062  ;;  %1282 = vrot.lane.b32.xlu2 %v620_v23, %s3968_s7 }
 0x178   : > { %6768 = vst [vmem:[#allocation36_spill] sm:$0xff] %v4611_v28  ;;  %v4614_v29 = vpop.permute.xlu0 %1060  ;;  %v659_v28 = vld [vmem:[#allocation2 + $0x3d2] sm:$0xff] }
 0x179   : > { %6769 = vst [vmem:[#allocation37_spill] sm:$0xff] %v4614_v29  ;;  %v4616_v30 = vpop.permute.xlu2 %1088 }
 0x17a   : > { %6770 = vst [vmem:[#allocation38_spill] sm:$0xff] %v4616_v30  ;;  %v651_v30 = vld [vmem:[#allocation2 + $0x352] sm:$0xff] }
 0x17d   : > { %1280 = vrot.lane.b32.xlu1 %v619_v35, %s3968_s7  ;;  %v628_v35 = vld [vmem:[#allocation2 + $0x1e2] sm:$0xff] }
 0x17e   : > { %1278 = vrot.lane.b32.xlu0 %v618_v36, %s3968_s7  ;;  %v627_v36 = vld [vmem:[#allocation2 + $0x1d2] sm:$0xff] }
 0x17f   : > { %v4620_v42 = vpop.permute.xlu1 %1068  ;;  %1288 = vrot.lane.b32.xlu2 %v623_v37, %s3968_s7  ;;  %v632_v37 = vld [vmem:[#allocation2 + $0x222] sm:$0xff] }
 0x180   : > { %6771 = vst [vmem:[#allocation39_spill] sm:$0xff] %v4620_v42  ;;  %v4623_v43 = vpop.permute.xlu0 %1066  ;;  %v645_v42 = vld [vmem:[#allocation2 + $0x2f2] sm:$0xff] }
 0x181   : > { %6772 = vst [vmem:[#allocation40_spill] sm:$0xff] %v4623_v43  ;;  %v4625_v44 = vpop.permute.xlu2 %1094  ;;  %v653_v43 = vld [vmem:[#allocation2 + $0x372] sm:$0xff] }
 0x182   : > { %6773 = vst [vmem:[#allocation41_spill] sm:$0xff] %v4625_v44  ;;  %v641_v44 = vld [vmem:[#allocation2 + $0x2b2] sm:$0xff] }
 0x185   : > { %1286 = vrot.lane.b32.xlu1 %v622_v51, %s3968_s7 }
 0x186   : > { %1284 = vrot.lane.b32.xlu0 %v621_v52, %s3968_s7 }
 0x187   : > { %v4629_v60 = vpop.permute.xlu1 %1074  ;;  %1294 = vrot.lane.b32.xlu2 %v626_v53, %s3968_s7 }
 0x188   : > { %6774 = vst [vmem:[#allocation42_spill] sm:$0xff] %v4629_v60  ;;  %v4632_v61 = vpop.permute.xlu0 %1072 }
 0x189   : > { %6775 = vst [vmem:[#allocation43_spill] sm:$0xff] %v4632_v61  ;;  %v4634_v62 = vpop.permute.xlu2 %1100  ;;  %v636_v61 = vld [vmem:[#allocation2 + $0x262] sm:$0xff] }
 0x18a   : > { %6776 = vst [vmem:[#allocation44_spill] sm:$0xff] %v4634_v62  ;;  %v633_v62 = vld [vmem:[#allocation2 + $0x232] sm:$0xff] }
 0x18d   : > { %1292 = vrot.lane.b32.xlu1 %v625_v8, %s3968_s7  ;;  %v631_v8 = vld [vmem:[#allocation2 + $0x212] sm:$0xff] }
 0x18e   : > { %1290 = vrot.lane.b32.xlu0 %v624_v9, %s3968_s7  ;;  %v630_v9 = vld [vmem:[#allocation2 + $0x202] sm:$0xff] }
 0x18f   : > { %v4638_v21 = vpop.permute.xlu1 %1080  ;;  %1300 = vrot.lane.b32.xlu2 %v629_v10, %s3968_s7  ;;  %v635_v10 = vld [vmem:[#allocation2 + $0x252] sm:$0xff] }
 0x190   : > { %6777 = vst [vmem:[#allocation45_spill] sm:$0xff] %v4638_v21  ;;  %v4641_v22 = vpop.permute.xlu0 %1078  ;;  %v678_v21 = vld [vmem:[#allocation2 + $0x103] sm:$0xff] }
 0x191   : > { %6778 = vst [vmem:[#allocation46_spill] sm:$0xff] %v4641_v22  ;;  %v4643_v23 = vpop.permute.xlu2 %1106 }
 0x192   : > { %6779 = vst [vmem:[#allocation47_spill] sm:$0xff] %v4643_v23 }
 0x195   : > { %1298 = vrot.lane.b32.xlu1 %v628_v35, %s3968_s7 }
 0x196   : > { %1296 = vrot.lane.b32.xlu0 %v627_v36, %s3968_s7 }
 0x197   : > { %v4647_v51 = vpop.permute.xlu1 %1086  ;;  %1306 = vrot.lane.b32.xlu2 %v632_v37, %s3968_s7  ;;  %v634_v37 = vld [vmem:[#allocation2 + $0x242] sm:$0xff] }
 0x198   : > { %6780 = vst [vmem:[#allocation48_spill] sm:$0xff] %v4647_v51  ;;  %v4650_v52 = vpop.permute.xlu0 %1084  ;;  %v654_v51 = vld [vmem:[#allocation2 + $0x382] sm:$0xff] }
 0x199   : > { %6781 = vst [vmem:[#allocation49_spill] sm:$0xff] %v4650_v52  ;;  %v4652_v53 = vpop.permute.xlu2 %1240  ;;  %v662_v52 = vld [vmem:[#allocation2 + $0x3] sm:$0xff] }
 0x19d   : > { %1304 = vrot.lane.b32.xlu1 %v631_v8, %s3968_s7 }
 0x19e   : > { %1302 = vrot.lane.b32.xlu0 %v630_v9, %s3968_s7 }
 0x19f   : > { %v4656_v23 = vpop.permute.xlu1 %1092  ;;  %1312 = vrot.lane.b32.xlu2 %v635_v10, %s3968_s7  ;;  %v637_v10 = vld [vmem:[#allocation2 + $0x272] sm:$0xff] }
 0x1a0   : > { %6782 = vst [vmem:[#allocation50_spill] sm:$0xff] %v4656_v23  ;;  %v4659_v35 = vpop.permute.xlu0 %1090 }
 0x1a1   : > { %6783 = vst [vmem:[#allocation51_spill] sm:$0xff] %v4659_v35  ;;  %v4661_v36 = vpop.permute.xlu2 %1246  ;;  %v648_v35 = vld [vmem:[#allocation2 + $0x322] sm:$0xff] }
 0x1a5   : > { %1310 = vrot.lane.b32.xlu1 %v634_v37, %s3968_s7 }
 0x1a6   : > { %1308 = vrot.lane.b32.xlu0 %v633_v62, %s3968_s7 }
 0x1a7   : > { %v4665_v60 = vpop.permute.xlu1 %1098  ;;  %1318 = vrot.lane.b32.xlu2 %v638_v4, %s3968_s7  ;;  %v640_v4 = vld [vmem:[#allocation2 + $0x2a2] sm:$0xff] }
 0x1a8   : > { %6784 = vst [vmem:[#allocation52_spill] sm:$0xff] %v4665_v60  ;;  %v4668_v8 = vpop.permute.xlu0 %1096  ;;  %v639_v60 = vld [vmem:[#allocation2 + $0x292] sm:$0xff] }
 0x1a9   : > { %6785 = vst [vmem:[#allocation53_spill] sm:$0xff] %v4668_v8  ;;  %v4670_v9 = vpop.permute.xlu2 %1252  ;;  %v644_v8 = vld [vmem:[#allocation2 + $0x2e2] sm:$0xff] }
 0x1ad   : > { %1316 = vrot.lane.b32.xlu1 %v637_v10, %s3968_s7 }
 0x1ae   : > { %1314 = vrot.lane.b32.xlu0 %v636_v61, %s3968_s7 }
 0x1af   : > { %v4674_v59 = vpop.permute.xlu1 %1104  ;;  %1324 = vrot.lane.b32.xlu2 %v641_v44, %s3968_s7  ;;  %v643_v44 = vld [vmem:[#allocation2 + $0x2d2] sm:$0xff] }
 0x1b0   : > { %6786 = vst [vmem:[#allocation54_spill] sm:$0xff] %v4674_v59  ;;  %v4677_v62 = vpop.permute.xlu0 %1102  ;;  %v642_v59 = vld [vmem:[#allocation2 + $0x2c2] sm:$0xff] }
 0x1b1   : > { %6787 = vst [vmem:[#allocation55_spill] sm:$0xff] %v4677_v62  ;;  %v4679_v37 = vpop.permute.xlu2 %1258  ;;  %v647_v62 = vld [vmem:[#allocation2 + $0x312] sm:$0xff] }
 0x1b2   : > { %6788 = vst [vmem:[#allocation56_spill] sm:$0xff] %v4679_v37  ;;  %v729_v37 = vld [vmem:[#allocation2 + $0x34] sm:$0xff] }
 0x1b5   : > { %1322 = vrot.lane.b32.xlu1 %v640_v4, %s3968_s7 }
 0x1b6   : > { %1320 = vrot.lane.b32.xlu0 %v639_v60, %s3968_s7 }
 0x1b7   : > { %v4683_v54 = vpop.permute.xlu1 %1238  ;;  %1330 = vrot.lane.b32.xlu2 %v644_v8, %s3968_s7  ;;  %v646_v8 = vld [vmem:[#allocation2 + $0x302] sm:$0xff] }
 0x1b8   : > { %v4686_v61 = vpop.permute.xlu0 %1108 }
 0x1b9   : > { %6789 = vst [vmem:[#allocation57_spill] sm:$0xff] %v4686_v61  ;;  %v4688_v10 = vpop.permute.xlu2 %1264  ;;  %v650_v61 = vld [vmem:[#allocation2 + $0x342] sm:$0xff] }
 0x1ba   : > { %6790 = vst [vmem:[#allocation58_spill] sm:$0xff] %v4688_v10  ;;  %v674_v10 = vld [vmem:[#allocation2 + $0xc3] sm:$0xff] }
 0x1bd   : > { %1328 = vrot.lane.b32.xlu1 %v643_v44, %s3968_s7 }
 0x1be   : > { %1326 = vrot.lane.b32.xlu0 %v642_v59, %s3968_s7 }
 0x1bf   : > { %v4692_v23 = vpop.permute.xlu1 %1244  ;;  %1336 = vrot.lane.b32.xlu2 %v647_v62, %s3968_s7  ;;  %v649_v62 = vld [vmem:[#allocation2 + $0x332] sm:$0xff] }
 0x1c0   : > { %v4695_v60 = vpop.permute.xlu0 %1242 }
 0x1c1   : > { %v4697_v4 = vpop.permute.xlu2 %1270 }
 0x1c5   : > { %1334 = vrot.lane.b32.xlu1 %v646_v8, %s3968_s7 }
 0x1c6   : > { %1332 = vrot.lane.b32.xlu0 %v645_v42, %s3968_s7 }
 0x1c7   : > { %v4701_v56 = vpop.permute.xlu1 %1250  ;;  %1342 = vrot.lane.b32.xlu2 %v650_v61, %s3968_s7  ;;  %v652_v61 = vld [vmem:[#allocation2 + $0x362] sm:$0xff] }
 0x1c8   : > { %v4704_v59 = vpop.permute.xlu0 %1248 }
 0x1c9   : > { %v4706_v44 = vpop.permute.xlu2 %1276 }
 0x1cd   : > { %1340 = vrot.lane.b32.xlu1 %v649_v62, %s3968_s7 }
 0x1ce   : > { %1338 = vrot.lane.b32.xlu0 %v648_v35, %s3968_s7 }
 0x1cf   : > { %v4710_v20 = vpop.permute.xlu1 %1256  ;;  %1348 = vrot.lane.b32.xlu2 %v653_v43, %s3968_s7  ;;  %v655_v43 = vld [vmem:[#allocation2 + $0x392] sm:$0xff] }
 0x1d0   : > { %6791 = vst [vmem:[#allocation59_spill] sm:$0xff] %v4710_v20  ;;  %v4713_v42 = vpop.permute.xlu0 %1254  ;;  %v779_v20 = vld [vmem:[#allocation2 + $0x354] sm:$0xff] }
 0x1d1   : > { %6792 = vst [vmem:[#allocation60_spill] sm:$0xff] %v4713_v42  ;;  %v4715_v8 = vpop.permute.xlu2 %1282  ;;  %v800_v42 = vld [vmem:[#allocation2 + $0xa5] sm:$0xff] }
 0x1d2   : > { %6793 = vst [vmem:[#allocation61_spill] sm:$0xff] %v4715_v8  ;;  %v725_v8 = vld [vmem:[#allocation2 + $0x3f3] sm:$0xff] }
 0x1d5   : > { %1346 = vrot.lane.b32.xlu1 %v652_v61, %s3968_s7 }
 0x1d6   : > { %1344 = vrot.lane.b32.xlu0 %v651_v30, %s3968_s7 }
 0x1d7   : > { %v4719_v45 = vpop.permute.xlu1 %1262  ;;  %1354 = vrot.lane.b32.xlu2 %v656_v50, %s3968_s7  ;;  %v658_v50 = vld [vmem:[#allocation2 + $0x3c2] sm:$0xff] }
 0x1d8   : > { %6794 = vst [vmem:[#allocation62_spill] sm:$0xff] %v4719_v45  ;;  %v4722_v35 = vpop.permute.xlu0 %1260  ;;  %v686_v45 = vld [vmem:[#allocation2 + $0x183] sm:$0xff] }
 0x1d9   : > { %6795 = vst [vmem:[#allocation63_spill] sm:$0xff] %v4722_v35  ;;  %v4724_v62 = vpop.permute.xlu2 %1288 }
 0x1da   : > { %6796 = vst [vmem:[#allocation64_spill] sm:$0xff] %v4724_v62 }
 0x1dd   : > { %1352 = vrot.lane.b32.xlu1 %v655_v43, %s3968_s7 }
 0x1de   : > { %1350 = vrot.lane.b32.xlu0 %v654_v51, %s3968_s7 }
 0x1df   : > { %v4728_v18 = vpop.permute.xlu1 %1268  ;;  %1360 = vrot.lane.b32.xlu2 %v659_v28, %s3968_s7  ;;  %v661_v28 = vld [vmem:[#allocation2 + $0x3f2] sm:$0xff] }
 0x1e0   : > { %6797 = vst [vmem:[#allocation65_spill] sm:$0xff] %v4728_v18  ;;  %v4731_v30 = vpop.permute.xlu0 %1266  ;;  %v660_v18 = vld [vmem:[#allocation2 + $0x3e2] sm:$0xff] }
 0x1e1   : > { %6798 = vst [vmem:[#allocation66_spill] sm:$0xff] %v4731_v30  ;;  %v4733_v61 = vpop.permute.xlu2 %1294  ;;  %v663_v30 = vld [vmem:[#allocation2 + $0x13] sm:$0xff] }
 0x1e2   : > { %6799 = vst [vmem:[#allocation67_spill] sm:$0xff] %v4733_v61 }
 0x1e5   : > { %1358 = vrot.lane.b32.xlu1 %v658_v50, %s3968_s7 }
 0x1e6   : > { %1356 = vrot.lane.b32.xlu0 %v657_v47, %s3968_s7 }
 0x1e7   : > { %v4737_v29 = vpop.permute.xlu1 %1274  ;;  %1494 = vrot.lane.b32.xlu2 %v662_v52, %s3969_s8  ;;  %v664_v52 = vld [vmem:[#allocation2 + $0x23] sm:$0xff] }
 0x1e8   : > { %v4740_v51 = vpop.permute.xlu0 %1272 }
 0x1e9   : > { %v4742_v43 = vpop.permute.xlu2 %1300 }
 0x1ea   : > { %6800 = vst [vmem:[#allocation68_spill] sm:$0xff] %v4742_v43 }
 0x1ed   : > { %1364 = vrot.lane.b32.xlu1 %v661_v28, %s3968_s7 }
 0x1ee   : > { %1362 = vrot.lane.b32.xlu0 %v660_v18, %s3968_s7 }
 0x1ef   : > { %v4746_v61 = vpop.permute.xlu1 %1280  ;;  %1500 = vrot.lane.b32.xlu2 %v665_v13, %s3969_s8  ;;  %v667_v13 = vld [vmem:[#allocation2 + $0x53] sm:$0xff] }
 0x1f0   : > { %6801 = vst [vmem:[#allocation69_spill] sm:$0xff] %v4746_v61  ;;  %v4749_v47 = vpop.permute.xlu0 %1278 }
 0x1f1   : > { %6802 = vst [vmem:[#allocation70_spill] sm:$0xff] %v4749_v47  ;;  %v4751_v50 = vpop.permute.xlu2 %1306  ;;  %v793_v47 = vld [vmem:[#allocation2 + $0x35] sm:$0xff] }
 0x1f2   : > { %6803 = vst [vmem:[#allocation71_spill] sm:$0xff] %v4751_v50 }
 0x1f5   : > { %1498 = vrot.lane.b32.xlu1 %v664_v52, %s3969_s8 }
 0x1f6   : > { %1496 = vrot.lane.b32.xlu0 %v663_v30, %s3969_s8 }
 0x1f7   : > { %v4755_v43 = vpop.permute.xlu1 %1286  ;;  %1506 = vrot.lane.b32.xlu2 %v668_v49, %s3969_s8  ;;  %v670_v49 = vld [vmem:[#allocation2 + $0x83] sm:$0xff] }
 0x1f8   : > { %6804 = vst [vmem:[#allocation72_spill] sm:$0xff] %v4755_v43  ;;  %v4758_v18 = vpop.permute.xlu0 %1284  ;;  %v693_v43 = vld [vmem:[#allocation2 + $0x1f3] sm:$0xff] }
 0x1f9   : > { %6805 = vst [vmem:[#allocation73_spill] sm:$0xff] %v4758_v18  ;;  %v4760_v28 = vpop.permute.xlu2 %1312  ;;  %v714_v18 = vld [vmem:[#allocation2 + $0x343] sm:$0xff] }
 0x1fa   : > { %6806 = vst [vmem:[#allocation74_spill] sm:$0xff] %v4760_v28  ;;  %v683_v28 = vld [vmem:[#allocation2 + $0x153] sm:$0xff] }
 0x1fd   : > { %1504 = vrot.lane.b32.xlu1 %v667_v13, %s3969_s8 }
 0x1fe   : > { %1502 = vrot.lane.b32.xlu0 %v666_v16, %s3969_s8 }
 0x1ff   : > { %v4764_v62 = vpop.permute.xlu1 %1292  ;;  %1512 = vrot.lane.b32.xlu2 %v671_v41, %s3969_s8  ;;  %v673_v41 = vld [vmem:[#allocation2 + $0xb3] sm:$0xff] }
 0x200   : > { %6807 = vst [vmem:[#allocation75_spill] sm:$0xff] %v4764_v62  ;;  %v4767_v30 = vpop.permute.xlu0 %1290  ;;  %v672_v62 = vld [vmem:[#allocation2 + $0xa3] sm:$0xff] }
 0x201   : > { %6808 = vst [vmem:[#allocation76_spill] sm:$0xff] %v4767_v30  ;;  %v4769_v52 = vpop.permute.xlu2 %1318  ;;  %v677_v30 = vld [vmem:[#allocation2 + $0xf3] sm:$0xff] }
 0x202   : > { %6809 = vst [vmem:[#allocation77_spill] sm:$0xff] %v4769_v52 }
 0x205   : > { %1510 = vrot.lane.b32.xlu1 %v670_v49, %s3969_s8 }
 0x206   : > { %1508 = vrot.lane.b32.xlu0 %v669_v38, %s3969_s8 }
 0x207   : > { %v4773_v11 = vpop.permute.xlu1 %1298  ;;  %1518 = vrot.lane.b32.xlu2 %v674_v10, %s3969_s8  ;;  %v676_v10 = vld [vmem:[#allocation2 + $0xe3] sm:$0xff] }
 0x208   : > { %6810 = vst [vmem:[#allocation78_spill] sm:$0xff] %v4773_v11  ;;  %v4776_v16 = vpop.permute.xlu0 %1296  ;;  %v675_v11 = vld [vmem:[#allocation2 + $0xd3] sm:$0xff] }
 0x209   : > { %6811 = vst [vmem:[#allocation79_spill] sm:$0xff] %v4776_v16  ;;  %v4778_v13 = vpop.permute.xlu2 %1324  ;;  %v680_v16 = vld [vmem:[#allocation2 + $0x123] sm:$0xff] }
 0x20a   : > { %6812 = vst [vmem:[#allocation80_spill] sm:$0xff] %v4778_v13 }
 0x20d   : > { %1516 = vrot.lane.b32.xlu1 %v673_v41, %s3969_s8 }
 0x20e   : > { %1514 = vrot.lane.b32.xlu0 %v672_v62, %s3969_s8 }
 0x20f   : > { %v4782_v52 = vpop.permute.xlu1 %1304  ;;  %1524 = vrot.lane.b32.xlu2 %v677_v30, %s3969_s8  ;;  %v679_v30 = vld [vmem:[#allocation2 + $0x113] sm:$0xff] }
 0x210   : > { %6813 = vst [vmem:[#allocation81_spill] sm:$0xff] %v4782_v52  ;;  %v4785_v38 = vpop.permute.xlu0 %1302 }
 0x211   : > { %v4787_v49 = vpop.permute.xlu2 %1330 }
 0x212   : > { %6814 = vst [vmem:[#allocation82_spill] sm:$0xff] %v4787_v49 }
 0x215   : > { %1522 = vrot.lane.b32.xlu1 %v676_v10, %s3969_s8 }
 0x216   : > { %1520 = vrot.lane.b32.xlu0 %v675_v11, %s3969_s8 }
 0x217   : > { %v4791_v13 = vpop.permute.xlu1 %1310  ;;  %1530 = vrot.lane.b32.xlu2 %v680_v16, %s3969_s8  ;;  %v682_v16 = vld [vmem:[#allocation2 + $0x143] sm:$0xff] }
 0x218   : > { %6815 = vst [vmem:[#allocation83_spill] sm:$0xff] %v4791_v13  ;;  %v4794_v62 = vpop.permute.xlu0 %1308  ;;  %v711_v13 = vld [vmem:[#allocation2 + $0x313] sm:$0xff] }
 0x219   : > { %6816 = vst [vmem:[#allocation84_spill] sm:$0xff] %v4794_v62  ;;  %v4796_v41 = vpop.permute.xlu2 %1336  ;;  %v722_v62 = vld [vmem:[#allocation2 + $0x3c3] sm:$0xff] }
 0x21a   : > { %6817 = vst [vmem:[#allocation85_spill] sm:$0xff] %v4796_v41 }
 0x21d   : > { %1528 = vrot.lane.b32.xlu1 %v679_v30, %s3969_s8 }
 0x21e   : > { %1526 = vrot.lane.b32.xlu0 %v678_v21, %s3969_s8 }
 0x21f   : > { %v4800_v49 = vpop.permute.xlu1 %1316  ;;  %1536 = vrot.lane.b32.xlu2 %v683_v28, %s3969_s8  ;;  %v685_v28 = vld [vmem:[#allocation2 + $0x173] sm:$0xff] }
 0x220   : > { %6818 = vst [vmem:[#allocation86_spill] sm:$0xff] %v4800_v49  ;;  %v4803_v11 = vpop.permute.xlu0 %1314  ;;  %v684_v49 = vld [vmem:[#allocation2 + $0x163] sm:$0xff] }
 0x221   : > { %6819 = vst [vmem:[#allocation87_spill] sm:$0xff] %v4803_v11  ;;  %v4805_v10 = vpop.permute.xlu2 %1342  ;;  %v689_v11 = vld [vmem:[#allocation2 + $0x1b3] sm:$0xff] }
 0x222   : > { %6820 = vst [vmem:[#allocation88_spill] sm:$0xff] %v4805_v10 }
 0x225   : > { %1534 = vrot.lane.b32.xlu1 %v682_v16, %s3969_s8 }
 0x226   : > { %1532 = vrot.lane.b32.xlu0 %v681_v14, %s3969_s8 }
 0x227   : > { %v4809_v41 = vpop.permute.xlu1 %1322  ;;  %1542 = vrot.lane.b32.xlu2 %v686_v45, %s3969_s8  ;;  %v688_v45 = vld [vmem:[#allocation2 + $0x1a3] sm:$0xff] }
 0x228   : > { %6821 = vst [vmem:[#allocation89_spill] sm:$0xff] %v4809_v41  ;;  %v4812_v21 = vpop.permute.xlu0 %1320  ;;  %v687_v41 = vld [vmem:[#allocation2 + $0x193] sm:$0xff] }
 0x229   : > { %6822 = vst [vmem:[#allocation90_spill] sm:$0xff] %v4812_v21  ;;  %v4814_v30 = vpop.permute.xlu2 %1348  ;;  %v692_v21 = vld [vmem:[#allocation2 + $0x1e3] sm:$0xff] }
 0x22a   : > { %6823 = vst [vmem:[#allocation91_spill] sm:$0xff] %v4814_v30 }
 0x22d   : > { %1540 = vrot.lane.b32.xlu1 %v685_v28, %s3969_s8 }
 0x22e   : > { %1538 = vrot.lane.b32.xlu0 %v684_v49, %s3969_s8 }
 0x22f   : > { %v4818_v10 = vpop.permute.xlu1 %1328  ;;  %1548 = vrot.lane.b32.xlu2 %v689_v11, %s3969_s8  ;;  %v691_v11 = vld [vmem:[#allocation2 + $0x1d3] sm:$0xff] }
 0x230   : > { %6824 = vst [vmem:[#allocation92_spill] sm:$0xff] %v4818_v10  ;;  %v4821_v14 = vpop.permute.xlu0 %1326  ;;  %v690_v10 = vld [vmem:[#allocation2 + $0x1c3] sm:$0xff] }
 0x231   : > { %6825 = vst [vmem:[#allocation93_spill] sm:$0xff] %v4821_v14  ;;  %v4823_v16 = vpop.permute.xlu2 %1354  ;;  %v695_v14 = vld [vmem:[#allocation2 + $0x213] sm:$0xff] }
 0x232   : > { %6826 = vst [vmem:[#allocation94_spill] sm:$0xff] %v4823_v16 }
 0x235   : > { %1546 = vrot.lane.b32.xlu1 %v688_v45, %s3969_s8 }
 0x236   : > { %1544 = vrot.lane.b32.xlu0 %v687_v41, %s3969_s8 }
 0x237   : > { %v4827_v30 = vpop.permute.xlu1 %1334  ;;  %1554 = vrot.lane.b32.xlu2 %v692_v21, %s3969_s8  ;;  %v694_v21 = vld [vmem:[#allocation2 + $0x203] sm:$0xff] }
 0x238   : > { %6827 = vst [vmem:[#allocation95_spill] sm:$0xff] %v4827_v30  ;;  %v4830_v49 = vpop.permute.xlu0 %1332 }
 0x239   : > { %6828 = vst [vmem:[#allocation96_spill] sm:$0xff] %v4830_v49  ;;  %v4832_v28 = vpop.permute.xlu2 %1360  ;;  %v698_v49 = vld [vmem:[#allocation2 + $0x243] sm:$0xff] }
 0x23a   : > { %6829 = vst [vmem:[#allocation97_spill] sm:$0xff] %v4832_v28 }
 0x23d   : > { %1552 = vrot.lane.b32.xlu1 %v691_v11, %s3969_s8 }
 0x23e   : > { %1550 = vrot.lane.b32.xlu0 %v690_v10, %s3969_s8 }
 0x23f   : > { %v4836_v16 = vpop.permute.xlu1 %1340  ;;  %1560 = vrot.lane.b32.xlu2 %v695_v14, %s3969_s8  ;;  %v697_v14 = vld [vmem:[#allocation2 + $0x233] sm:$0xff] }
 0x240   : > { %6830 = vst [vmem:[#allocation98_spill] sm:$0xff] %v4836_v16  ;;  %v4839_v41 = vpop.permute.xlu0 %1338  ;;  %v696_v16 = vld [vmem:[#allocation2 + $0x223] sm:$0xff] }
 0x241   : > { %6831 = vst [vmem:[#allocation99_spill] sm:$0xff] %v4839_v41  ;;  %v4841_v45 = vpop.permute.xlu2 %1494  ;;  %v701_v41 = vld [vmem:[#allocation2 + $0x273] sm:$0xff] }
 0x245   : > { %1558 = vrot.lane.b32.xlu1 %v694_v21, %s3969_s8 }
 0x246   : > { %1556 = vrot.lane.b32.xlu0 %v693_v43, %s3969_s8 }
 0x247   : > { %v4845_v28 = vpop.permute.xlu1 %1346  ;;  %1566 = vrot.lane.b32.xlu2 %v698_v49, %s3969_s8  ;;  %v700_v49 = vld [vmem:[#allocation2 + $0x263] sm:$0xff] }
 0x248   : > { %6832 = vst [vmem:[#allocation100_spill] sm:$0xff] %v4845_v28  ;;  %v4848_v10 = vpop.permute.xlu0 %1344  ;;  %v699_v28 = vld [vmem:[#allocation2 + $0x253] sm:$0xff] }
 0x249   : > { %6833 = vst [vmem:[#allocation101_spill] sm:$0xff] %v4848_v10  ;;  %v4850_v11 = vpop.permute.xlu2 %1500  ;;  %v704_v10 = vld [vmem:[#allocation2 + $0x2a3] sm:$0xff] }
 0x24d   : > { %1564 = vrot.lane.b32.xlu1 %v697_v14, %s3969_s8 }
 0x24e   : > { %1562 = vrot.lane.b32.xlu0 %v696_v16, %s3969_s8 }
 0x24f   : > { %v4854_v12 = vpop.permute.xlu1 %1352  ;;  %1572 = vrot.lane.b32.xlu2 %v701_v41, %s3969_s8  ;;  %v703_v41 = vld [vmem:[#allocation2 + $0x293] sm:$0xff] }
 0x250   : > { %6834 = vst [vmem:[#allocation102_spill] sm:$0xff] %v4854_v12  ;;  %v4857_v43 = vpop.permute.xlu0 %1350  ;;  %v702_v12 = vld [vmem:[#allocation2 + $0x283] sm:$0xff] }
 0x251   : > { %6835 = vst [vmem:[#allocation103_spill] sm:$0xff] %v4857_v43  ;;  %v4859_v21 = vpop.permute.xlu2 %1506  ;;  %v707_v43 = vld [vmem:[#allocation2 + $0x2d3] sm:$0xff] }
 0x255   : > { %1570 = vrot.lane.b32.xlu1 %v700_v49, %s3969_s8 }
 0x256   : > { %1568 = vrot.lane.b32.xlu0 %v699_v28, %s3969_s8 }
 0x257   : > { %v4863_v39 = vpop.permute.xlu1 %1358  ;;  %1578 = vrot.lane.b32.xlu2 %v704_v10, %s3969_s8  ;;  %v706_v10 = vld [vmem:[#allocation2 + $0x2c3] sm:$0xff] }
 0x258   : > { %6836 = vst [vmem:[#allocation104_spill] sm:$0xff] %v4863_v39  ;;  %v4866_v16 = vpop.permute.xlu0 %1356  ;;  %v705_v39 = vld [vmem:[#allocation2 + $0x2b3] sm:$0xff] }
 0x259   : > { %6837 = vst [vmem:[#allocation105_spill] sm:$0xff] %v4866_v16  ;;  %v4868_v14 = vpop.permute.xlu2 %1512  ;;  %v710_v16 = vld [vmem:[#allocation2 + $0x303] sm:$0xff] }
 0x25a   : > { %6838 = vst [vmem:[#allocation106_spill] sm:$0xff] %v4868_v14 }
 0x25d   : > { %1576 = vrot.lane.b32.xlu1 %v703_v41, %s3969_s8 }
 0x25e   : > { %1574 = vrot.lane.b32.xlu0 %v702_v12, %s3969_s8 }
 0x25f   : > { %v4872_v30 = vpop.permute.xlu1 %1364  ;;  %1584 = vrot.lane.b32.xlu2 %v707_v43, %s3969_s8  ;;  %v709_v43 = vld [vmem:[#allocation2 + $0x2f3] sm:$0xff] }
 0x260   : > { %6839 = vst [vmem:[#allocation107_spill] sm:$0xff] %v4872_v30  ;;  %v4875_v28 = vpop.permute.xlu0 %1362  ;;  %v708_v30 = vld [vmem:[#allocation2 + $0x2e3] sm:$0xff] }
 0x261   : > { %6840 = vst [vmem:[#allocation108_spill] sm:$0xff] %v4875_v28  ;;  %v4877_v49 = vpop.permute.xlu2 %1518  ;;  %v713_v28 = vld [vmem:[#allocation2 + $0x333] sm:$0xff] }
 0x262   : > { %6841 = vst [vmem:[#allocation109_spill] sm:$0xff] %v4877_v49 }
 0x265   : > { %1582 = vrot.lane.b32.xlu1 %v706_v10, %s3969_s8 }
 0x266   : > { %1580 = vrot.lane.b32.xlu0 %v705_v39, %s3969_s8 }
 0x267   : > { %v4881_v22 = vpop.permute.xlu1 %1498  ;;  %1590 = vrot.lane.b32.xlu2 %v710_v16, %s3969_s8  ;;  %v712_v16 = vld [vmem:[#allocation2 + $0x323] sm:$0xff] }
 0x268   : > { %v4884_v12 = vpop.permute.xlu0 %1496 }
 0x269   : > { %v4886_v41 = vpop.permute.xlu2 %1524 }
 0x26a   : > { %6842 = vst [vmem:[#allocation110_spill] sm:$0xff] %v4886_v41 }
 0x26d   : > { %1588 = vrot.lane.b32.xlu1 %v709_v43, %s3969_s8 }
 0x26e   : > { %1586 = vrot.lane.b32.xlu0 %v708_v30, %s3969_s8 }
 0x26f   : > { %v4890_v49 = vpop.permute.xlu1 %1504  ;;  %1596 = vrot.lane.b32.xlu2 %v713_v28, %s3969_s8  ;;  %v715_v28 = vld [vmem:[#allocation2 + $0x353] sm:$0xff] }
 0x270   : > { %v4893_v39 = vpop.permute.xlu0 %1502 }
 0x271   : > { %v4895_v10 = vpop.permute.xlu2 %1530 }
 0x275   : > { %1594 = vrot.lane.b32.xlu1 %v712_v16, %s3969_s8 }
 0x276   : > { %1592 = vrot.lane.b32.xlu0 %v711_v13, %s3969_s8 }
 0x277   : > { %v4899_v41 = vpop.permute.xlu1 %1510  ;;  %1602 = vrot.lane.b32.xlu2 %v716_v15, %s3969_s8  ;;  %v718_v15 = vld [vmem:[#allocation2 + $0x383] sm:$0xff] }
 0x278   : > { %6843 = vst [vmem:[#allocation111_spill] sm:$0xff] %v4899_v41  ;;  %v4902_v30 = vpop.permute.xlu0 %1508  ;;  %v870_v41 = vld [vmem:[#allocation2 + $0x106] sm:$0xff] }
 0x279   : > { %v4904_v43 = vpop.permute.xlu2 %1536 }
 0x27a   : > { %6844 = vst [vmem:[#allocation112_spill] sm:$0xff] %v4904_v43 }
 0x27d   : > { %1600 = vrot.lane.b32.xlu1 %v715_v28, %s3969_s8 }
 0x27e   : > { %1598 = vrot.lane.b32.xlu0 %v714_v18, %s3969_s8 }
 0x27f   : > { %v4908_v35 = vpop.permute.xlu1 %1516  ;;  %1608 = vrot.lane.b32.xlu2 %v719_v7, %s3969_s8  ;;  %v721_v7 = vld [vmem:[#allocation2 + $0x3b3] sm:$0xff] }
 0x280   : > { %6845 = vst [vmem:[#allocation113_spill] sm:$0xff] %v4908_v35  ;;  %v4911_v13 = vpop.permute.xlu0 %1514  ;;  %v720_v35 = vld [vmem:[#allocation2 + $0x3a3] sm:$0xff] }
 0x281   : > { %6846 = vst [vmem:[#allocation114_spill] sm:$0xff] %v4911_v13  ;;  %v4913_v16 = vpop.permute.xlu2 %1542  ;;  %v726_v13 = vld [vmem:[#allocation2 + $0x4] sm:$0xff] }
 0x282   : > { %6847 = vst [vmem:[#allocation115_spill] sm:$0xff] %v4913_v16 }
 0x285   : > { %1606 = vrot.lane.b32.xlu1 %v718_v15, %s3969_s8 }
 0x286   : > { %1604 = vrot.lane.b32.xlu0 %v717_v40, %s3969_s8 }
 0x287   : > { %v4917_v34 = vpop.permute.xlu1 %1522  ;;  %1614 = vrot.lane.b32.xlu2 %v722_v62, %s3969_s8  ;;  %v724_v62 = vld [vmem:[#allocation2 + $0x3e3] sm:$0xff] }
 0x288   : > { %6848 = vst [vmem:[#allocation116_spill] sm:$0xff] %v4917_v34  ;;  %v4920_v18 = vpop.permute.xlu0 %1520  ;;  %v723_v34 = vld [vmem:[#allocation2 + $0x3d3] sm:$0xff] }
 0x289   : > { %6849 = vst [vmem:[#allocation117_spill] sm:$0xff] %v4920_v18  ;;  %v4922_v28 = vpop.permute.xlu2 %1548  ;;  %v728_v18 = vld [vmem:[#allocation2 + $0x24] sm:$0xff] }
 0x28a   : > { %6850 = vst [vmem:[#allocation118_spill] sm:$0xff] %v4922_v28 }
 0x28d   : > { %1612 = vrot.lane.b32.xlu1 %v721_v7, %s3969_s8 }
 0x28e   : > { %1610 = vrot.lane.b32.xlu0 %v720_v35, %s3969_s8 }
 0x28f   : > { %v4926_v16 = vpop.permute.xlu1 %1528  ;;  %1620 = vrot.lane.b32.xlu2 %v725_v8, %s3969_s8  ;;  %v727_v8 = vld [vmem:[#allocation2 + $0x14] sm:$0xff] }
 0x290   : > { %v4929_v40 = vpop.permute.xlu0 %1526 }
 0x291   : > { %v4931_v15 = vpop.permute.xlu2 %1554 }
 0x292   : > { %6851 = vst [vmem:[#allocation119_spill] sm:$0xff] %v4931_v15 }
 0x295   : > { %1618 = vrot.lane.b32.xlu1 %v724_v62, %s3969_s8 }
 0x296   : > { %1616 = vrot.lane.b32.xlu0 %v723_v34, %s3969_s8  ;;  %s3922_s8 = scalar_lea.hbm %s6735_s4, 4 }
 0x297   : > { %v4935_v28 = vpop.permute.xlu1 %1534  ;;  %1754 = vrot.lane.b32.xlu2 %v728_v18, %s3970_s9  ;;  %v730_v18 = vld [vmem:[#allocation2 + $0x44] sm:$0xff] }
 0x298   : > { %6852 = vst [vmem:[#allocation120_spill] sm:$0xff] %v4935_v28  ;;  %v4938_v35 = vpop.permute.xlu0 %1532  ;;  %v854_v28 = vld [vmem:[#allocation2 + $0x6] sm:$0xff] }
 0x299   : > { %v4940_v7 = vpop.permute.xlu2 %1560 }
 0x29a   : > { %6853 = vst [vmem:[#allocation121_spill] sm:$0xff] %v4940_v7  ;;  %v782_v7 = vld [vmem:[#allocation2 + $0x384] sm:$0xff] }
 0x29d   : > { %1752 = vrot.lane.b32.xlu1 %v727_v8, %s3970_s9 }
 0x29e   : > { %1750 = vrot.lane.b32.xlu0 %v726_v13, %s3970_s9 }
 0x29f   : > { %v4944_v15 = vpop.permute.xlu1 %1540  ;;  %1760 = vrot.lane.b32.xlu2 %v731_v31, %s3970_s9  ;;  %v733_v31 = vld [vmem:[#allocation2 + $0x74] sm:$0xff] }
 0x2a0   : > { %6854 = vst [vmem:[#allocation122_spill] sm:$0xff] %v4944_v15  ;;  %v4947_v34 = vpop.permute.xlu0 %1538  ;;  %v732_v15 = vld [vmem:[#allocation2 + $0x64] sm:$0xff] }
 0x2a1   : > { %6855 = vst [vmem:[#allocation123_spill] sm:$0xff] %v4947_v34  ;;  %v4949_v62 = vpop.permute.xlu2 %1566  ;;  %v737_v34 = vld [vmem:[#allocation2 + $0xb4] sm:$0xff] }
 0x2a2   : > { %6856 = vst [vmem:[#allocation124_spill] sm:$0xff] %v4949_v62 }
 0x2a5   : > { %1758 = vrot.lane.b32.xlu1 %v730_v18, %s3970_s9 }
 0x2a6   : > { %1756 = vrot.lane.b32.xlu0 %v729_v37, %s3970_s9 }
 0x2a7   : > { %v4953_v50 = vpop.permute.xlu1 %1546  ;;  %1766 = vrot.lane.b32.xlu2 %v734_v5, %s3970_s9  ;;  %v736_v5 = vld [vmem:[#allocation2 + $0xa4] sm:$0xff] }
 0x2a8   : > { %6857 = vst [vmem:[#allocation125_spill] sm:$0xff] %v4953_v50  ;;  %v4956_v13 = vpop.permute.xlu0 %1544  ;;  %v735_v50 = vld [vmem:[#allocation2 + $0x94] sm:$0xff] }
 0x2a9   : > { %6858 = vst [vmem:[#allocation126_spill] sm:$0xff] %v4956_v13  ;;  %v4958_v8 = vpop.permute.xlu2 %1572  ;;  %v740_v13 = vld [vmem:[#allocation2 + $0xe4] sm:$0xff] }
 0x2aa   : > { %6859 = vst [vmem:[#allocation127_spill] sm:$0xff] %v4958_v8 }
 0x2ad   : > { %1764 = vrot.lane.b32.xlu1 %v733_v31, %s3970_s9 }
 0x2ae   : > { %1762 = vrot.lane.b32.xlu0 %v732_v15, %s3970_s9 }
 0x2af   : > { %v4962_v62 = vpop.permute.xlu1 %1552  ;;  %1772 = vrot.lane.b32.xlu2 %v737_v34, %s3970_s9  ;;  %v739_v34 = vld [vmem:[#allocation2 + $0xd4] sm:$0xff] }
 0x2b0   : > { %6860 = vst [vmem:[#allocation128_spill] sm:$0xff] %v4962_v62  ;;  %v4965_v37 = vpop.permute.xlu0 %1550  ;;  %v738_v62 = vld [vmem:[#allocation2 + $0xc4] sm:$0xff] }
 0x2b1   : > { %6861 = vst [vmem:[#allocation129_spill] sm:$0xff] %v4965_v37  ;;  %v4967_v18 = vpop.permute.xlu2 %1578  ;;  %v743_v37 = vld [vmem:[#allocation2 + $0x114] sm:$0xff] }
 0x2b2   : > { %6862 = vst [vmem:[#allocation130_spill] sm:$0xff] %v4967_v18 }
 0x2b5   : > { %1770 = vrot.lane.b32.xlu1 %v736_v5, %s3970_s9 }
 0x2b6   : > { %1768 = vrot.lane.b32.xlu0 %v735_v50, %s3970_s9 }
 0x2b7   : > { %v4971_v8 = vpop.permute.xlu1 %1558  ;;  %1778 = vrot.lane.b32.xlu2 %v740_v13, %s3970_s9  ;;  %v742_v13 = vld [vmem:[#allocation2 + $0x104] sm:$0xff] }
 0x2b8   : > { %v4974_v15 = vpop.permute.xlu0 %1556 }
 0x2b9   : > { %6863 = vst [vmem:[#allocation131_spill] sm:$0xff] %v4974_v15  ;;  %v4976_v31 = vpop.permute.xlu2 %1584  ;;  %v746_v15 = vld [vmem:[#allocation2 + $0x144] sm:$0xff] }
 0x2ba   : > { %6864 = vst [vmem:[#allocation132_spill] sm:$0xff] %v4976_v31 }
 0x2bd   : > { %1776 = vrot.lane.b32.xlu1 %v739_v34, %s3970_s9 }
 0x2be   : > { %1774 = vrot.lane.b32.xlu0 %v738_v62, %s3970_s9 }
 0x2bf   : > { %v4980_v18 = vpop.permute.xlu1 %1564  ;;  %1784 = vrot.lane.b32.xlu2 %v743_v37, %s3970_s9  ;;  %v745_v37 = vld [vmem:[#allocation2 + $0x134] sm:$0xff] }
 0x2c0   : > { %6865 = vst [vmem:[#allocation133_spill] sm:$0xff] %v4980_v18  ;;  %v4983_v50 = vpop.permute.xlu0 %1562  ;;  %v744_v18 = vld [vmem:[#allocation2 + $0x124] sm:$0xff] }
 0x2c1   : > { %6866 = vst [vmem:[#allocation134_spill] sm:$0xff] %v4983_v50  ;;  %v4985_v5 = vpop.permute.xlu2 %1590  ;;  %v749_v50 = vld [vmem:[#allocation2 + $0x174] sm:$0xff] }
 0x2c2   : > { %6867 = vst [vmem:[#allocation135_spill] sm:$0xff] %v4985_v5 }
 0x2c5   : > { %1782 = vrot.lane.b32.xlu1 %v742_v13, %s3970_s9 }
 0x2c6   : > { %1780 = vrot.lane.b32.xlu0 %v741_v2, %s3970_s9 }
 0x2c7   : > { %v4989_v31 = vpop.permute.xlu1 %1570  ;;  %1790 = vrot.lane.b32.xlu2 %v746_v15, %s3970_s9  ;;  %v748_v15 = vld [vmem:[#allocation2 + $0x164] sm:$0xff] }
 0x2c8   : > { %6868 = vst [vmem:[#allocation136_spill] sm:$0xff] %v4989_v31  ;;  %v4992_v62 = vpop.permute.xlu0 %1568  ;;  %v747_v31 = vld [vmem:[#allocation2 + $0x154] sm:$0xff] }
 0x2c9   : > { %6869 = vst [vmem:[#allocation137_spill] sm:$0xff] %v4992_v62  ;;  %v4994_v34 = vpop.permute.xlu2 %1596  ;;  %v752_v62 = vld [vmem:[#allocation2 + $0x1a4] sm:$0xff] }
 0x2ca   : > { %6870 = vst [vmem:[#allocation138_spill] sm:$0xff] %v4994_v34 }
 0x2cd   : > { %1788 = vrot.lane.b32.xlu1 %v745_v37, %s3970_s9 }
 0x2ce   : > { %1786 = vrot.lane.b32.xlu0 %v744_v18, %s3970_s9 }
 0x2cf   : > { %v4998_v5 = vpop.permute.xlu1 %1576  ;;  %1796 = vrot.lane.b32.xlu2 %v749_v50, %s3970_s9  ;;  %v751_v50 = vld [vmem:[#allocation2 + $0x194] sm:$0xff] }
 0x2d0   : > { %6871 = vst [vmem:[#allocation139_spill] sm:$0xff] %v4998_v5  ;;  %v5001_v2 = vpop.permute.xlu0 %1574  ;;  %v750_v5 = vld [vmem:[#allocation2 + $0x184] sm:$0xff] }
 0x2d1   : > { %6872 = vst [vmem:[#allocation140_spill] sm:$0xff] %v5001_v2  ;;  %v5003_v13 = vpop.permute.xlu2 %1602  ;;  %v755_v2 = vld [vmem:[#allocation2 + $0x1d4] sm:$0xff] }
 0x2d2   : > { %6873 = vst [vmem:[#allocation141_spill] sm:$0xff] %v5003_v13 }
 0x2d5   : > { %1794 = vrot.lane.b32.xlu1 %v748_v15, %s3970_s9 }
 0x2d6   : > { %1792 = vrot.lane.b32.xlu0 %v747_v31, %s3970_s9 }
 0x2d7   : > { %v5007_v34 = vpop.permute.xlu1 %1582  ;;  %1802 = vrot.lane.b32.xlu2 %v752_v62, %s3970_s9  ;;  %v754_v62 = vld [vmem:[#allocation2 + $0x1c4] sm:$0xff] }
 0x2d8   : > { %6874 = vst [vmem:[#allocation142_spill] sm:$0xff] %v5007_v34  ;;  %v5010_v18 = vpop.permute.xlu0 %1580  ;;  %v753_v34 = vld [vmem:[#allocation2 + $0x1b4] sm:$0xff] }
 0x2d9   : > { %6875 = vst [vmem:[#allocation143_spill] sm:$0xff] %v5010_v18  ;;  %v5012_v37 = vpop.permute.xlu2 %1608  ;;  %v758_v18 = vld [vmem:[#allocation2 + $0x204] sm:$0xff] }
 0x2da   : > { %6876 = vst [vmem:[#allocation144_spill] sm:$0xff] %v5012_v37 }
 0x2dd   : > { %1800 = vrot.lane.b32.xlu1 %v751_v50, %s3970_s9 }
 0x2de   : > { %1798 = vrot.lane.b32.xlu0 %v750_v5, %s3970_s9 }
 0x2df   : > { %v5016_v13 = vpop.permute.xlu1 %1588  ;;  %1808 = vrot.lane.b32.xlu2 %v755_v2, %s3970_s9  ;;  %v757_v2 = vld [vmem:[#allocation2 + $0x1f4] sm:$0xff] }
 0x2e0   : > { %6877 = vst [vmem:[#allocation145_spill] sm:$0xff] %v5016_v13  ;;  %v5019_v31 = vpop.permute.xlu0 %1586  ;;  %v756_v13 = vld [vmem:[#allocation2 + $0x1e4] sm:$0xff] }
 0x2e1   : > { %6878 = vst [vmem:[#allocation146_spill] sm:$0xff] %v5019_v31  ;;  %v5021_v15 = vpop.permute.xlu2 %1614  ;;  %v761_v31 = vld [vmem:[#allocation2 + $0x234] sm:$0xff] }
 0x2e2   : > { %6879 = vst [vmem:[#allocation147_spill] sm:$0xff] %v5021_v15 }
 0x2e5   : > { %1806 = vrot.lane.b32.xlu1 %v754_v62, %s3970_s9 }
 0x2e6   : > { %1804 = vrot.lane.b32.xlu0 %v753_v34, %s3970_s9 }
 0x2e7   : > { %v5025_v37 = vpop.permute.xlu1 %1594  ;;  %1814 = vrot.lane.b32.xlu2 %v758_v18, %s3970_s9  ;;  %v760_v18 = vld [vmem:[#allocation2 + $0x224] sm:$0xff] }
 0x2e8   : > { %6880 = vst [vmem:[#allocation148_spill] sm:$0xff] %v5025_v37  ;;  %v5028_v5 = vpop.permute.xlu0 %1592  ;;  %v759_v37 = vld [vmem:[#allocation2 + $0x214] sm:$0xff] }
 0x2e9   : > { %6881 = vst [vmem:[#allocation149_spill] sm:$0xff] %v5028_v5  ;;  %v5030_v50 = vpop.permute.xlu2 %1620  ;;  %v764_v5 = vld [vmem:[#allocation2 + $0x264] sm:$0xff] }
 0x2ea   : > { %6882 = vst [vmem:[#allocation150_spill] sm:$0xff] %v5030_v50 }
 0x2ed   : > { %1812 = vrot.lane.b32.xlu1 %v757_v2, %s3970_s9 }
 0x2ee   : > { %1810 = vrot.lane.b32.xlu0 %v756_v13, %s3970_s9 }
 0x2ef   : > { %v5034_v15 = vpop.permute.xlu1 %1600  ;;  %1820 = vrot.lane.b32.xlu2 %v761_v31, %s3970_s9  ;;  %v763_v31 = vld [vmem:[#allocation2 + $0x254] sm:$0xff] }
 0x2f0   : > { %6883 = vst [vmem:[#allocation151_spill] sm:$0xff] %v5034_v15  ;;  %v5037_v34 = vpop.permute.xlu0 %1598  ;;  %v762_v15 = vld [vmem:[#allocation2 + $0x244] sm:$0xff] }
 0x2f1   : > { %6884 = vst [vmem:[#allocation152_spill] sm:$0xff] %v5037_v34  ;;  %v5039_v62 = vpop.permute.xlu2 %1754  ;;  %v767_v34 = vld [vmem:[#allocation2 + $0x294] sm:$0xff] }
 0x2f5   : > { %1818 = vrot.lane.b32.xlu1 %v760_v18, %s3970_s9 }
 0x2f6   : > { %1816 = vrot.lane.b32.xlu0 %v759_v37, %s3970_s9 }
 0x2f7   : > { %v5043_v50 = vpop.permute.xlu1 %1606  ;;  %1826 = vrot.lane.b32.xlu2 %v764_v5, %s3970_s9  ;;  %v766_v5 = vld [vmem:[#allocation2 + $0x284] sm:$0xff] }
 0x2f8   : > { %6885 = vst [vmem:[#allocation153_spill] sm:$0xff] %v5043_v50  ;;  %v5046_v13 = vpop.permute.xlu0 %1604  ;;  %v765_v50 = vld [vmem:[#allocation2 + $0x274] sm:$0xff] }
 0x2f9   : > { %6886 = vst [vmem:[#allocation154_spill] sm:$0xff] %v5046_v13  ;;  %v5048_v2 = vpop.permute.xlu2 %1760  ;;  %v770_v13 = vld [vmem:[#allocation2 + $0x2c4] sm:$0xff] }
 0x2fd   : > { %1824 = vrot.lane.b32.xlu1 %v763_v31, %s3970_s9 }
 0x2fe   : > { %1822 = vrot.lane.b32.xlu0 %v762_v15, %s3970_s9 }
 0x2ff   : > { %v5052_v43 = vpop.permute.xlu1 %1612  ;;  %1832 = vrot.lane.b32.xlu2 %v767_v34, %s3970_s9  ;;  %v769_v34 = vld [vmem:[#allocation2 + $0x2b4] sm:$0xff] }
 0x300   : > { %6887 = vst [vmem:[#allocation155_spill] sm:$0xff] %v5052_v43  ;;  %v5055_v37 = vpop.permute.xlu0 %1610  ;;  %v768_v43 = vld [vmem:[#allocation2 + $0x2a4] sm:$0xff] }
 0x301   : > { %6888 = vst [vmem:[#allocation156_spill] sm:$0xff] %v5055_v37  ;;  %v5057_v18 = vpop.permute.xlu2 %1766  ;;  %v773_v37 = vld [vmem:[#allocation2 + $0x2f4] sm:$0xff] }
 0x302   : > { %6889 = vst [vmem:[#allocation157_spill] sm:$0xff] %v5057_v18  ;;  %v792_v18 = vld [vmem:[#allocation2 + $0x25] sm:$0xff] }
 0x305   : > { %1830 = vrot.lane.b32.xlu1 %v766_v5, %s3970_s9 }
 0x306   : > { %1828 = vrot.lane.b32.xlu0 %v765_v50, %s3970_s9 }
 0x307   : > { %v5061_v61 = vpop.permute.xlu1 %1618  ;;  %1838 = vrot.lane.b32.xlu2 %v770_v13, %s3970_s9  ;;  %v772_v13 = vld [vmem:[#allocation2 + $0x2e4] sm:$0xff] }
 0x308   : > { %6890 = vst [vmem:[#allocation158_spill] sm:$0xff] %v5061_v61  ;;  %v5064_v15 = vpop.permute.xlu0 %1616  ;;  %v771_v61 = vld [vmem:[#allocation2 + $0x2d4] sm:$0xff] }
 0x309   : > { %6891 = vst [vmem:[#allocation159_spill] sm:$0xff] %v5064_v15  ;;  %v5066_v31 = vpop.permute.xlu2 %1772  ;;  %v776_v15 = vld [vmem:[#allocation2 + $0x324] sm:$0xff] }
 0x30a   : > { %6892 = vst [vmem:[#allocation160_spill] sm:$0xff] %v5066_v31 }
 0x30d   : > { %1836 = vrot.lane.b32.xlu1 %v769_v34, %s3970_s9 }
 0x30e   : > { %1834 = vrot.lane.b32.xlu0 %v768_v43, %s3970_s9 }
 0x30f   : > { %v5070_v14 = vpop.permute.xlu1 %1752  ;;  %1844 = vrot.lane.b32.xlu2 %v773_v37, %s3970_s9  ;;  %v775_v37 = vld [vmem:[#allocation2 + $0x314] sm:$0xff] }
 0x310   : > { %v5073_v50 = vpop.permute.xlu0 %1750 }
 0x311   : > { %v5075_v5 = vpop.permute.xlu2 %1778 }
 0x312   : > { %6893 = vst [vmem:[#allocation161_spill] sm:$0xff] %v5075_v5 }
 0x315   : > { %1842 = vrot.lane.b32.xlu1 %v772_v13, %s3970_s9 }
 0x316   : > { %1840 = vrot.lane.b32.xlu0 %v771_v61, %s3970_s9 }
 0x317   : > { %v5079_v31 = vpop.permute.xlu1 %1758  ;;  %1850 = vrot.lane.b32.xlu2 %v776_v15, %s3970_s9  ;;  %v778_v15 = vld [vmem:[#allocation2 + $0x344] sm:$0xff] }
 0x318   : > { %v5082_v43 = vpop.permute.xlu0 %1756 }
 0x319   : > { %v5084_v34 = vpop.permute.xlu2 %1784 }
 0x31d   : > { %1848 = vrot.lane.b32.xlu1 %v775_v37, %s3970_s9 }
 0x31e   : > { %1846 = vrot.lane.b32.xlu0 %v774_v32, %s3970_s9 }
 0x31f   : > { %v5088_v5 = vpop.permute.xlu1 %1764  ;;  %1856 = vrot.lane.b32.xlu2 %v779_v20, %s3970_s9  ;;  %v781_v20 = vld [vmem:[#allocation2 + $0x374] sm:$0xff] }
 0x320   : > { %v5091_v61 = vpop.permute.xlu0 %1762 }
 0x321   : > { %v5093_v13 = vpop.permute.xlu2 %1790 }
 0x322   : > { %6894 = vst [vmem:[#allocation162_spill] sm:$0xff] %v5093_v13 }
 0x325   : > { %1854 = vrot.lane.b32.xlu1 %v778_v15, %s3970_s9 }
 0x326   : > { %1852 = vrot.lane.b32.xlu0 %v777_v6, %s3970_s9 }
 0x327   : > { %v5097_v52 = vpop.permute.xlu1 %1770  ;;  %1862 = vrot.lane.b32.xlu2 %v782_v7, %s3970_s9  ;;  %v790_v7 = vld [vmem:[#allocation2 + $0x5] sm:$0xff] }
 0x328   : > { %6895 = vst [vmem:[#allocation163_spill] sm:$0xff] %v5097_v52  ;;  %v5100_v32 = vpop.permute.xlu0 %1768  ;;  %v783_v52 = vld [vmem:[#allocation2 + $0x394] sm:$0xff] }
 0x329   : > { %6896 = vst [vmem:[#allocation164_spill] sm:$0xff] %v5100_v32  ;;  %v5102_v37 = vpop.permute.xlu2 %1796  ;;  %v784_v32 = vld [vmem:[#allocation2 + $0x3a4] sm:$0xff] }
 0x32a   : > { %6897 = vst [vmem:[#allocation165_spill] sm:$0xff] %v5102_v37  ;;  %v785_v37 = vld [vmem:[#allocation2 + $0x3b4] sm:$0xff] }
 0x32d   : > { %1860 = vrot.lane.b32.xlu1 %v781_v20, %s3970_s9 }
 0x32e   : > { %1858 = vrot.lane.b32.xlu0 %v780_v3, %s3970_s9 }
 0x32f   : > { %v5106_v13 = vpop.permute.xlu1 %1776  ;;  %2262 = vrot.lane.b32.xlu2 %v854_v28, %s3971_s10  ;;  %v855_v28 = vld [vmem:[#allocation2 + $0x16] sm:$0xff] }
 0x330   : > { %6898 = vst [vmem:[#allocation166_spill] sm:$0xff] %v5106_v13  ;;  %v5109_v6 = vpop.permute.xlu0 %1774 }
 0x331   : > { %6899 = vst [vmem:[#allocation167_spill] sm:$0xff] %v5109_v6  ;;  %v5111_v15 = vpop.permute.xlu2 %1802  ;;  %v791_v6 = vld [vmem:[#allocation2 + $0x15] sm:$0xff] }
 0x332   : > { %6900 = vst [vmem:[#allocation168_spill] sm:$0xff] %v5111_v15 }
 0x335   : > { %2006 = vrot.lane.b32.xlu1 %v790_v7, %s3972_s11 }
 0x336   : > { %1864 = vrot.lane.b32.xlu0 %v783_v52, %s3970_s9 }
 0x337   : > { %v5115_v20 = vpop.permute.xlu1 %1782  ;;  %1866 = vrot.lane.b32.xlu2 %v784_v32, %s3970_s9  ;;  %v856_v32 = vld [vmem:[#allocation2 + $0x26] sm:$0xff] }
 0x338   : > { %v5118_v3 = vpop.permute.xlu0 %1780 }
 0x339   : > { %6901 = vst [vmem:[#allocation169_spill] sm:$0xff] %v5118_v3  ;;  %v5120_v13 = vpop.permute.xlu2 %1808  ;;  %v794_v3 = vld [vmem:[#allocation2 + $0x45] sm:$0xff] }
 0x33a   : > { %6902 = vst [vmem:[#allocation170_spill] sm:$0xff] %v5120_v13 }
 0x33d   : > { %2264 = vrot.lane.b32.xlu1 %v855_v28, %s3971_s10 }
 0x33e   : > { %2008 = vrot.lane.b32.xlu0 %v791_v6, %s3972_s11 }
 0x33f   : > { %v5124_v15 = vpop.permute.xlu1 %1788  ;;  %1868 = vrot.lane.b32.xlu2 %v785_v37, %s3970_s9  ;;  %v857_v37 = vld [vmem:[#allocation2 + $0x36] sm:$0xff] }
 0x340   : > { %v5127_v52 = vpop.permute.xlu0 %1786 }
 0x341   : > { %v5129_v7 = vpop.permute.xlu2 %1814 }
 0x345   : > { %2266 = vrot.lane.b32.xlu1 %v856_v32, %s3971_s10 }
 0x346   : > { %2010 = vrot.lane.b32.xlu0 %v792_v18, %s3972_s11 }
 0x347   : > { %v5133_v13 = vpop.permute.xlu1 %1794  ;;  %2014 = vrot.lane.b32.xlu2 %v794_v3, %s3972_s11  ;;  %v858_v3 = vld [vmem:[#allocation2 + $0x46] sm:$0xff] }
 0x348   : > { %6903 = vst [vmem:[#allocation171_spill] sm:$0xff] %v5133_v13  ;;  %v5136_v6 = vpop.permute.xlu0 %1792  ;;  %v806_v13 = vld [vmem:[#allocation2 + $0x105] sm:$0xff] }
 0x349   : > { %6904 = vst [vmem:[#allocation172_spill] sm:$0xff] %v5136_v6  ;;  %v5138_v28 = vpop.permute.xlu2 %1820  ;;  %v859_v6 = vld [vmem:[#allocation2 + $0x56] sm:$0xff] }
 0x34a   : > { %6905 = vst [vmem:[#allocation173_spill] sm:$0xff] %v5138_v28 }
 0x34d   : > { %2268 = vrot.lane.b32.xlu1 %v857_v37, %s3971_s10 }
 0x34e   : > { %2012 = vrot.lane.b32.xlu0 %v793_v47, %s3972_s11 }
 0x34f   : > { %v5142_v1 = vpop.permute.xlu1 %1800  ;;  %2294 = vrot.lane.b32.xlu2 %v870_v41, %s3971_s10  ;;  %v807_v41 = vld [vmem:[#allocation2 + $0x115] sm:$0xff] }
 0x350   : > { %6906 = vst [vmem:[#allocation174_spill] sm:$0xff] %v5142_v1  ;;  %v5145_v18 = vpop.permute.xlu0 %1798  ;;  %v795_v1 = vld [vmem:[#allocation2 + $0x55] sm:$0xff] }
 0x351   : > { %6907 = vst [vmem:[#allocation175_spill] sm:$0xff] %v5145_v18  ;;  %v5147_v32 = vpop.permute.xlu2 %1826  ;;  %v808_v18 = vld [vmem:[#allocation2 + $0x125] sm:$0xff] }
 0x352   : > { %6908 = vst [vmem:[#allocation176_spill] sm:$0xff] %v5147_v32 }
 0x355   : > { %2270 = vrot.lane.b32.xlu1 %v858_v3, %s3971_s10 }
 0x356   : > { %2038 = vrot.lane.b32.xlu0 %v806_v13, %s3972_s11 }
 0x357   : > { %v5151_v28 = vpop.permute.xlu1 %1806  ;;  %2272 = vrot.lane.b32.xlu2 %v859_v6, %s3971_s10  ;;  %v796_v6 = vld [vmem:[#allocation2 + $0x65] sm:$0xff] }
 0x358   : > { %6909 = vst [vmem:[#allocation177_spill] sm:$0xff] %v5151_v28  ;;  %v5154_v47 = vpop.permute.xlu0 %1804  ;;  %v871_v28 = vld [vmem:[#allocation2 + $0x116] sm:$0xff] }
 0x359   : > { %6910 = vst [vmem:[#allocation178_spill] sm:$0xff] %v5154_v47  ;;  %v5156_v37 = vpop.permute.xlu2 %1832  ;;  %v797_v47 = vld [vmem:[#allocation2 + $0x75] sm:$0xff] }
 0x35a   : > { %6911 = vst [vmem:[#allocation179_spill] sm:$0xff] %v5156_v37 }
 0x35d   : > { %2040 = vrot.lane.b32.xlu1 %v807_v41, %s3972_s11 }
 0x35e   : > { %2016 = vrot.lane.b32.xlu0 %v795_v1, %s3972_s11 }
 0x35f   : > { %v5160_v32 = vpop.permute.xlu1 %1812  ;;  %2042 = vrot.lane.b32.xlu2 %v808_v18, %s3972_s11  ;;  %v872_v18 = vld [vmem:[#allocation2 + $0x126] sm:$0xff] }
 0x360   : > { %6912 = vst [vmem:[#allocation180_spill] sm:$0xff] %v5160_v32  ;;  %v5163_v13 = vpop.permute.xlu0 %1810  ;;  %v860_v32 = vld [vmem:[#allocation2 + $0x66] sm:$0xff] }
 0x361   : > { %6913 = vst [vmem:[#allocation181_spill] sm:$0xff] %v5163_v13  ;;  %v5165_v3 = vpop.permute.xlu2 %1838  ;;  %v873_v13 = vld [vmem:[#allocation2 + $0x136] sm:$0xff] }
 0x362   : > { %6914 = vst [vmem:[#allocation182_spill] sm:$0xff] %v5165_v3 }
 0x365   : > { %2018 = vrot.lane.b32.xlu1 %v796_v6, %s3972_s11 }
 0x366   : > { %2296 = vrot.lane.b32.xlu0 %v871_v28, %s3971_s10 }
 0x367   : > { %v5169_v37 = vpop.permute.xlu1 %1818  ;;  %2020 = vrot.lane.b32.xlu2 %v797_v47, %s3972_s11  ;;  %v861_v47 = vld [vmem:[#allocation2 + $0x76] sm:$0xff] }
 0x368   : > { %6915 = vst [vmem:[#allocation183_spill] sm:$0xff] %v5169_v37  ;;  %v5172_v1 = vpop.permute.xlu0 %1816  ;;  %v809_v37 = vld [vmem:[#allocation2 + $0x135] sm:$0xff] }
 0x369   : > { %6916 = vst [vmem:[#allocation184_spill] sm:$0xff] %v5172_v1  ;;  %v5174_v41 = vpop.permute.xlu2 %1844  ;;  %v798_v1 = vld [vmem:[#allocation2 + $0x85] sm:$0xff] }
 0x36a   : > { %6917 = vst [vmem:[#allocation185_spill] sm:$0xff] %v5174_v41 }
 0x36d   : > { %2298 = vrot.lane.b32.xlu1 %v872_v18, %s3971_s10 }
 0x36e   : > { %2274 = vrot.lane.b32.xlu0 %v860_v32, %s3971_s10 }
 0x36f   : > { %v5178_v3 = vpop.permute.xlu1 %1824  ;;  %2300 = vrot.lane.b32.xlu2 %v873_v13, %s3971_s10  ;;  %v886_v13 = vld [vmem:[#allocation2 + $0x206] sm:$0xff] }
 0x370   : > { %6918 = vst [vmem:[#allocation186_spill] sm:$0xff] %v5178_v3  ;;  %v5181_v28 = vpop.permute.xlu0 %1822  ;;  %v822_v3 = vld [vmem:[#allocation2 + $0x205] sm:$0xff] }
 0x371   : > { %6919 = vst [vmem:[#allocation187_spill] sm:$0xff] %v5181_v28  ;;  %v5183_v6 = vpop.permute.xlu2 %1850  ;;  %v874_v28 = vld [vmem:[#allocation2 + $0x146] sm:$0xff] }
 0x372   : > { %6920 = vst [vmem:[#allocation188_spill] sm:$0xff] %v5183_v6 }
 0x375   : > { %2276 = vrot.lane.b32.xlu1 %v861_v47, %s3971_s10 }
 0x376   : > { %2044 = vrot.lane.b32.xlu0 %v809_v37, %s3972_s11 }
 0x377   : > { %v5187_v41 = vpop.permute.xlu1 %1830  ;;  %2022 = vrot.lane.b32.xlu2 %v798_v1, %s3972_s11  ;;  %v2846_v1 = vld [vmem:[%s6732_s1 + $0x18] sm:$0xf] }
 0x378   : > { %6921 = vst [vmem:[#allocation189_spill] sm:$0xff] %v5187_v41  ;;  %v5190_v32 = vpop.permute.xlu0 %1828  ;;  %3773 = vmatpush.msk.msra.mxu0 %vm3044_vm2, %v2846_v1  ;;  %3842 = vmatpush.msk.msra.mxu1 %vm3044_vm2, %v2846_v1  ;;  %v823_v41 = vld [vmem:[#allocation2 + $0x215] sm:$0xff] }
 0x379   : > { %6922 = vst [vmem:[#allocation190_spill] sm:$0xff] %v5190_v32  ;;  %v5192_v18 = vpop.permute.xlu2 %1856  ;;  %3843 = vmatpush.msk.msra.mxu2 %vm3044_vm2, %v2846_v1  ;;  %3844 = vmatpush.msk.msra.mxu3 %vm3044_vm2, %v2846_v1  ;;  %v811_v32 = vld [vmem:[#allocation2 + $0x155] sm:$0xff] }
 0x37a   : > { %6923 = vst [vmem:[#allocation191_spill] sm:$0xff] %v5192_v18  ;;  %v2845_v18 = vld [vmem:[%s6732_s1 + $0x10] sm:$0xff] }
 0x37b   : > { %3061 = vmatpush.msra.mxu0 %v2845_v18  ;;  %3845 = vmatpush.msra.mxu1 %v2845_v18 }
 0x37c   : > { %3846 = vmatpush.msra.mxu2 %v2845_v18  ;;  %3847 = vmatpush.msra.mxu3 %v2845_v18  ;;  %v875_v18 = vld [vmem:[#allocation2 + $0x156] sm:$0xff] }
 0x37d   : > { %2326 = vrot.lane.b32.xlu1 %v886_v13, %s3971_s10  ;;  %v862_v13 = vld [vmem:[#allocation2 + $0x86] sm:$0xff] }
 0x37e   : > { %2070 = vrot.lane.b32.xlu0 %v822_v3, %s3972_s11  ;;  %v810_v3 = vld [vmem:[#allocation2 + $0x145] sm:$0xff] }
 0x37f   : > { %v5196_v6 = vpop.permute.xlu1 %1836  ;;  %2302 = vrot.lane.b32.xlu2 %v874_v28, %s3971_s10  ;;  %v799_v28 = vld [vmem:[#allocation2 + $0x95] sm:$0xff] }
 0x380   : > { %6924 = vst [vmem:[#allocation192_spill] sm:$0xff] %v5196_v6  ;;  %v5199_v37 = vpop.permute.xlu0 %1834 }
 0x381   : > { %6925 = vst [vmem:[#allocation193_spill] sm:$0xff] %v5199_v37  ;;  %v5201_v47 = vpop.permute.xlu2 %1862 }
 0x382   : > { %6926 = vst [vmem:[#allocation194_spill] sm:$0xff] %v5201_v47  ;;  %v2844_v47 = vld [vmem:[%s6732_s1 + $0x8] sm:$0xff] }
 0x383   : > { %3062 = vmatpush.msra.mxu0 %v2844_v47  ;;  %3848 = vmatpush.msra.mxu1 %v2844_v47 }
 0x384   : > { %3849 = vmatpush.msra.mxu2 %v2844_v47  ;;  %3850 = vmatpush.msra.mxu3 %v2844_v47  ;;  %v863_v47 = vld [vmem:[#allocation2 + $0x96] sm:$0xff] }
 0x385   : > { %2278 = vrot.lane.b32.xlu1 %v862_v13, %s3971_s10  ;;  %v2843_v13 = vld [vmem:[%s6732_s1] sm:$0xff] }
 0x386   : > { %2046 = vrot.lane.b32.xlu0 %v810_v3, %s3972_s11  ;;  %v887_v3 = vld [vmem:[#allocation2 + $0x216] sm:$0xff]  ;;  %3063 = vmatpush.msra.mxu0 %v2843_v13 }
 0x387   : > { %v5214_v6 = vpop.permute.xlu1 %1842  ;;  %2024 = vrot.lane.b32.xlu2 %v799_v28, %s3972_s11  ;;  %3851 = vmatpush.msra.mxu1 %v2843_v13 }
 0x388   : > { %6927 = vst [vmem:[#allocation195_spill] sm:$0xff] %v5214_v6  ;;  %v5217_v37 = vpop.permute.xlu0 %1840  ;;  %3852 = vmatpush.msra.mxu2 %v2843_v13  ;;  %3853 = vmatpush.msra.mxu3 %v2843_v13 }
 0x389   : > { %6928 = vst [vmem:[#allocation196_spill] sm:$0xff] %v5217_v37  ;;  %v2263_v1 = vpop.permute.xlu2 %2262 }
 0x38d   : > { %2328 = vrot.lane.b32.xlu1 %v887_v3, %s3971_s10 }
 0x38e   : > { %2072 = vrot.lane.b32.xlu0 %v823_v41, %s3972_s11 }
 0x38f   : > { %v5224_v28 = vpop.permute.xlu1 %1848  ;;  %2304 = vrot.lane.b32.xlu2 %v875_v18, %s3971_s10  ;;  %v888_v18 = vld [vmem:[#allocation2 + $0x226] sm:$0xff] }
 0x390   : > { %6929 = vst [vmem:[#allocation197_spill] sm:$0xff] %v5224_v28  ;;  %v5227_v6 = vpop.permute.xlu0 %1846  ;;  %v824_v28 = vld [vmem:[#allocation2 + $0x225] sm:$0xff] }
 0x391   : > { %6930 = vst [vmem:[#allocation198_spill] sm:$0xff] %v5227_v6  ;;  %v5229_v37 = vpop.permute.xlu2 %1866  ;;  %v876_v6 = vld [vmem:[#allocation2 + $0x166] sm:$0xff] }
 0x392   : > { %6931 = vst [vmem:[#allocation199_spill] sm:$0xff] %v5229_v37 }
 0x395   : > { %2280 = vrot.lane.b32.xlu1 %v863_v47, %s3971_s10  ;;  %v470_v47 = vld [vmem:[#allocation2] sm:$0xff] }
 0x396   : > { %2048 = vrot.lane.b32.xlu0 %v811_v32, %s3972_s11 }
 0x397   : > { %v5233_v13 = vpop.permute.xlu1 %1854  ;;  %2026 = vrot.lane.b32.xlu2 %v800_v42, %s3972_s11  ;;  %v864_v42 = vld [vmem:[#allocation2 + $0xa6] sm:$0xff] }
 0x398   : > { %6932 = vst [vmem:[#allocation200_spill] sm:$0xff] %v5233_v13  ;;  %v5236_v41 = vpop.permute.xlu0 %1852 }
 0x399   : > { %6933 = vst [vmem:[#allocation201_spill] sm:$0xff] %v5236_v41  ;;  %v5238_v3 = vpop.permute.xlu2 %1868  ;;  %v812_v41 = vld [vmem:[#allocation2 + $0x165] sm:$0xff] }
 0x39a   : > { %6934 = vst [vmem:[#allocation202_spill] sm:$0xff] %v5238_v3  ;;  %v2454_v3 = vsel %vm212_vm0, %v470_v47, %v4488_v48 }
 0x39d   : > { %2330 = vrot.lane.b32.xlu1 %v888_v18, %s3971_s10 }
 0x39e   : > { %2074 = vrot.lane.b32.xlu0 %v824_v28, %s3972_s11  ;;  %v2519_v28 = vsel %vm2518_vm4, %v2454_v3, %v4683_v54 }
 0x39f   : > { %v5242_v37 = vpop.permute.xlu1 %1860  ;;  %2306 = vrot.lane.b32.xlu2 %v876_v6, %s3971_s10  ;;  %v2584_v6 = vsel %vm2583_vm3, %v2519_v28, %v4841_v45  ;;  %v471_v45 = vld [vmem:[#allocation2 + $0x10] sm:$0xff] }
 0x3a0   : > { %6935 = vst [vmem:[#allocation203_spill] sm:$0xff] %v5242_v37  ;;  %v5245_v32 = vpop.permute.xlu0 %1858  ;;  %v2649_v18 = vsel %vm2648_vm6, %v2584_v6, %v5073_v50  ;;  %v877_v28 = vld [vmem:[#allocation2 + $0x176] sm:$0xff]  ;;  %v2455_v50 = vsel %vm212_vm0, %v471_v45, %v4503_v57 }
 0x3a1   : > { %v5247_v13 = vpop.permute.xlu2 %2014 }
 0x3a5   : > { %2282 = vrot.lane.b32.xlu1 %v864_v42, %s3971_s10  ;;  %v825_v42 = vld [vmem:[#allocation2 + $0x235] sm:$0xff] }
 0x3a6   : > { %2050 = vrot.lane.b32.xlu0 %v812_v41, %s3972_s11  ;;  %v889_v41 = vld [vmem:[#allocation2 + $0x236] sm:$0xff] }
 0x3a7   : > { %v2007_v37 = vpop.permute.xlu1 %2006  ;;  %2028 = vrot.lane.b32.xlu2 %v801_v33, %s3972_s11  ;;  %v2520_v33 = vsel %vm2518_vm4, %v2455_v50, %v4652_v53  ;;  %v865_v53 = vld [vmem:[#allocation2 + $0xb6] sm:$0xff] }
 0x3a8   : > { %v2714_v48 = vsel %vm2713_vm5, %v2649_v18, %v2007_v37  ;;  %v5261_v54 = vpop.permute.xlu0 %1864  ;;  %v2585_v37 = vsel %vm2583_vm3, %v2520_v33, %v4884_v12 }
 0x3a9   : > { %v2779_v3 = vsel %vm2778_vm7, %v2714_v48, %v2263_v1  ;;  %v5264_v47 = vpop.permute.xlu2 %2294  ;;  %v2650_v6 = vsel %vm2648_vm6, %v2585_v37, %v5070_v14 }
 0x3aa   : > { %3774 = vmatmul.msk.f32.vlgmr.msra.gmra.mxu0 %vm2851_vm8, %v2779_v3  ;;  %v472_v3 = vld [vmem:[#allocation2 + $0x20] sm:$0xff] }
 0x3ab   : > { %v2456_v12 = vsel %vm212_vm0, %v472_v3, %v4483_v46  ;;  %v814_v3 = vld [vmem:[#allocation2 + $0x185] sm:$0xff] }
 0x3ac   : > { %v2521_v14 = vsel %vm2518_vm4, %v2456_v12, %v4695_v60  ;;  %v838_v60 = vld [vmem:[#allocation2 + $0x305] sm:$0xff] }
 0x3ad   : > { %2332 = vrot.lane.b32.xlu1 %v889_v41, %s3971_s10  ;;  %v813_v41 = vld [vmem:[#allocation2 + $0x175] sm:$0xff] }
 0x3ae   : > { %2076 = vrot.lane.b32.xlu0 %v825_v42, %s3972_s11  ;;  %v890_v42 = vld [vmem:[#allocation2 + $0x246] sm:$0xff] }
 0x3af   : > { %v2265_v1 = vpop.permute.xlu1 %2264  ;;  %2308 = vrot.lane.b32.xlu2 %v877_v28, %s3971_s10  ;;  %v2586_v28 = vsel %vm2583_vm3, %v2521_v14, %v4881_v22 }
 0x3b0   : > { %v2009_v18 = vpop.permute.xlu0 %2008  ;;  %v2651_v33 = vsel %vm2648_vm6, %v2586_v28, %v5039_v62  ;;  %v486_v28 = vld [vmem:[#allocation2 + $0x100] sm:$0xff] }
 0x3b1   : > { %v2715_v48 = vsel %vm2713_vm5, %v2650_v6, %v2009_v18  ;;  %v5279_v57 = vpop.permute.xlu2 %2272  ;;  %v473_v6 = vld [vmem:[#allocation2 + $0x30] sm:$0xff] }
 0x3b2   : > { %v2780_v45 = vsel %vm2778_vm7, %v2715_v48, %v2265_v1  ;;  %v826_v48 = vld [vmem:[#allocation2 + $0x245] sm:$0xff]  ;;  %v2457_v22 = vsel %vm212_vm0, %v473_v6, %v4498_v55 }
 0x3b3   : > { %3775 = vmatmul.msk.f32.gmra.mxu0 %vm2851_vm8, %v2780_v45  ;;  %v2522_v62 = vsel %vm2518_vm4, %v2457_v22, %v4692_v23  ;;  %v475_v22 = vld [vmem:[#allocation2 + $0x50] sm:$0xff] }
 0x3b4   : > { %v2587_v45 = vsel %vm2583_vm3, %v2522_v62, %v4850_v11  ;;  %v902_v11 = vld [vmem:[#allocation2 + $0x306] sm:$0xff] }
 0x3b5   : > { %2284 = vrot.lane.b32.xlu1 %v865_v53, %s3971_s10  ;;  %v878_v62 = vld [vmem:[#allocation2 + $0x186] sm:$0xff] }
 0x3b6   : > { %2052 = vrot.lane.b32.xlu0 %v813_v41, %s3972_s11  ;;  %v474_v41 = vld [vmem:[#allocation2 + $0x40] sm:$0xff] }
 0x3b7   : > { %v2267_v50 = vpop.permute.xlu1 %2266  ;;  %2334 = vrot.lane.b32.xlu2 %v890_v42, %s3971_s10  ;;  %v2652_v42 = vsel %vm2648_vm6, %v2587_v45, %v5082_v43  ;;  %v2470_v43 = vsel %vm212_vm0, %v486_v28, %v4539_v17  ;;  %v903_v45 = vld [vmem:[#allocation2 + $0x316] sm:$0xff] }
 0x3b8   : > { %v2011_v37 = vpop.permute.xlu0 %2010 }
 0x3b9   : > { %v2716_v1 = vsel %vm2713_vm5, %v2651_v33, %v2011_v37  ;;  %v5295_v46 = vpop.permute.xlu2 %2042  ;;  %v2458_v33 = vsel %vm212_vm0, %v474_v41, %v4441_v19 }
 0x3ba   : > { %v2781_v18 = vsel %vm2778_vm7, %v2716_v1, %v2267_v50  ;;  %v802_v50 = vld [vmem:[#allocation2 + $0xc5] sm:$0xff]  ;;  %v2523_v37 = vsel %vm2518_vm4, %v2458_v33, %v4661_v36  ;;  %v827_v1 = vld [vmem:[#allocation2 + $0x255] sm:$0xff] }
 0x3bb   : > { %3776 = vmatmul.msk.f32.gmra.mxu0 %vm2851_vm8, %v2781_v18  ;;  %v2588_v6 = vsel %vm2583_vm3, %v2523_v37, %v4893_v39  ;;  %v2535_v18 = vsel %vm2518_vm4, %v2470_v43, %v4697_v4  ;;  %v867_v33 = vld [vmem:[#allocation2 + $0xd6] sm:$0xff] }
 0x3bc   : > { %v2653_v19 = vsel %vm2648_vm6, %v2588_v6, %v5079_v31  ;;  %v2600_v36 = vsel %vm2583_vm3, %v2535_v18, %v4929_v40  ;;  %v476_v6 = vld [vmem:[#allocation2 + $0x60] sm:$0xff] }
 0x3bd   : > { %2102 = vrot.lane.b32.xlu1 %v838_v60, %s3972_s11  ;;  %v2718_v60 = vsel %vm2713_vm5, %v2653_v19, %v5247_v13  ;;  %v2665_v39 = vsel %vm2648_vm6, %v2600_v36, %v5115_v20  ;;  %v866_v13 = vld [vmem:[#allocation2 + $0xc6] sm:$0xff]  ;;  %v2459_v20 = vsel %vm212_vm0, %v475_v22, %v4454_v26  ;;  %v803_v36 = vld [vmem:[#allocation2 + $0xd5] sm:$0xff] }
 0x3be   : > { %2078 = vrot.lane.b32.xlu0 %v826_v48, %s3972_s11 }
 0x3bf   : > { %v2269_v53 = vpop.permute.xlu1 %2268  ;;  %2054 = vrot.lane.b32.xlu2 %v814_v3, %s3972_s11 }
 0x3c0   : > { %v2013_v12 = vpop.permute.xlu0 %2012 }
 0x3c1   : > { %v2717_v55 = vsel %vm2713_vm5, %v2652_v42, %v2013_v12  ;;  %v5311_v14 = vpop.permute.xlu2 %2020 }
 0x3c2   : > { %v2782_v23 = vsel %vm2778_vm7, %v2717_v55, %v2269_v53  ;;  %v2524_v53 = vsel %vm2518_vm4, %v2459_v20, %v4704_v59  ;;  %v487_v55 = vld [vmem:[#allocation2 + $0x110] sm:$0xff]  ;;  %v804_v20 = vld [vmem:[#allocation2 + $0xe5] sm:$0xff] }
 0x3c3   : > { %3777 = vmatmul.msk.f32.gmra.mxu0 %vm2851_vm8, %v2782_v23  ;;  %v891_v23 = vld [vmem:[#allocation2 + $0x256] sm:$0xff] }
 0x3c5   : > { %2030 = vrot.lane.b32.xlu1 %v802_v50, %s3972_s11  ;;  %v839_v50 = vld [vmem:[#allocation2 + $0x315] sm:$0xff] }
 0x3c6   : > { %2358 = vrot.lane.b32.xlu0 %v902_v11, %s3971_s10 }
 0x3c7   : > { %v2271_v17 = vpop.permute.xlu1 %2270  ;;  %2080 = vrot.lane.b32.xlu2 %v827_v1, %s3972_s11  ;;  %v488_v1 = vld [vmem:[#allocation2 + $0x120] sm:$0xff] }
 0x3c8   : > { %v2039_v48 = vpop.permute.xlu0 %2038  ;;  %v2783_v4 = vsel %vm2778_vm7, %v2718_v60, %v2271_v17  ;;  %v2472_v19 = vsel %vm212_vm0, %v488_v1, %v4551_v25  ;;  %v840_v17 = vld [vmem:[#allocation2 + $0x325] sm:$0xff] }
 0x3c9   : > { %v2730_v3 = vsel %vm2713_vm5, %v2665_v39, %v2039_v48  ;;  %v5338_v31 = vpop.permute.xlu2 %2300  ;;  %v2537_v60 = vsel %vm2518_vm4, %v2472_v19, %v4737_v29  ;;  %v868_v1 = vld [vmem:[#allocation2 + $0xe6] sm:$0xff] }
 0x3ca   : > { %v2795_v40 = vsel %vm2778_vm7, %v2730_v3, %v5264_v47  ;;  %v2589_v47 = vsel %vm2583_vm3, %v2524_v53, %v4890_v49  ;;  %v2471_v49 = vsel %vm212_vm0, %v487_v55, %v4506_v58  ;;  %v2602_v48 = vsel %vm2583_vm3, %v2537_v60, %v4895_v10  ;;  %v477_v10 = vld [vmem:[#allocation2 + $0x70] sm:$0xff]  ;;  %v6940_v60 = vld [vmem:[#allocation70_spill] sm:$0xff] }
 0x3cb   : > { %3778 = vmatmul.msk.f32.gmra.mxu0 %vm2851_vm8, %v2783_v4  ;;  %3790 = vmatmul.msk.f32.vlgmr.msra.gmra.mxu1 %vm2851_vm8, %v2795_v40  ;;  %v2654_v42 = vsel %vm2648_vm6, %v2589_v47, %v5048_v2  ;;  %v2536_v2 = vsel %vm2518_vm4, %v2471_v49, %v4740_v51  ;;  %v2667_v25 = vsel %vm2648_vm6, %v2602_v48, %v5127_v52 }
 0x3cc   : > { %v2601_v11 = vsel %vm2583_vm3, %v2536_v2, %v4926_v16  ;;  %v815_v16 = vld [vmem:[#allocation2 + $0x195] sm:$0xff]  ;;  %v2732_v29 = vsel %vm2713_vm5, %v2667_v25, %v5295_v46  ;;  %v2461_v46 = vsel %vm212_vm0, %v477_v10, %v4512_v63 }
 0x3cd   : > { %2310 = vrot.lane.b32.xlu1 %v878_v62, %s3971_s10  ;;  %v489_v62 = vld [vmem:[#allocation2 + $0x130] sm:$0xff] }
 0x3ce   : > { %2286 = vrot.lane.b32.xlu0 %v866_v13, %s3971_s10  ;;  %v879_v13 = vld [vmem:[#allocation2 + $0x196] sm:$0xff]  ;;  %v2473_v53 = vsel %vm212_vm0, %v489_v62, %v4548_v24 }
 0x3cf   : > { %v2041_v41 = vpop.permute.xlu1 %2040  ;;  %2360 = vrot.lane.b32.xlu2 %v903_v45, %s3971_s10  ;;  %v2526_v45 = vsel %vm2518_vm4, %v2461_v46, %v4670_v9  ;;  %v503_v62 = vld [vmem:[#allocation2 + $0x210] sm:$0xff] }
 0x3d0   : > { %v2017_v12 = vpop.permute.xlu0 %2016  ;;  %v2591_v47 = vsel %vm2583_vm3, %v2526_v45, %v4902_v30  ;;  %v829_v46 = vld [vmem:[#allocation2 + $0x275] sm:$0xff]  ;;  %v6944_v45 = vld [vmem:[#allocation31_spill] sm:$0xff] }
 0x3d1   : > { %v2719_v26 = vsel %vm2713_vm5, %v2654_v42, %v2017_v12  ;;  %v5356_v28 = vpop.permute.xlu2 %2022  ;;  %v2656_v42 = vsel %vm2648_vm6, %v2591_v47, %v5088_v5 }
 0x3d2   : > { %v2784_v59 = vsel %vm2778_vm7, %v2719_v26, %v5279_v57  ;;  %v2666_v57 = vsel %vm2648_vm6, %v2601_v11, %v5084_v34  ;;  %v2460_v34 = vsel %vm212_vm0, %v476_v6, %v4515_v0  ;;  %v2721_v9 = vsel %vm2713_vm5, %v2656_v42, %v5311_v14  ;;  %v502_v26 = vld [vmem:[#allocation2 + $0x200] sm:$0xff]  ;;  %v6937_v6 = vld [vmem:[#allocation60_spill] sm:$0xff] }
 0x3d3   : > { %3779 = vmatmul.msk.f32.gmra.mxu0 %vm2851_vm8, %v2784_v59  ;;  %v2731_v58 = vsel %vm2713_vm5, %v2666_v57, %v2041_v41  ;;  %v2525_v39 = vsel %vm2518_vm4, %v2460_v34, %v4701_v56  ;;  %v2538_v41 = vsel %vm2518_vm4, %v2473_v53, %v4706_v44  ;;  %v904_v14 = vld [vmem:[#allocation2 + $0x326] sm:$0xff]  ;;  %v6945_v53 = vld [vmem:[#allocation81_spill] sm:$0xff] }
 0x3d4   : > { %v2590_v4 = vsel %vm2583_vm3, %v2525_v39, %v4859_v21  ;;  %v2603_v63 = vsel %vm2583_vm3, %v2538_v41, %v4938_v35  ;;  %v892_v59 = vld [vmem:[#allocation2 + $0x266] sm:$0xff]  ;;  %v6941_v39 = vld [vmem:[#allocation157_spill] sm:$0xff] }
 0x3d5   : > { %2336 = vrot.lane.b32.xlu1 %v891_v23, %s3971_s10  ;;  %v2655_v0 = vsel %vm2648_vm6, %v2590_v4, %v5091_v61  ;;  %v828_v61 = vld [vmem:[#allocation2 + $0x265] sm:$0xff]  ;;  %v2668_v30 = vsel %vm2648_vm6, %v2603_v63, %v5124_v15  ;;  %v2486_v15 = vsel %vm212_vm0, %v502_v26, %v4553_v27  ;;  %v6942_v4 = vld [vmem:[#allocation120_spill] sm:$0xff]  ;;  %v6946_v41 = vld [vmem:[#allocation121_spill] sm:$0xff] }
 0x3d6   : > { %2104 = vrot.lane.b32.xlu0 %v839_v50, %s3972_s11  ;;  %v880_v23 = vld [vmem:[#allocation2 + $0x1a6] sm:$0xff]  ;;  %v2551_v50 = vsel %vm2518_vm4, %v2486_v15, %v4785_v38 }
 0x3d7   : > { %v2019_v37 = vpop.permute.xlu1 %2018  ;;  %2288 = vrot.lane.b32.xlu2 %v867_v33, %s3971_s10  ;;  %v2616_v49 = vsel %vm2583_vm3, %v2551_v50, %v4971_v8  ;;  %v816_v8 = vld [vmem:[#allocation2 + $0x1a5] sm:$0xff] }
 0x3d8   : > { %v2297_v43 = vpop.permute.xlu0 %2296  ;;  %v2720_v3 = vsel %vm2713_vm5, %v2655_v0, %v2019_v37  ;;  %v2681_v2 = vsel %vm2648_vm6, %v2616_v49, %v5129_v7  ;;  %v490_v37 = vld [vmem:[#allocation2 + $0x140] sm:$0xff]  ;;  %v6949_v15 = vld [vmem:[#allocation59_spill] sm:$0xff] }
 0x3d9   : > { %v2796_v51 = vsel %vm2778_vm7, %v2731_v58, %v2297_v43  ;;  %v5374_v18 = vpop.permute.xlu2 %2302  ;;  %v6936_v58 = vld [vmem:[#allocation6_spill] sm:$0xff]  ;;  %v6938_v7 = vld [vmem:[#allocation9_spill] sm:$0xff] }
 0x3da   : > { %3791 = vmatmul.msk.f32.gmra.mxu1 %vm2851_vm8, %v2796_v51  ;;  %v2474_v19 = vsel %vm212_vm0, %v490_v37, %v6938_v7  ;;  %v830_v49 = vld [vmem:[#allocation2 + $0x285] sm:$0xff] }
 0x3dd   : > { %2056 = vrot.lane.b32.xlu1 %v815_v16, %s3972_s11  ;;  %v893_v16 = vld [vmem:[#allocation2 + $0x276] sm:$0xff] }
 0x3de   : > { %2032 = vrot.lane.b32.xlu0 %v803_v36, %s3972_s11  ;;  %v6939_v36 = vld [vmem:[#allocation111_spill] sm:$0xff] }
 0x3df   : > { %v2299_v56 = vpop.permute.xlu1 %2298  ;;  %2106 = vrot.lane.b32.xlu2 %v840_v17, %s3972_s11  ;;  %v2539_v17 = vsel %vm2518_vm4, %v2474_v19, %v6940_v60  ;;  %v504_v60 = vld [vmem:[#allocation2 + $0x220] sm:$0xff] }
 0x3e0   : > { %v2275_v22 = vpop.permute.xlu0 %2274  ;;  %v2797_v21 = vsel %vm2778_vm7, %v2732_v29, %v2299_v56  ;;  %v2604_v25 = vsel %vm2583_vm3, %v2539_v17, %v6942_v4  ;;  %v6943_v56 = vld [vmem:[#allocation162_spill] sm:$0xff] }
 0x3e1   : > { %v2785_v40 = vsel %vm2778_vm7, %v2720_v3, %v2275_v22  ;;  %v5401_v52 = vpop.permute.xlu2 %2024  ;;  %v2669_v10 = vsel %vm2648_vm6, %v2604_v25, %v6943_v56  ;;  %v6956_v4 = vld [vmem:[#allocation30_spill] sm:$0xff] }
 0x3e2   : > { %3780 = vmatmul.msk.f32.gmra.mxu0 %vm2851_vm8, %v2785_v40  ;;  %3792 = vmatmul.msk.f32.gmra.mxu1 %vm2851_vm8, %v2797_v21  ;;  %v2488_v25 = vsel %vm212_vm0, %v504_v60, %v6956_v4  ;;  %v6958_v56 = vld [vmem:[#allocation134_spill] sm:$0xff]  ;;  %v895_v4 = vld [vmem:[#allocation2 + $0x296] sm:$0xff] }
 0x3e5   : > { %2082 = vrot.lane.b32.xlu1 %v828_v61, %s3972_s11 }
 0x3e6   : > { %2312 = vrot.lane.b32.xlu0 %v879_v13, %s3971_s10  ;;  %v817_v13 = vld [vmem:[#allocation2 + $0x1b5] sm:$0xff] }
 0x3e7   : > { %v2277_v24 = vpop.permute.xlu1 %2276  ;;  %2034 = vrot.lane.b32.xlu2 %v804_v20, %s3972_s11  ;;  %v2487_v20 = vsel %vm212_vm0, %v503_v62, %v6944_v45  ;;  %v894_v45 = vld [vmem:[#allocation2 + $0x286] sm:$0xff] }
 0x3e8   : > { %v2045_v12 = vpop.permute.xlu0 %2044  ;;  %v2786_v44 = vsel %vm2778_vm7, %v2721_v9, %v2277_v24  ;;  %v2552_v47 = vsel %vm2518_vm4, %v2487_v20, %v6945_v53  ;;  %v6947_v9 = vld [vmem:[#allocation184_spill] sm:$0xff]  ;;  %v6960_v20 = vld [vmem:[#allocation10_spill] sm:$0xff] }
 0x3e9   : > { %v2733_v55 = vsel %vm2713_vm5, %v2668_v30, %v2045_v12  ;;  %v5428_v5 = vpop.permute.xlu2 %2304  ;;  %v2617_v42 = vsel %vm2583_vm3, %v2552_v47, %v6946_v41  ;;  %v842_v47 = vld [vmem:[#allocation2 + $0x345] sm:$0xff]  ;;  %v6961_v41 = vld [vmem:[#allocation56_spill] sm:$0xff] }
 0x3ea   : > { %3781 = vmatmul.msk.f32.gmra.mxu0 %vm2851_vm8, %v2786_v44  ;;  %v2798_v35 = vsel %vm2778_vm7, %v2733_v55, %v5338_v31  ;;  %v478_v31 = vld [vmem:[#allocation2 + $0x80] sm:$0xff]  ;;  %v2682_v24 = vsel %vm2648_vm6, %v2617_v42, %v6947_v9  ;;  %v491_v55 = vld [vmem:[#allocation2 + $0x150] sm:$0xff] }
 0x3eb   : > { %3793 = vmatmul.msk.f32.gmra.mxu1 %vm2851_vm8, %v2798_v35  ;;  %v2462_v43 = vsel %vm212_vm0, %v478_v31, %v6936_v58  ;;  %v805_v35 = vld [vmem:[#allocation2 + $0xf5] sm:$0xff] }
 0x3ec   : > { %v2527_v51 = vsel %vm2518_vm4, %v2462_v43, %v6937_v6  ;;  %v6954_v58 = vld [vmem:[#allocation112_spill] sm:$0xff] }
 0x3ed   : > { %2362 = vrot.lane.b32.xlu1 %v904_v14, %s3971_s10  ;;  %v2592_v34 = vsel %vm2583_vm3, %v2527_v51, %v6939_v36  ;;  %v6948_v14 = vld [vmem:[#allocation11_spill] sm:$0xff]  ;;  %v6955_v51 = vld [vmem:[#allocation172_spill] sm:$0xff] }
 0x3ee   : > { %2338 = vrot.lane.b32.xlu0 %v892_v59, %s3971_s10  ;;  %v2657_v48 = vsel %vm2648_vm6, %v2592_v34, %v6941_v39  ;;  %v869_v39 = vld [vmem:[#allocation2 + $0xf6] sm:$0xff] }
 0x3ef   : > { %v2327_v33 = vpop.permute.xlu1 %2326  ;;  %2314 = vrot.lane.b32.xlu2 %v880_v23, %s3971_s10  ;;  %v2722_v0 = vsel %vm2713_vm5, %v2657_v48, %v5356_v28  ;;  %v841_v28 = vld [vmem:[#allocation2 + $0x335] sm:$0xff]  ;;  %v906_v48 = vld [vmem:[#allocation2 + $0x346] sm:$0xff] }
 0x3f0   : > { %v2071_v11 = vpop.permute.xlu0 %2070  ;;  %v905_v23 = vld [vmem:[#allocation2 + $0x336] sm:$0xff] }
 0x3f1   : > { %v2746_v27 = vsel %vm2713_vm5, %v2681_v2, %v2071_v11  ;;  %v5446_v57 = vpop.permute.xlu2 %2026  ;;  %v6951_v2 = vld [vmem:[#allocation106_spill] sm:$0xff] }
 0x3f2   : > { %v2811_v38 = vsel %vm2778_vm7, %v2746_v27, %v2327_v33  ;;  %v6950_v33 = vld [vmem:[#allocation19_spill] sm:$0xff]  ;;  %v6952_v27 = vld [vmem:[#allocation69_spill] sm:$0xff] }
 0x3f3   : > { %3806 = vmatmul.msk.f32.vlgmr.msra.gmra.mxu2 %vm2851_vm8, %v2811_v38  ;;  %v2475_v31 = vsel %vm212_vm0, %v491_v55, %v6950_v33  ;;  %v6953_v38 = vld [vmem:[#allocation164_spill] sm:$0xff] }
 0x3f4   : > { %v2540_v37 = vsel %vm2518_vm4, %v2475_v31, %v6952_v27  ;;  %v505_v27 = vld [vmem:[#allocation2 + $0x230] sm:$0xff] }
 0x3f5   : > { %2290 = vrot.lane.b32.xlu1 %v868_v1, %s3971_s10  ;;  %v2605_v43 = vsel %vm2583_vm3, %v2540_v37, %v6954_v58  ;;  %v6968_v58 = vld [vmem:[#allocation20_spill] sm:$0xff] }
 0x3f6   : > { %2058 = vrot.lane.b32.xlu0 %v816_v8, %s3972_s11 }
 0x3f7   : > { %v2279_v29 = vpop.permute.xlu1 %2278  ;;  %2340 = vrot.lane.b32.xlu2 %v893_v16, %s3971_s10  ;;  %v2670_v16 = vsel %vm2648_vm6, %v2605_v43, %v6955_v51  ;;  %v2489_v43 = vsel %vm212_vm0, %v505_v27, %v6968_v58  ;;  %v6970_v51 = vld [vmem:[#allocation133_spill] sm:$0xff]  ;;  %v6983_v27 = vld [vmem:[#allocation187_spill] sm:$0xff] }
 0x3f8   : > { %v2047_v3 = vpop.permute.xlu0 %2046  ;;  %v2787_v22 = vsel %vm2778_vm7, %v2722_v0, %v2279_v29  ;;  %v6957_v0 = vld [vmem:[#allocation71_spill] sm:$0xff] }
 0x3f9   : > { %v2734_v21 = vsel %vm2713_vm5, %v2669_v10, %v2047_v3  ;;  %3782 = vmatmul.msk.f32.gmra.mxu0 %vm2851_vm8, %v2787_v22  ;;  %v5474_v40 = vpop.permute.xlu2 %2306  ;;  %v2553_v29 = vsel %vm2518_vm4, %v2488_v25, %v6957_v0  ;;  %v6959_v22 = vld [vmem:[#allocation183_spill] sm:$0xff] }
 0x3fa   : > { %v2799_v61 = vsel %vm2778_vm7, %v2734_v21, %v5374_v18  ;;  %v479_v18 = vld [vmem:[#allocation2 + $0x90] sm:$0xff]  ;;  %v2618_v10 = vsel %vm2583_vm3, %v2553_v29, %v6958_v56 }
 0x3fb   : > { %3794 = vmatmul.msk.f32.gmra.mxu1 %vm2851_vm8, %v2799_v61  ;;  %v2463_v59 = vsel %vm212_vm0, %v479_v18, %v6948_v14  ;;  %v2683_v21 = vsel %vm2648_vm6, %v2618_v10, %v6959_v22  ;;  %v6962_v18 = vld [vmem:[#allocation18_spill] sm:$0xff]  ;;  %v6966_v14 = vld [vmem:[#allocation123_spill] sm:$0xff]  ;;  %v843_v29 = vld [vmem:[#allocation2 + $0x355] sm:$0xff] }
 0x3fc   : > { %v2528_v50 = vsel %vm2518_vm4, %v2463_v59, %v6949_v15  ;;  %v6972_v25 = vld [vmem:[#allocation7_spill] sm:$0xff]  ;;  %v6974_v22 = vld [vmem:[#allocation12_spill] sm:$0xff] }
 0x3fd   : > { %2108 = vrot.lane.b32.xlu1 %v841_v28, %s3972_s11  ;;  %v2593_v11 = vsel %vm2583_vm3, %v2528_v50, %v6951_v2  ;;  %v6967_v50 = vld [vmem:[#allocation171_spill] sm:$0xff] }
 0x3fe   : > { %2084 = vrot.lane.b32.xlu0 %v829_v46, %s3972_s11  ;;  %v2658_v1 = vsel %vm2648_vm6, %v2593_v11, %v6953_v38  ;;  %v492_v46 = vld [vmem:[#allocation2 + $0x160] sm:$0xff]  ;;  %v6973_v56 = vld [vmem:[#allocation63_spill] sm:$0xff] }
 0x3ff   : > { %v2329_v63 = vpop.permute.xlu1 %2328  ;;  %2060 = vrot.lane.b32.xlu2 %v817_v13, %s3972_s11  ;;  %v2723_v8 = vsel %vm2713_vm5, %v2658_v1, %v5401_v52  ;;  %v881_v52 = vld [vmem:[#allocation2 + $0x1b6] sm:$0xff]  ;;  %v2476_v9 = vsel %vm212_vm0, %v492_v46, %v6962_v18  ;;  %v818_v38 = vld [vmem:[#allocation2 + $0x1c5] sm:$0xff] }
 0x400   : > { %v2073_v30 = vpop.permute.xlu0 %2072  ;;  %v907_v1 = vld [vmem:[#allocation2 + $0x356] sm:$0xff] }
 0x401   : > { %v2747_v12 = vsel %vm2713_vm5, %v2682_v24, %v2073_v30  ;;  %v5491_v44 = vpop.permute.xlu2 %2028  ;;  %v6963_v24 = vld [vmem:[#allocation114_spill] sm:$0xff]  ;;  %v6976_v46 = vld [vmem:[#allocation73_spill] sm:$0xff] }
 0x402   : > { %v2812_v26 = vsel %vm2778_vm7, %v2747_v12, %v2329_v63  ;;  %v831_v63 = vld [vmem:[#allocation2 + $0x295] sm:$0xff] }
 0x403   : > { %3807 = vmatmul.msk.f32.gmra.mxu2 %vm2851_vm8, %v2812_v26  ;;  %v6964_v12 = vld [vmem:[#allocation61_spill] sm:$0xff]  ;;  %v6965_v26 = vld [vmem:[#allocation163_spill] sm:$0xff] }
 0x404   : > { %v2541_v55 = vsel %vm2518_vm4, %v2476_v9, %v6964_v12  ;;  %v6979_v18 = vld [vmem:[#allocation165_spill] sm:$0xff] }
 0x405   : > { %2036 = vrot.lane.b32.xlu1 %v805_v35, %s3972_s11  ;;  %v2606_v59 = vsel %vm2583_vm3, %v2541_v55, %v6966_v14  ;;  %v883_v14 = vld [vmem:[#allocation2 + $0x1d6] sm:$0xff] }
 0x406   : > { %2364 = vrot.lane.b32.xlu0 %v905_v23, %s3971_s10 }
 0x407   : > { %v2281_v6 = vpop.permute.xlu1 %2280  ;;  %2086 = vrot.lane.b32.xlu2 %v830_v49, %s3972_s11  ;;  %v2671_v49 = vsel %vm2648_vm6, %v2606_v59, %v6967_v50  ;;  %v819_v59 = vld [vmem:[#allocation2 + $0x1d5] sm:$0xff] }
 0x408   : > { %v2049_v7 = vpop.permute.xlu0 %2048  ;;  %v2788_v19 = vsel %vm2778_vm7, %v2723_v8, %v2281_v6  ;;  %v6969_v8 = vld [vmem:[#allocation84_spill] sm:$0xff] }
 0x409   : > { %v2735_v36 = vsel %vm2713_vm5, %v2670_v16, %v2049_v7  ;;  %3783 = vmatmul.msk.f32.gmra.mxu0 %vm2851_vm8, %v2788_v19  ;;  %v5519_v34 = vpop.permute.xlu2 %2308  ;;  %v2554_v6 = vsel %vm2518_vm4, %v2489_v43, %v6969_v8  ;;  %v6971_v19 = vld [vmem:[#allocation173_spill] sm:$0xff] }
 0x40a   : > { %v2800_v17 = vsel %vm2778_vm7, %v2735_v36, %v5428_v5  ;;  %v480_v5 = vld [vmem:[#allocation2 + $0xa0] sm:$0xff]  ;;  %v2619_v16 = vsel %vm2583_vm3, %v2554_v6, %v6970_v51 }
 0x40b   : > { %3795 = vmatmul.msk.f32.gmra.mxu1 %vm2851_vm8, %v2800_v17  ;;  %v2464_v53 = vsel %vm212_vm0, %v480_v5, %v6960_v20  ;;  %v2684_v36 = vsel %vm2648_vm6, %v2619_v16, %v6971_v19  ;;  %v832_v5 = vld [vmem:[#allocation2 + $0x2a5] sm:$0xff] }
 0x40c   : > { %v2529_v42 = vsel %vm2518_vm4, %v2464_v53, %v6961_v41  ;;  %v6978_v53 = vld [vmem:[#allocation122_spill] sm:$0xff] }
 0x40d   : > { %2316 = vrot.lane.b32.xlu1 %v881_v52, %s3971_s10  ;;  %v2594_v30 = vsel %vm2583_vm3, %v2529_v42, %v6963_v24  ;;  %v896_v16 = vld [vmem:[#allocation2 + $0x2a6] sm:$0xff] }
 0x40e   : > { %2292 = vrot.lane.b32.xlu0 %v869_v39, %s3971_s10  ;;  %v2659_v35 = vsel %vm2648_vm6, %v2594_v30, %v6965_v26  ;;  %v493_v39 = vld [vmem:[#allocation2 + $0x170] sm:$0xff]  ;;  %v506_v26 = vld [vmem:[#allocation2 + $0x240] sm:$0xff] }
 0x40f   : > { %v2331_v3 = vpop.permute.xlu1 %2330  ;;  %2366 = vrot.lane.b32.xlu2 %v906_v48, %s3971_s10  ;;  %v2724_v23 = vsel %vm2713_vm5, %v2659_v35, %v5446_v57  ;;  %v882_v57 = vld [vmem:[#allocation2 + $0x1c6] sm:$0xff] }
 0x410   : > { %v2075_v62 = vpop.permute.xlu0 %2074 }
 0x411   : > { %v2748_v61 = vsel %vm2713_vm5, %v2683_v21, %v2075_v62  ;;  %v5536_v28 = vpop.permute.xlu2 %2334  ;;  %v2477_v21 = vsel %vm212_vm0, %v493_v39, %v6974_v22  ;;  %v6975_v62 = vld [vmem:[#allocation113_spill] sm:$0xff] }
 0x412   : > { %v2813_v13 = vsel %vm2778_vm7, %v2748_v61, %v2331_v3  ;;  %v5592_v3 = vld [vmem:[%s6733_s2] ss:$0 sm:$0xff] }
 0x413   : > { %3808 = vmatmul.msk.f32.gmra.mxu2 %vm2851_vm8, %v2813_v13  ;;  %v2542_v13 = vsel %vm2518_vm4, %v2477_v21, %v6976_v46 }
 0x415   : > { %2342 = vrot.lane.b32.xlu1 %v894_v45, %s3971_s10  ;;  %v6977_v45 = vld [vmem:[#allocation160_spill] sm:$0xff] }
 0x416   : > { %2110 = vrot.lane.b32.xlu0 %v842_v47, %s3972_s11  ;;  %v2607_v47 = vsel %vm2583_vm3, %v2542_v13, %v6978_v53 }
 0x417   : > { %v2283_v15 = vpop.permute.xlu1 %2282  ;;  %2088 = vrot.lane.b32.xlu2 %v831_v63, %s3972_s11  ;;  %v2672_v9 = vsel %vm2648_vm6, %v2607_v47, %v6979_v18 }
 0x418   : > { %v2051_v33 = vpop.permute.xlu0 %2050  ;;  %v2789_v31 = vsel %vm2778_vm7, %v2724_v23, %v2283_v15  ;;  %v908_v23 = vld [vmem:[#allocation2 + $0x366] sm:$0xff] }
 0x419   : > { %v2736_v2 = vsel %vm2713_vm5, %v2671_v49, %v2051_v33  ;;  %3784 = vmatmul.msk.f32.gmra.mxu0 %vm2851_vm8, %v2789_v31  ;;  %v5564_v11 = vpop.permute.xlu2 %2054  ;;  %v6980_v15 = vld [vmem:[#allocation34_spill] sm:$0xff]  ;;  %v6981_v49 = vld [vmem:[#allocation83_spill] sm:$0xff]  ;;  %v6982_v31 = vld [vmem:[#allocation124_spill] sm:$0xff] }
 0x41a   : > { %v2801_v37 = vsel %vm2778_vm7, %v2736_v2, %v5474_v40  ;;  %v481_v40 = vld [vmem:[#allocation2 + $0xb0] sm:$0xff]  ;;  %v2490_v50 = vsel %vm212_vm0, %v506_v26, %v6980_v15 }
 0x41b   : > { %3796 = vmatmul.msk.f32.gmra.mxu1 %vm2851_vm8, %v2801_v37  ;;  %v2465_v0 = vsel %vm212_vm0, %v481_v40, %v6972_v25  ;;  %v2555_v33 = vsel %vm2518_vm4, %v2490_v50, %v6981_v49  ;;  %v6992_v15 = vld [vmem:[#allocation115_spill] sm:$0xff] }
 0x41c   : > { %v2530_v10 = vsel %vm2518_vm4, %v2465_v0, %v6973_v56  ;;  %v2620_v2 = vsel %vm2583_vm3, %v2555_v33, %v6982_v31  ;;  %v6993_v33 = vld [vmem:[#allocation109_spill] sm:$0xff] }
 0x41d   : > { %2318 = vrot.lane.b32.xlu1 %v882_v57, %s3971_s10  ;;  %v2595_v61 = vsel %vm2583_vm3, %v2530_v10, %v6975_v62  ;;  %v2685_v37 = vsel %vm2648_vm6, %v2620_v2, %v6983_v27  ;;  %v494_v62 = vld [vmem:[#allocation2 + $0x180] sm:$0xff]  ;;  %v6994_v2 = vld [vmem:[#allocation175_spill] sm:$0xff] }
 0x41e   : > { %2062 = vrot.lane.b32.xlu0 %v818_v38, %s3972_s11  ;;  %v2660_v20 = vsel %vm2648_vm6, %v2595_v61, %v6977_v45  ;;  %v482_v45 = vld [vmem:[#allocation2 + $0xc0] sm:$0xff] }
 0x41f   : > { %v2333_v7 = vpop.permute.xlu1 %2332  ;;  %2368 = vrot.lane.b32.xlu2 %v907_v1, %s3971_s10  ;;  %v2725_v41 = vsel %vm2713_vm5, %v2660_v20, %v5491_v44  ;;  %v518_v1 = vld [vmem:[#allocation2 + $0x300] sm:$0xff] }
 0x420   : > { %v2077_v60 = vpop.permute.xlu0 %2076 }
 0x421   : > { %v2749_v17 = vsel %vm2713_vm5, %v2684_v36, %v2077_v60  ;;  %v5581_v52 = vpop.permute.xlu2 %2080  ;;  %v844_v36 = vld [vmem:[#allocation2 + $0x365] sm:$0xff] }
 0x422   : > { %v2814_v48 = vsel %vm2778_vm7, %v2749_v17, %v2333_v7  ;;  %v6984_v60 = vld [vmem:[#allocation46_spill] sm:$0xff] }
 0x423   : > { %3809 = vmatmul.msk.f32.gmra.mxu2 %vm2851_vm8, %v2814_v48  ;;  %v2502_v17 = vsel %vm212_vm0, %v518_v1, %v6984_v60  ;;  %v833_v48 = vld [vmem:[#allocation2 + $0x2b5] sm:$0xff] }
 0x424   : > { %v6996_v60 = vld [vmem:[#allocation33_spill] sm:$0xff] }
 0x425   : > { %2344 = vrot.lane.b32.xlu1 %v895_v4, %s3971_s10  ;;  %v6985_v4 = vld [vmem:[#allocation95_spill] sm:$0xff] }
 0x426   : > { %2112 = vrot.lane.b32.xlu0 %v843_v29, %s3972_s11  ;;  %v2567_v25 = vsel %vm2518_vm4, %v2502_v17, %v6985_v4  ;;  %v6986_v29 = vld [vmem:[#allocation135_spill] sm:$0xff]  ;;  %v845_v4 = vld [vmem:[#allocation2 + $0x375] sm:$0xff] }
 0x427   : > { %v2285_v42 = vpop.permute.xlu1 %2284  ;;  %v3065_v63 = vpop.f32.mrf.mxu0  ;;  %2090 = vrot.lane.b32.xlu2 %v832_v5, %s3972_s11  ;;  %v2632_v56 = vsel %vm2583_vm3, %v2567_v25, %v6986_v29  ;;  %v6987_v5 = vld [vmem:[#allocation198_spill] sm:$0xff] }
 0x428   : > { %v2053_v24 = vpop.permute.xlu0 %2052  ;;  %v3066_v30 = vadd.f32 %v5592_v3, %v3065_v63  ;;  %v2790_v12 = vsel %vm2778_vm7, %v2725_v41, %v2285_v42  ;;  %v2697_v22 = vsel %vm2648_vm6, %v2632_v56, %v6987_v5  ;;  %v884_v41 = vld [vmem:[#allocation2 + $0x1e6] sm:$0xff]  ;;  %v6998_v56 = vld [vmem:[#allocation45_spill] sm:$0xff] }
 0x429   : > { %v2737_v44 = vsel %vm2713_vm5, %v2672_v9, %v2053_v24  ;;  %3785 = vmatmul.msk.f32.gmra.mxu0 %vm2851_vm8, %v2790_v12  ;;  %v5622_v55 = vpop.permute.xlu2 %2360  ;;  %v6988_v42 = vld [vmem:[#allocation22_spill] sm:$0xff]  ;;  %v6999_v5 = vld [vmem:[#allocation137_spill] sm:$0xff] }
 0x42a   : > { %3257 = vst.msk [vmem:[%s5613_s12] sm:$0xff] %vm2518_vm4, %v3066_v30  ;;  %v2802_v35 = vsel %vm2778_vm7, %v2737_v44, %v5519_v34  ;;  %v3454_v58 = vmul.f32 %v3066_v30, %v3066_v30  ;;  %v3321_v7 = vsel %vm2518_vm4, %v3066_v30, 0.0  ;;  %v2478_v63 = vsel %vm212_vm0, %v494_v62, %v6988_v42  ;;  %v820_v24 = vld [vmem:[#allocation2 + $0x1e5] sm:$0xff]  ;;  %v6990_v44 = vld [vmem:[#allocation72_spill] sm:$0xff]  ;;  %v7000_v62 = vld [vmem:[#allocation85_spill] sm:$0xff] }
 0x42b   : > { %3797 = vmatmul.msk.f32.gmra.mxu1 %vm2851_vm8, %v2802_v35  ;;  %v6989_v30 = vld [vmem:[#allocation14_spill] sm:$0xff]  ;;  %v2543_v26 = vsel %vm2518_vm4, %v2478_v63, %v6990_v44  ;;  %v7003_v63 = vld [vmem:[#allocation197_spill] sm:$0xff] }
 0x42c   : > { %v2466_v12 = vsel %vm212_vm0, %v482_v45, %v6989_v30  ;;  %v2608_v50 = vsel %vm2583_vm3, %v2543_v26, %v6992_v15  ;;  %v6997_v25 = vld [vmem:[#allocation74_spill] sm:$0xff]  ;;  %v821_v15 = vld [vmem:[#allocation2 + $0x1f5] sm:$0xff] }
 0x42d   : > { %2320 = vrot.lane.b32.xlu1 %v883_v14, %s3971_s10  ;;  %v909_v14 = vld [vmem:[#allocation2 + $0x376] sm:$0xff]  ;;  %v834_v29 = vld [vmem:[#allocation2 + $0x2c5] sm:$0xff] }
 0x42e   : > { %2064 = vrot.lane.b32.xlu0 %v819_v59, %s3972_s11  ;;  %v6991_v59 = vld [vmem:[#allocation62_spill] sm:$0xff] }
 0x42f   : > { %v2103_v34 = vpop.permute.xlu1 %2102  ;;  %2370 = vrot.lane.b32.xlu2 %v908_v23, %s3971_s10  ;;  %v2531_v23 = vsel %vm2518_vm4, %v2466_v12, %v6991_v59 }
 0x430   : > { %v2079_v57 = vpop.permute.xlu0 %2078  ;;  %v3068_v38 = vpop.f32.mrf.mxu0  ;;  %v2762_v61 = vsel %vm2713_vm5, %v2697_v22, %v2103_v34  ;;  %v2596_v31 = vsel %vm2583_vm3, %v2531_v23, %v6993_v33  ;;  %v2673_v34 = vsel %vm2648_vm6, %v2608_v50, %v6994_v2  ;;  %v885_v23 = vld [vmem:[#allocation2 + $0x1f6] sm:$0xff]  ;;  %v910_v33 = vld [vmem:[#allocation2 + $0x386] sm:$0xff] }
 0x431   : > { %v2750_v43 = vsel %vm2713_vm5, %v2685_v37, %v2079_v57  ;;  %v3069_v8 = vadd.f32 %v5592_v3, %v3068_v38  ;;  %v5642_v6 = vpop.permute.xlu2 %2288  ;;  %v6995_v37 = vld [vmem:[#allocation167_spill] sm:$0xff]  ;;  %v2738_v38 = vsel %vm2713_vm5, %v2673_v34, %v5564_v11 }
 0x432   : > { %v2815_v51 = vsel %vm2778_vm7, %v2750_v43, %v5536_v28  ;;  %v3518_v28 = vsel %vm2518_vm4, %v3454_v58, 0.0  ;;  %v2661_v57 = vsel %vm2648_vm6, %v2596_v31, %v6995_v37  ;;  %v507_v58 = vld [vmem:[#allocation2 + $0x250] sm:$0xff]  ;;  %v7004_v31 = vld [vmem:[#allocation13_spill] sm:$0xff] }
 0x433   : > { %3258 = vst.msk [vmem:[%s5613_s12 + $0x8] sm:$0xff] %vm2518_vm4, %v3069_v8  ;;  %v3322_v40 = vsel %vm2518_vm4, %v3069_v8, 0.0  ;;  %v3455_v19 = vmul.f32 %v3069_v8, %v3069_v8  ;;  %3810 = vmatmul.msk.f32.gmra.mxu2 %vm2851_vm8, %v2815_v51  ;;  %v519_v11 = vld [vmem:[#allocation2 + $0x310] sm:$0xff]  ;;  %v2491_v17 = vsel %vm212_vm0, %v507_v58, %v6996_v60 }
 0x434   : > { %v3323_v39 = vadd.f32 %v3322_v40, %v3321_v7 }
 0x435   : > { %v3519_v0 = vsel %vm2518_vm4, %v3455_v19, 0.0  ;;  %2346 = vrot.lane.b32.xlu1 %v896_v16, %s3971_s10 }
 0x436   : > { %v3520_v10 = vadd.f32 %v3519_v0, %v3518_v28  ;;  %2114 = vrot.lane.b32.xlu0 %v844_v36, %s3972_s11  ;;  %v897_v36 = vld [vmem:[#allocation2 + $0x2b6] sm:$0xff]  ;;  %v2556_v28 = vsel %vm2518_vm4, %v2491_v17, %v6997_v25  ;;  %v898_v17 = vld [vmem:[#allocation2 + $0x2c6] sm:$0xff] }
 0x437   : > { %v2031_v21 = vpop.permute.xlu1 %2030  ;;  %2092 = vrot.lane.b32.xlu2 %v833_v48, %s3972_s11  ;;  %v2621_v22 = vsel %vm2583_vm3, %v2556_v28, %v6999_v5 }
 0x438   : > { %v2359_v46 = vpop.permute.xlu0 %2358  ;;  %v3071_v13 = vpop.f32.mrf.mxu0  ;;  %v2726_v43 = vsel %vm2713_vm5, %v2661_v57, %v2031_v21  ;;  %v7006_v57 = vld [vmem:[#allocation117_spill] sm:$0xff] }
 0x439   : > { %v3072_v20 = vadd.f32 %v5592_v3, %v3071_v13  ;;  %v2827_v53 = vsel %vm2778_vm7, %v2762_v61, %v2359_v46  ;;  %v5667_v47 = vpop.permute.xlu2 %2106  ;;  %v7001_v46 = vld [vmem:[#allocation186_spill] sm:$0xff] }
 0x43a   : > { %3822 = vmatmul.msk.f32.vlgmr.msra.gmra.mxu3 %vm2851_vm8, %v2827_v53  ;;  %v2686_v13 = vsel %vm2648_vm6, %v2621_v22, %v7001_v46 }
 0x43b   : > { %3259 = vst.msk [vmem:[%s5613_s12 + $0x10] sm:$0xff] %vm2518_vm4, %v3072_v20  ;;  %v3324_v18 = vsel %vm2518_vm4, %v3072_v20, 0.0  ;;  %v3456_v9 = vmul.f32 %v3072_v20, %v3072_v20  ;;  %v7002_v20 = vld [vmem:[#allocation149_spill] sm:$0xff] }
 0x43c   : > { %v3325_v35 = vadd.f32 %v3324_v18, %v3323_v39 }
 0x43d   : > { %v3521_v49 = vsel %vm2518_vm4, %v3456_v9, 0.0  ;;  %2322 = vrot.lane.b32.xlu1 %v884_v41, %s3971_s10  ;;  %v2751_v41 = vsel %vm2713_vm5, %v2686_v13, %v5581_v52 }
 0x43e   : > { %v3522_v27 = vadd.f32 %v3521_v49, %v3520_v10  ;;  %2066 = vrot.lane.b32.xlu0 %v820_v24, %s3972_s11  ;;  %v2503_v10 = vsel %vm212_vm0, %v519_v11, %v6998_v56 }
 0x43f   : > { %v2311_v1 = vpop.permute.xlu1 %2310  ;;  %2372 = vrot.lane.b32.xlu2 %v909_v14, %s3971_s10  ;;  %v2568_v61 = vsel %vm2518_vm4, %v2503_v10, %v7000_v62 }
 0x440   : > { %v2287_v8 = vpop.permute.xlu0 %2286  ;;  %v3074_v51 = vpop.f32.mrf.mxu0  ;;  %v2803_v16 = vsel %vm2778_vm7, %v2738_v38, %v2311_v1  ;;  %v2633_v53 = vsel %vm2583_vm3, %v2568_v61, %v7002_v20 }
 0x441   : > { %v3075_v7 = vadd.f32 %v5592_v3, %v3074_v51  ;;  %v2791_v40 = vsel %vm2778_vm7, %v2726_v43, %v2287_v8  ;;  %3798 = vmatmul.msk.f32.gmra.mxu1 %vm2851_vm8, %v2803_v16  ;;  %v5700_v19 = vpop.permute.xlu2 %2034  ;;  %v2698_v18 = vsel %vm2648_vm6, %v2633_v53, %v7003_v63  ;;  %v7007_v43 = vld [vmem:[#allocation166_spill] sm:$0xff]  ;;  %v495_v16 = vld [vmem:[#allocation2 + $0x190] sm:$0xff] }
 0x442   : > { %3786 = vmatmul.msk.f32.gmra.mxu0 %vm2851_vm8, %v2791_v40 }
 0x443   : > { %3260 = vst.msk [vmem:[%s5613_s12 + $0x18] sm:$0xff] %vm2518_vm4, %v3075_v7  ;;  %v3326_v39 = vsel %vm2518_vm4, %v3075_v7, 0.0  ;;  %v3457_v48 = vmul.f32 %v3075_v7, %v3075_v7 }
 0x444   : > { %v3327_v0 = vadd.f32 %v3326_v39, %v3325_v35  ;;  %v483_v35 = vld [vmem:[#allocation2 + $0xd0] sm:$0xff]  ;;  %v846_v39 = vld [vmem:[#allocation2 + $0x385] sm:$0xff] }
 0x445   : > { %v3523_v21 = vsel %vm2518_vm4, %v3457_v48, 0.0  ;;  %2348 = vrot.lane.b32.xlu1 %v897_v36, %s3971_s10  ;;  %v2467_v2 = vsel %vm212_vm0, %v483_v35, %v7004_v31  ;;  %v7008_v48 = vld [vmem:[#allocation21_spill] sm:$0xff]  ;;  %v7017_v31 = vld [vmem:[#allocation148_spill] sm:$0xff] }
 0x446   : > { %v3524_v45 = vadd.f32 %v3523_v21, %v3522_v27  ;;  %2116 = vrot.lane.b32.xlu0 %v845_v4, %s3972_s11  ;;  %v2479_v4 = vsel %vm212_vm0, %v495_v16, %v7008_v48  ;;  %v7011_v21 = vld [vmem:[#allocation174_spill] sm:$0xff] }
 0x447   : > { %v2337_v42 = vpop.permute.xlu1 %2336  ;;  %2094 = vrot.lane.b32.xlu2 %v834_v29, %s3972_s11  ;;  %v7009_v29 = vld [vmem:[#allocation64_spill] sm:$0xff]  ;;  %v496_v48 = vld [vmem:[#allocation2 + $0x1a0] sm:$0xff] }
 0x448   : > { %v3113_v9 = vpop.f32.mrf.mxu1  ;;  %v2105_v24 = vpop.permute.xlu0 %2104  ;;  %v2816_v30 = vsel %vm2778_vm7, %v2751_v41, %v2337_v42  ;;  %v2544_v56 = vsel %vm2518_vm4, %v2479_v4, %v7009_v29  ;;  %v508_v41 = vld [vmem:[#allocation2 + $0x260] sm:$0xff] }
 0x449   : > { %v5730_v12 = vadd.f32 %v5592_v3, %v3113_v9  ;;  %v2763_v44 = vsel %vm2713_vm5, %v2698_v18, %v2105_v24  ;;  %v3077_v26 = vpop.f32.mrf.mxu0  ;;  %3811 = vmatmul.msk.f32.gmra.mxu2 %vm2851_vm8, %v2816_v30  ;;  %v5734_v52 = vpop.permute.xlu2 %2314  ;;  %v520_v42 = vld [vmem:[#allocation2 + $0x320] sm:$0xff]  ;;  %v847_v9 = vld [vmem:[#allocation2 + $0x395] sm:$0xff]  ;;  %v7012_v30 = vld [vmem:[#allocation23_spill] sm:$0xff] }
 0x44a   : > { %v3078_v14 = vadd.f32 %v5592_v3, %v3077_v26  ;;  %v2828_v59 = vsel %vm2778_vm7, %v2763_v44, %v5622_v55  ;;  %v7005_v55 = vld [vmem:[#allocation58_spill] sm:$0xff]  ;;  %v835_v24 = vld [vmem:[#allocation2 + $0x2d5] sm:$0xff]  ;;  %v2492_v44 = vsel %vm212_vm0, %v508_v41, %v7012_v30  ;;  %v7013_v26 = vld [vmem:[#allocation35_spill] sm:$0xff] }
 0x44b   : > { %3273 = vst.msk [vmem:[%s5613_s12 + $0x80] sm:$0xff] %vm2518_vm4, %v5730_v12  ;;  %3823 = vmatmul.msk.f32.gmra.mxu3 %vm2851_vm8, %v2828_v59  ;;  %v2532_v27 = vsel %vm2518_vm4, %v2467_v2, %v7005_v55  ;;  %v2504_v35 = vsel %vm212_vm0, %v520_v42, %v7013_v26  ;;  %v7014_v59 = vld [vmem:[#allocation87_spill] sm:$0xff]  ;;  %v7027_v26 = vld [vmem:[#allocation168_spill] sm:$0xff] }
 0x44c   : > { %3261 = vst.msk [vmem:[%s5613_s12 + $0x20] sm:$0xff] %vm2518_vm4, %v3078_v14  ;;  %v3328_v50 = vsel %vm2518_vm4, %v3078_v14, 0.0  ;;  %v3458_v49 = vmul.f32 %v3078_v14, %v3078_v14  ;;  %v2597_v38 = vsel %vm2583_vm3, %v2532_v27, %v7006_v57  ;;  %v848_v14 = vld [vmem:[#allocation2 + $0x3a5] sm:$0xff]  ;;  %v7019_v27 = vld [vmem:[#allocation188_spill] sm:$0xff] }
 0x44d   : > { %v3329_v34 = vadd.f32 %v3328_v50, %v3327_v0  ;;  %2324 = vrot.lane.b32.xlu1 %v885_v23, %s3971_s10  ;;  %v2662_v8 = vsel %vm2648_vm6, %v2597_v38, %v7007_v43  ;;  %v899_v0 = vld [vmem:[#allocation2 + $0x2d6] sm:$0xff]  ;;  %v2557_v23 = vsel %vm2518_vm4, %v2492_v44, %v7014_v59 }
 0x44e   : > { %v3525_v37 = vsel %vm2518_vm4, %v3458_v49, 0.0  ;;  %2068 = vrot.lane.b32.xlu0 %v821_v15, %s3972_s11  ;;  %v7015_v15 = vld [vmem:[#allocation99_spill] sm:$0xff]  ;;  %v7016_v49 = vld [vmem:[#allocation136_spill] sm:$0xff] }
 0x44f   : > { %v3526_v1 = vadd.f32 %v3525_v37, %v3524_v45  ;;  %v2057_v58 = vpop.permute.xlu1 %2056  ;;  %2374 = vrot.lane.b32.xlu2 %v910_v33, %s3971_s10  ;;  %v2569_v50 = vsel %vm2518_vm4, %v2504_v35, %v7015_v15  ;;  %v2622_v33 = vsel %vm2583_vm3, %v2557_v23, %v7016_v49  ;;  %v912_v49 = vld [vmem:[#allocation2 + $0x3a6] sm:$0xff] }
 0x450   : > { %v2033_v51 = vpop.permute.xlu0 %2032  ;;  %v2634_v2 = vsel %vm2583_vm3, %v2569_v50, %v7017_v31 }
 0x451   : > { %v2727_v7 = vsel %vm2713_vm5, %v2662_v8, %v2033_v51  ;;  %v3080_v40 = vpop.f32.mrf.mxu0  ;;  %v5759_v11 = vpop.permute.xlu2 %2340  ;;  %v2699_v37 = vsel %vm2648_vm6, %v2634_v2, %v7019_v27 }
 0x452   : > { %v3081_v36 = vadd.f32 %v5592_v3, %v3080_v40  ;;  %v2792_v60 = vsel %vm2778_vm7, %v2727_v7, %v5642_v6  ;;  %v7010_v6 = vld [vmem:[#allocation126_spill] sm:$0xff] }
 0x453   : > { %3787 = vmatmul.msk.f32.gmra.mxu0 %vm2851_vm8, %v2792_v60  ;;  %v2609_v5 = vsel %vm2583_vm3, %v2544_v56, %v7010_v6  ;;  %v484_v7 = vld [vmem:[#allocation2 + $0xe0] sm:$0xff]  ;;  %v837_v56 = vld [vmem:[#allocation2 + $0x2f5] sm:$0xff] }
 0x454   : > { %3262 = vst.msk [vmem:[%s5613_s12 + $0x28] sm:$0xff] %vm2518_vm4, %v3081_v36  ;;  %v3330_v25 = vsel %vm2518_vm4, %v3081_v36, 0.0  ;;  %v3459_v28 = vmul.f32 %v3081_v36, %v3081_v36  ;;  %v2674_v62 = vsel %vm2648_vm6, %v2609_v5, %v7011_v21  ;;  %v7021_v6 = vld [vmem:[#allocation66_spill] sm:$0xff]  ;;  %v7022_v21 = vld [vmem:[#allocation15_spill] sm:$0xff] }
 0x455   : > { %v3331_v10 = vadd.f32 %v3330_v25, %v3329_v34  ;;  %2350 = vrot.lane.b32.xlu1 %v898_v17, %s3971_s10  ;;  %v2739_v45 = vsel %vm2713_vm5, %v2674_v62, %v2057_v58  ;;  %v7018_v34 = vld [vmem:[#allocation176_spill] sm:$0xff]  ;;  %v2480_v62 = vsel %vm212_vm0, %v496_v48, %v7022_v21 }
 0x456   : > { %v3527_v22 = vsel %vm2518_vm4, %v3459_v28, 0.0  ;;  %2118 = vrot.lane.b32.xlu0 %v846_v39, %s3972_s11  ;;  %v2687_v55 = vsel %vm2648_vm6, %v2622_v33, %v7018_v34  ;;  %v836_v39 = vld [vmem:[#allocation2 + $0x2e5] sm:$0xff]  ;;  %v911_v25 = vld [vmem:[#allocation2 + $0x396] sm:$0xff] }
 0x457   : > { %v3528_v61 = vadd.f32 %v3527_v22, %v3526_v1  ;;  %v3116_v46 = vpop.f32.mrf.mxu1  ;;  %v2083_v13 = vpop.permute.xlu1 %2082  ;;  %2352 = vrot.lane.b32.xlu2 %v899_v0, %s3971_s10  ;;  %v2764_v1 = vsel %vm2713_vm5, %v2699_v37, %v5667_v47  ;;  %v7020_v28 = vld [vmem:[#allocation8_spill] sm:$0xff]  ;;  %v900_v34 = vld [vmem:[#allocation2 + $0x2e6] sm:$0xff] }
 0x458   : > { %v5782_v20 = vadd.f32 %v5592_v3, %v3116_v46  ;;  %v2313_v53 = vpop.permute.xlu0 %2312  ;;  %v2752_v58 = vsel %vm2713_vm5, %v2687_v55, %v2083_v13  ;;  %v2468_v0 = vsel %vm212_vm0, %v484_v7, %v7020_v28  ;;  %v7024_v13 = vld [vmem:[#allocation76_spill] sm:$0xff]  ;;  %v7031_v7 = vld [vmem:[#allocation190_spill] sm:$0xff] }
 0x459   : > { %v2804_v63 = vsel %vm2778_vm7, %v2739_v45, %v2313_v53  ;;  %v5785_v18 = vpop.permute.xlu2 %2060  ;;  %v2533_v5 = vsel %vm2518_vm4, %v2468_v0, %v7021_v6  ;;  %v2545_v45 = vsel %vm2518_vm4, %v2480_v62, %v7024_v13  ;;  %v7025_v53 = vld [vmem:[#allocation161_spill] sm:$0xff]  ;;  %v509_v33 = vld [vmem:[#allocation2 + $0x270] sm:$0xff] }
 0x45a   : > { %3274 = vst.msk [vmem:[%s5613_s12 + $0x88] sm:$0xff] %vm2518_vm4, %v5782_v20  ;;  %3799 = vmatmul.msk.f32.gmra.mxu1 %vm2851_vm8, %v2804_v63 }
 0x45d   : > { %2120 = vrot.lane.b32.xlu1 %v847_v9, %s3972_s11 }
 0x45e   : > { %2096 = vrot.lane.b32.xlu0 %v835_v24, %s3972_s11 }
 0x45f   : > { %v3083_v57 = vpop.f32.mrf.mxu0  ;;  %v3119_v38 = vpop.f32.mrf.mxu1  ;;  %2122 = vrot.lane.b32.xlu2 %v848_v14, %s3972_s11 }
 0x460   : > { %v3084_v43 = vadd.f32 %v5592_v3, %v3083_v57  ;;  %v5815_v8 = vadd.f32 %v5592_v3, %v3119_v38  ;;  %v2363_v51 = vpop.permute.xlu1 %2362  ;;  %v2339_v16 = vpop.permute.xlu0 %2338  ;;  %v7028_v57 = vld [vmem:[#allocation37_spill] sm:$0xff] }
 0x461   : > { %v2817_v40 = vsel %vm2778_vm7, %v2752_v58, %v2339_v16  ;;  %v2829_v36 = vsel %vm2778_vm7, %v2764_v1, %v2363_v51  ;;  %v5819_v60 = vpop.permute.xlu2 %2086  ;;  %v2493_v38 = vsel %vm212_vm0, %v509_v33, %v7028_v57  ;;  %v913_v1 = vld [vmem:[#allocation2 + $0x3b6] sm:$0xff]  ;;  %v7029_v58 = vld [vmem:[#allocation86_spill] sm:$0xff] }
 0x462   : > { %3263 = vst.msk [vmem:[%s5613_s12 + $0x30] sm:$0xff] %vm2518_vm4, %v3084_v43  ;;  %v3332_v47 = vsel %vm2518_vm4, %v3084_v43, 0.0  ;;  %v3460_v17 = vmul.f32 %v3084_v43, %v3084_v43  ;;  %3812 = vmatmul.msk.f32.gmra.mxu2 %vm2851_vm8, %v2817_v40  ;;  %3824 = vmatmul.msk.f32.gmra.mxu3 %vm2851_vm8, %v2829_v36  ;;  %v2558_v43 = vsel %vm2518_vm4, %v2493_v38, %v7029_v58  ;;  %v7040_v57 = vld [vmem:[#allocation118_spill] sm:$0xff] }
 0x463   : > { %v3333_v4 = vadd.f32 %v3332_v47, %v3331_v10  ;;  %3275 = vst.msk [vmem:[%s5613_s12 + $0x90] sm:$0xff] %vm2518_vm4, %v5815_v8  ;;  %v7023_v10 = vld [vmem:[#allocation116_spill] sm:$0xff] }
 0x464   : > { %v3529_v29 = vsel %vm2518_vm4, %v3460_v17, 0.0  ;;  %v2598_v46 = vsel %vm2583_vm3, %v2533_v5, %v7023_v10  ;;  %v521_v47 = vld [vmem:[#allocation2 + $0x330] sm:$0xff]  ;;  %v7035_v10 = vld [vmem:[#allocation201_spill] sm:$0xff] }
 0x465   : > { %v3530_v22 = vadd.f32 %v3529_v29, %v3528_v61  ;;  %2098 = vrot.lane.b32.xlu1 %v836_v39, %s3972_s11  ;;  %v2663_v41 = vsel %vm2648_vm6, %v2598_v46, %v7025_v53  ;;  %v7026_v61 = vld [vmem:[#allocation125_spill] sm:$0xff]  ;;  %v7033_v29 = vld [vmem:[#allocation98_spill] sm:$0xff] }
 0x466   : > { %2376 = vrot.lane.b32.xlu0 %v911_v25, %s3971_s10  ;;  %v2610_v63 = vsel %vm2583_vm3, %v2545_v45, %v7026_v61  ;;  %v2728_v9 = vsel %vm2713_vm5, %v2663_v41, %v5700_v19  ;;  %v901_v39 = vld [vmem:[#allocation2 + $0x2f6] sm:$0xff]  ;;  %v914_v53 = vld [vmem:[#allocation2 + $0x3c6] sm:$0xff] }
 0x467   : > { %v3086_v42 = vpop.f32.mrf.mxu0  ;;  %2100 = vrot.lane.b32.xlu2 %v837_v56, %s3972_s11  ;;  %v2675_v35 = vsel %vm2648_vm6, %v2610_v63, %v7027_v26  ;;  %v7032_v25 = vld [vmem:[#allocation49_spill] sm:$0xff]  ;;  %v497_v41 = vld [vmem:[#allocation2 + $0x1b0] sm:$0xff] }
 0x468   : > { %v3087_v24 = vadd.f32 %v5592_v3, %v3086_v42  ;;  %v2291_v30 = vpop.permute.xlu1 %2290  ;;  %v3122_v44 = vpop.f32.mrf.mxu1  ;;  %v2505_v28 = vsel %vm212_vm0, %v521_v47, %v7032_v25  ;;  %v851_v25 = vld [vmem:[#allocation2 + $0x3d5] sm:$0xff] }
 0x469   : > { %v5853_v14 = vadd.f32 %v5592_v3, %v3122_v44  ;;  %v2059_v59 = vpop.permute.xlu0 %2058  ;;  %v2793_v23 = vsel %vm2778_vm7, %v2728_v9, %v2291_v30  ;;  %v5866_v55 = vpop.permute.xlu2 %2366  ;;  %v2570_v56 = vsel %vm2518_vm4, %v2505_v28, %v7033_v29  ;;  %v522_v28 = vld [vmem:[#allocation2 + $0x340] sm:$0xff]  ;;  %v787_v29 = vld [vmem:[#allocation2 + $0x3d4] sm:$0xff] }
 0x46a   : > { %3264 = vst.msk [vmem:[%s5613_s12 + $0x38] sm:$0xff] %vm2518_vm4, %v3087_v24  ;;  %v3334_v15 = vsel %vm2518_vm4, %v3087_v24, 0.0  ;;  %v3461_v50 = vmul.f32 %v3087_v24, %v3087_v24  ;;  %v2740_v19 = vsel %vm2713_vm5, %v2675_v35, %v2059_v59  ;;  %3788 = vmatmul.msk.f32.gmra.mxu0 %vm2851_vm8, %v2793_v23  ;;  %v485_v24 = vld [vmem:[#allocation2 + $0xf0] sm:$0xff]  ;;  %v850_v35 = vld [vmem:[#allocation2 + $0x3c5] sm:$0xff] }
 0x46b   : > { %v3335_v31 = vadd.f32 %v3334_v15, %v3333_v4  ;;  %3276 = vst.msk [vmem:[%s5613_s12 + $0x98] sm:$0xff] %vm2518_vm4, %v5853_v14  ;;  %v2805_v2 = vsel %vm2778_vm7, %v2740_v19, %v5734_v52  ;;  %v7030_v52 = vld [vmem:[#allocation127_spill] sm:$0xff]  ;;  %v849_v4 = vld [vmem:[#allocation2 + $0x3b5] sm:$0xff]  ;;  %v786_v23 = vld [vmem:[#allocation2 + $0x3c4] sm:$0xff] }
 0x46c   : > { %v3531_v27 = vsel %vm2518_vm4, %v3461_v50, 0.0  ;;  %3800 = vmatmul.msk.f32.gmra.mxu1 %vm2851_vm8, %v2805_v2  ;;  %v2623_v51 = vsel %vm2583_vm3, %v2558_v43, %v7030_v52  ;;  %v7036_v15 = vld [vmem:[#allocation25_spill] sm:$0xff]  ;;  %v7042_v43 = vld [vmem:[#allocation178_spill] sm:$0xff] }
 0x46d   : > { %v3532_v37 = vadd.f32 %v3531_v27, %v3530_v22  ;;  %2378 = vrot.lane.b32.xlu1 %v912_v49, %s3971_s10  ;;  %v2688_v40 = vsel %vm2648_vm6, %v2623_v51, %v7031_v7  ;;  %v7034_v22 = vld [vmem:[#allocation138_spill] sm:$0xff]  ;;  %v2481_v50 = vsel %vm212_vm0, %v497_v41, %v7036_v15  ;;  %v7037_v49 = vld [vmem:[#allocation16_spill] sm:$0xff] }
 0x46e   : > { %2354 = vrot.lane.b32.xlu0 %v900_v34, %s3971_s10  ;;  %v2469_v33 = vsel %vm212_vm0, %v485_v24, %v7037_v49  ;;  %v7039_v34 = vld [vmem:[#allocation65_spill] sm:$0xff] }
 0x46f   : > { %2380 = vrot.lane.b32.xlu2 %v913_v1, %s3971_s10  ;;  %v2534_v27 = vsel %vm2518_vm4, %v2469_v33, %v7039_v34  ;;  %v7041_v1 = vld [vmem:[#allocation110_spill] sm:$0xff] }
 0x470   : > { %v2109_v16 = vpop.permute.xlu1 %2108  ;;  %v2599_v58 = vsel %vm2583_vm3, %v2534_v27, %v7041_v1 }
 0x471   : > { %v2085_v36 = vpop.permute.xlu0 %2084  ;;  %v5888_v0 = vpop.permute.xlu2 %2088 }
 0x472   : > { %v2753_v17 = vsel %vm2713_vm5, %v2688_v40, %v2085_v36 }
 0x473   : > { %v2818_v48 = vsel %vm2778_vm7, %v2753_v17, %v5759_v11  ;;  %v2635_v11 = vsel %vm2583_vm3, %v2570_v56, %v7034_v22  ;;  %v7044_v56 = vld [vmem:[#allocation36_spill] sm:$0xff]  ;;  %v7046_v22 = vld [vmem:[#allocation77_spill] sm:$0xff] }
 0x474   : > { %3813 = vmatmul.msk.f32.gmra.mxu2 %vm2851_vm8, %v2818_v48  ;;  %v2700_v46 = vsel %vm2648_vm6, %v2635_v11, %v7035_v10  ;;  %v510_v48 = vld [vmem:[#allocation2 + $0x280] sm:$0xff] }
 0x475   : > { %2356 = vrot.lane.b32.xlu1 %v901_v39, %s3971_s10  ;;  %v2765_v42 = vsel %vm2713_vm5, %v2700_v46, %v2109_v16  ;;  %v7043_v16 = vld [vmem:[#allocation169_spill] sm:$0xff]  ;;  %v7047_v46 = vld [vmem:[#allocation88_spill] sm:$0xff] }
 0x476   : > { %2124 = vrot.lane.b32.xlu0 %v849_v4, %s3972_s11  ;;  %v3161_v6 = vpop.f32.mrf.mxu2  ;;  %v3089_v5 = vpop.f32.mrf.mxu0  ;;  %v2664_v7 = vsel %vm2648_vm6, %v2599_v58, %v7043_v16 }
 0x477   : > { %v5896_v21 = vadd.f32 %v5592_v3, %v3161_v6  ;;  %v3090_v62 = vadd.f32 %v5592_v3, %v3089_v5  ;;  %2382 = vrot.lane.b32.xlu2 %v914_v53, %s3971_s10  ;;  %v7045_v6 = vld [vmem:[#allocation48_spill] sm:$0xff] }
 0x478   : > { %v2037_v13 = vpop.permute.xlu1 %2036  ;;  %v3125_v45 = vpop.f32.mrf.mxu1  ;;  %v2506_v5 = vsel %vm212_vm0, %v522_v28, %v7045_v6  ;;  %v853_v28 = vld [vmem:[#allocation2 + $0x3f5] sm:$0xff] }
 0x479   : > { %3289 = vst.msk [vmem:[%s5613_s12 + $0x100] sm:$0xff] %vm2518_vm4, %v5896_v21  ;;  %v3336_v61 = vsel %vm2518_vm4, %v3090_v62, 0.0  ;;  %v3462_v63 = vmul.f32 %v3090_v62, %v3090_v62  ;;  %v2365_v9 = vpop.permute.xlu0 %2364  ;;  %v5910_v44 = vadd.f32 %v5592_v3, %v3125_v45  ;;  %v5934_v51 = vpop.permute.xlu2 %2368  ;;  %v2729_v47 = vsel %vm2713_vm5, %v2664_v7, %v2037_v13  ;;  %v7048_v45 = vld [vmem:[#allocation140_spill] sm:$0xff] }
 0x47a   : > { %3265 = vst.msk [vmem:[%s5613_s12 + $0x40] sm:$0xff] %vm2518_vm4, %v3090_v62  ;;  %v3337_v30 = vadd.f32 %v3336_v61, %v3335_v31  ;;  %v2830_v26 = vsel %vm2778_vm7, %v2765_v42, %v2365_v9  ;;  %v7038_v31 = vld [vmem:[#allocation75_spill] sm:$0xff]  ;;  %v2571_v13 = vsel %vm2518_vm4, %v2506_v5, %v7047_v46  ;;  %v7049_v61 = vld [vmem:[#allocation152_spill] sm:$0xff]  ;;  %v7050_v9 = vld [vmem:[#allocation189_spill] sm:$0xff] }
 0x47b   : > { %v3533_v59 = vsel %vm2518_vm4, %v3462_v63, 0.0  ;;  %3825 = vmatmul.msk.f32.gmra.mxu3 %vm2851_vm8, %v2830_v26  ;;  %3277 = vst.msk [vmem:[%s5613_s12 + $0xa0] sm:$0xff] %vm2518_vm4, %v5910_v44  ;;  %v2546_v2 = vsel %vm2518_vm4, %v2481_v50, %v7038_v31  ;;  %v2636_v63 = vsel %vm2583_vm3, %v2571_v13, %v7049_v61  ;;  %v917_v7 = vld [vmem:[#allocation2 + $0x3f6] sm:$0xff]  ;;  %v7056_v5 = vld [vmem:[#allocation26_spill] sm:$0xff]  ;;  %v7060_v61 = vld [vmem:[#allocation139_spill] sm:$0xff] }
 0x47c   : > { %v3534_v19 = vadd.f32 %v3533_v59, %v3532_v37  ;;  %v2611_v38 = vsel %vm2583_vm3, %v2546_v2, %v7040_v57  ;;  %v915_v37 = vld [vmem:[#allocation2 + $0x3d6] sm:$0xff]  ;;  %v916_v59 = vld [vmem:[#allocation2 + $0x3e6] sm:$0xff] }
 0x47d   : > { %2126 = vrot.lane.b32.xlu1 %v850_v35, %s3972_s11  ;;  %v2676_v52 = vsel %vm2648_vm6, %v2611_v38, %v7042_v43  ;;  %v852_v38 = vld [vmem:[#allocation2 + $0x3e5] sm:$0xff]  ;;  %v789_v6 = vld [vmem:[#allocation2 + $0x3f4] sm:$0xff] }
 0x47e   : > { %1870 = vrot.lane.b32.xlu0 %v786_v23, %s3970_s9  ;;  %v2741_v40 = vsel %vm2713_vm5, %v2676_v52, %v5785_v18  ;;  %v2494_v18 = vsel %vm212_vm0, %v510_v48, %v7044_v56  ;;  %v7051_v23 = vld [vmem:[#allocation200_spill] sm:$0xff]  ;;  %v788_v43 = vld [vmem:[#allocation2 + $0x3e4] sm:$0xff] }
 0x47f   : > { %2384 = vrot.lane.b32.xlu2 %v915_v37, %s3971_s10  ;;  %v2559_v11 = vsel %vm2518_vm4, %v2494_v18, %v7046_v22  ;;  %v2701_v15 = vsel %vm2648_vm6, %v2636_v63, %v7051_v23  ;;  %v498_v37 = vld [vmem:[#allocation2 + $0x1c0] sm:$0xff] }
 0x480   : > { %v2317_v36 = vpop.permute.xlu1 %2316  ;;  %v2624_v53 = vsel %vm2583_vm3, %v2559_v11, %v7048_v45  ;;  %v7057_v11 = vld [vmem:[#allocation38_spill] sm:$0xff] }
 0x481   : > { %v2293_v17 = vpop.permute.xlu0 %2292  ;;  %v2806_v39 = vsel %vm2778_vm7, %v2741_v40, %v2317_v36  ;;  %v2689_v24 = vsel %vm2648_vm6, %v2624_v53, %v7050_v9  ;;  %v5974_v31 = vpop.permute.xlu2 %2090  ;;  %v7053_v40 = vld [vmem:[#allocation67_spill] sm:$0xff]  ;;  %v7059_v53 = vld [vmem:[#allocation101_spill] sm:$0xff] }
 0x482   : > { %v2794_v4 = vsel %vm2778_vm7, %v2729_v47, %v2293_v17  ;;  %3801 = vmatmul.msk.f32.gmra.mxu1 %vm2851_vm8, %v2806_v39  ;;  %v2754_v50 = vsel %vm2713_vm5, %v2689_v24, %v5819_v60  ;;  %v7054_v47 = vld [vmem:[#allocation129_spill] sm:$0xff] }
 0x483   : > { %3789 = vmatmul.msk.f32.gmra.mxu0 %vm2851_vm8, %v2794_v4  ;;  %v7055_v17 = vld [vmem:[#allocation177_spill] sm:$0xff]  ;;  %v511_v4 = vld [vmem:[#allocation2 + $0x290] sm:$0xff] }
 0x484   : > { %v2495_v22 = vsel %vm212_vm0, %v511_v4, %v7056_v5  ;;  %v512_v4 = vld [vmem:[#allocation2 + $0x2a0] sm:$0xff]  ;;  %v7069_v5 = vld [vmem:[#allocation51_spill] sm:$0xff] }
 0x485   : > { %2128 = vrot.lane.b32.xlu1 %v851_v25, %s3972_s11 }
 0x486   : > { %1872 = vrot.lane.b32.xlu0 %v787_v29, %s3970_s9  ;;  %v3164_v62 = vpop.f32.mrf.mxu2  ;;  %v3092_v10 = vpop.f32.mrf.mxu0  ;;  %v523_v29 = vld [vmem:[#allocation2 + $0x350] sm:$0xff] }
 0x487   : > { %v5959_v41 = vadd.f32 %v5592_v3, %v3164_v62  ;;  %v3093_v42 = vadd.f32 %v5592_v3, %v3092_v10  ;;  %2386 = vrot.lane.b32.xlu2 %v916_v59, %s3971_s10  ;;  %v2507_v62 = vsel %vm212_vm0, %v523_v29, %v7057_v11  ;;  %v7058_v10 = vld [vmem:[#allocation90_spill] sm:$0xff]  ;;  %v7062_v59 = vld [vmem:[#allocation179_spill] sm:$0xff]  ;;  %v7070_v11 = vld [vmem:[#allocation89_spill] sm:$0xff] }
 0x488   : > { %v2343_v26 = vpop.permute.xlu1 %2342  ;;  %v3128_v35 = vpop.f32.mrf.mxu1  ;;  %v2560_v46 = vsel %vm2518_vm4, %v2495_v22, %v7058_v10 }
 0x489   : > { %3290 = vst.msk [vmem:[%s5613_s12 + $0x108] sm:$0xff] %vm2518_vm4, %v5959_v41  ;;  %v3338_v49 = vsel %vm2518_vm4, %v3093_v42, 0.0  ;;  %v3463_v33 = vmul.f32 %v3093_v42, %v3093_v42  ;;  %v2111_v2 = vpop.permute.xlu0 %2110  ;;  %v5980_v27 = vadd.f32 %v5592_v3, %v3128_v35  ;;  %v2819_v57 = vsel %vm2778_vm7, %v2754_v50, %v2343_v26  ;;  %v6004_v56 = vpop.permute.xlu2 %2370  ;;  %v7061_v26 = vld [vmem:[#allocation151_spill] sm:$0xff] }
 0x48a   : > { %3266 = vst.msk [vmem:[%s5613_s12 + $0x48] sm:$0xff] %vm2518_vm4, %v3093_v42  ;;  %v3339_v34 = vadd.f32 %v3338_v49, %v3337_v30  ;;  %v2766_v60 = vsel %vm2713_vm5, %v2701_v15, %v2111_v2  ;;  %3814 = vmatmul.msk.f32.gmra.mxu2 %vm2851_vm8, %v2819_v57  ;;  %v7052_v30 = vld [vmem:[#allocation24_spill] sm:$0xff]  ;;  %v2572_v42 = vsel %vm2518_vm4, %v2507_v62, %v7059_v53  ;;  %v7063_v49 = vld [vmem:[#allocation191_spill] sm:$0xff]  ;;  %v7072_v53 = vld [vmem:[#allocation130_spill] sm:$0xff] }
 0x48b   : > { %v3535_v1 = vsel %vm2518_vm4, %v3463_v33, 0.0  ;;  %v2831_v58 = vsel %vm2778_vm7, %v2766_v60, %v5866_v55  ;;  %3278 = vst.msk [vmem:[%s5613_s12 + $0xa8] sm:$0xff] %vm2518_vm4, %v5980_v27  ;;  %v2482_v16 = vsel %vm212_vm0, %v498_v37, %v7052_v30  ;;  %v2625_v63 = vsel %vm2583_vm3, %v2560_v46, %v7060_v61  ;;  %v499_v30 = vld [vmem:[#allocation2 + $0x1d0] sm:$0xff] }
 0x48c   : > { %v3536_v52 = vadd.f32 %v3535_v1, %v3534_v19  ;;  %3826 = vmatmul.msk.f32.gmra.mxu3 %vm2851_vm8, %v2831_v58  ;;  %v2547_v36 = vsel %vm2518_vm4, %v2482_v16, %v7053_v40  ;;  %v2637_v35 = vsel %vm2583_vm3, %v2572_v42, %v7061_v26  ;;  %v2690_v23 = vsel %vm2648_vm6, %v2625_v63, %v7062_v59  ;;  %v7064_v40 = vld [vmem:[#allocation17_spill] sm:$0xff] }
 0x48d   : > { %2130 = vrot.lane.b32.xlu1 %v852_v38, %s3972_s11  ;;  %v2612_v55 = vsel %vm2583_vm3, %v2547_v36, %v7054_v47  ;;  %v2702_v33 = vsel %vm2648_vm6, %v2637_v35, %v7063_v49  ;;  %v2755_v2 = vsel %vm2713_vm5, %v2690_v23, %v5888_v0  ;;  %v2483_v36 = vsel %vm212_vm0, %v499_v30, %v7064_v40  ;;  %v7065_v47 = vld [vmem:[#allocation79_spill] sm:$0xff]  ;;  %v7073_v26 = vld [vmem:[#allocation141_spill] sm:$0xff] }
 0x48e   : > { %1874 = vrot.lane.b32.xlu0 %v788_v43, %s3970_s9  ;;  %v2677_v39 = vsel %vm2648_vm6, %v2612_v55, %v7055_v17  ;;  %v2548_v55 = vsel %vm2518_vm4, %v2483_v36, %v7065_v47  ;;  %v7074_v59 = vld [vmem:[#allocation193_spill] sm:$0xff]  ;;  %v7076_v36 = vld [vmem:[#allocation78_spill] sm:$0xff] }
 0x48f   : > { %2388 = vrot.lane.b32.xlu2 %v917_v7, %s3971_s10  ;;  %v500_v30 = vld [vmem:[#allocation2 + $0x1e0] sm:$0xff] }
 0x490   : > { %v2319_v19 = vpop.permute.xlu1 %2318 }
 0x491   : > { %v2063_v48 = vpop.permute.xlu0 %2062 }
 0x492   : > { %v2742_v25 = vsel %vm2713_vm5, %v2677_v39, %v2063_v48  ;;  %v7067_v48 = vld [vmem:[#allocation170_spill] sm:$0xff] }
 0x493   : > { %v2807_v18 = vsel %vm2778_vm7, %v2742_v25, %v2319_v19  ;;  %v7066_v19 = vld [vmem:[#allocation128_spill] sm:$0xff] }
 0x494   : > { %3802 = vmatmul.msk.f32.gmra.mxu1 %vm2851_vm8, %v2807_v18  ;;  %v2613_v17 = vsel %vm2583_vm3, %v2548_v55, %v7066_v19  ;;  %v7068_v18 = vld [vmem:[#allocation40_spill] sm:$0xff]  ;;  %v7077_v55 = vld [vmem:[#allocation119_spill] sm:$0xff] }
 0x495   : > { %2132 = vrot.lane.b32.xlu1 %v853_v28, %s3972_s11  ;;  %v524_v28 = vld [vmem:[#allocation2 + $0x360] sm:$0xff]  ;;  %s3839_s11 = sshll.u32 %s4019_s19, 1 }
 0x496   : > { %1876 = vrot.lane.b32.xlu0 %v789_v6, %s3970_s9  ;;  %v3167_v13 = vpop.f32.mrf.mxu2  ;;  %v3095_v45 = vpop.f32.mrf.mxu0  ;;  %v2496_v6 = vsel %vm212_vm0, %v512_v4, %v7068_v18  ;;  %v2508_v22 = vsel %vm212_vm0, %v524_v28, %v7069_v5  ;;  %v525_v4 = vld [vmem:[#allocation2 + $0x370] sm:$0xff]  ;;  %v7081_v5 = vld [vmem:[#allocation50_spill] sm:$0xff]  ;;  %s197_s9 = sand.u32 1, %s3956_s16   ;;  %s3675_s20 = scalar_lea.hbm %s6735_s4, %s3839_s11 }
 0x497   : > { %v6021_v9 = vadd.f32 %v5592_v3, %v3167_v13  ;;  %v3096_v24 = vadd.f32 %v5592_v3, %v3095_v45  ;;  %v2561_v62 = vsel %vm2518_vm4, %v2496_v6, %v7070_v11  ;;  %v7071_v13 = vld [vmem:[#allocation100_spill] sm:$0xff]  ;;  %v7079_v28 = vld [vmem:[#allocation39_spill] sm:$0xff]  ;;  %s3768_s10 = sshll.u32 %s197_s9, 1  ;;  %s3679_s29 = sshll.u32 %s3675_s20, 4  ;;  %s3680_s29 = int_to_ptr.hbm [resolvable:$true] %s3679_s29 }
 0x498   : > { %v2345_v15 = vpop.permute.xlu1 %2344  ;;  %v3131_v50 = vpop.f32.mrf.mxu1  ;;  %v2573_v45 = vsel %vm2518_vm4, %v2508_v22, %v7071_v13  ;;  %v2626_v42 = vsel %vm2583_vm3, %v2561_v62, %v7072_v53  ;;  %v7080_v18 = vld [vmem:[#allocation80_spill] sm:$0xff]  ;;  %v2509_v22 = vsel %vm212_vm0, %v525_v4, %v7081_v5  ;;  %v7082_v11 = vld [vmem:[#allocation143_spill] sm:$0xff]  ;;  %s199_s22 = scalar_lea.vmem [#allocation3], %s3768_s10  ;;  %s3661_s19 = scalar_lea.sflag [#allocation4], %s197_s9 }
 0x499   : > { %3291 = vst.msk [vmem:[%s5613_s12 + $0x110] sm:$0xff] %vm2518_vm4, %v6021_v9  ;;  %v3340_v60 = vsel %vm2518_vm4, %v3096_v24, 0.0  ;;  %v3464_v57 = vmul.f32 %v3096_v24, %v3096_v24  ;;  %v2113_v38 = vpop.permute.xlu0 %2112  ;;  %v6039_v1 = vadd.f32 %v5592_v3, %v3131_v50  ;;  %v2820_v43 = vsel %vm2778_vm7, %v2755_v2, %v2345_v15  ;;  %s3677_s23 = sshll.u32 %s199_s22, 4  ;;  %s3916_s30 = sshra.s32 %s3680_s29, 4  ;;  %s3678_s23 = int_to_ptr.vmem [resolvable:$true] %s3677_s23  ;;  %s3917_s30 = int_to_ptr.hbm [resolvable:$true] %s3916_s30 }
 0x49a   : > { %3267 = vst.msk [vmem:[%s5613_s12 + $0x50] sm:$0xff] %vm2518_vm4, %v3096_v24  ;;  %v3341_v37 = vadd.f32 %v3340_v60, %v3339_v34  ;;  %v2767_v58 = vsel %vm2713_vm5, %v2702_v33, %v2113_v38  ;;  %3815 = vmatmul.msk.f32.gmra.mxu2 %vm2851_vm8, %v2820_v43  ;;  %v6051_v34 = vpop.permute.xlu2 %2092  ;;  %v2638_v35 = vsel %vm2583_vm3, %v2573_v45, %v7073_v26  ;;  %v7084_v45 = vld [vmem:[#allocation192_spill] sm:$0xff]  ;;  %s3918_s5 = scalar_lea.hbm %s3917_s30, 2  ;;  %p3923_p0 = scmp.lt.s32.totalorder %s3917_s30, %s6735_s4 }
 0x49b   : > { %v3537_v0 = vsel %vm2518_vm4, %v3464_v57, 0.0  ;;  %v2832_v16 = vsel %vm2778_vm7, %v2767_v58, %v5934_v51  ;;  %3279 = vst.msk [vmem:[%s5613_s12 + $0xb0] sm:$0xff] %vm2518_vm4, %v6039_v1  ;;  %v2678_v51 = vsel %vm2648_vm6, %v2613_v17, %v7067_v48  ;;  %v2691_v23 = vsel %vm2648_vm6, %v2626_v42, %v7074_v59  ;;  %v7078_v48 = vld [vmem:[#allocation181_spill] sm:$0xff]  ;;  %p3919_p11 = scmp.ne.s32.totalorder %s3917_s30, %s3918_s5  ;;  %p3924_p1 = scmp.lt.s32.totalorder %s3922_s8, %s3918_s5 }
 0x49c   : > { %v3538_v7 = vadd.f32 %v3537_v0, %v3536_v52  ;;  %3827 = vmatmul.msk.f32.gmra.mxu3 %vm2851_vm8, %v2832_v16  ;;  %v2703_v49 = vsel %vm2648_vm6, %v2638_v35, %v5245_v32  ;;  %v2756_v33 = vsel %vm2713_vm5, %v2691_v23, %v5974_v31  ;;  %v7086_v23 = vld [vmem:[#allocation203_spill] sm:$0xff] }
 0x49d   : > { %p3920_p12 = pnand %p3919_p11, %p4036_p5  ;;  %p3925_p2 = por %p3924_p1, %p3923_p0 }
 0x49f   : > { %p3921_p13 = pneg %p3920_p12 }
 0x4a0   : > { %v2321_v39 = vpop.permute.xlu1 %2320 }
 0x4a1   : > { %v2065_v52 = vpop.permute.xlu0 %2064  ;;  %p3926_p3 = pnand %p3925_p2, %p3921_p13 }
 0x4a2   : > { %v2743_v25 = vsel %vm2713_vm5, %v2678_v51, %v2065_v52  ;;  %v2373_v61 = vpop.permute.xlu2 %2372 }
 0x4a3   : > { %v2808_v29 = vsel %vm2778_vm7, %v2743_v25, %v2321_v39  ;;  %v513_v39 = vld [vmem:[#allocation2 + $0x2b0] sm:$0xff] }
 0x4a4   : > { %3803 = vmatmul.msk.f32.gmra.mxu1 %vm2851_vm8, %v2808_v29  ;;  %v2497_v29 = vsel %vm212_vm0, %v513_v39, %v7079_v28  ;;  %v514_v39 = vld [vmem:[#allocation2 + $0x2c0] sm:$0xff] }
 0x4a5   : > { %v2562_v6 = vsel %vm2518_vm4, %v2497_v29, %v7080_v18  ;;  %v7091_v18 = vld [vmem:[#allocation29_spill] sm:$0xff] }
 0x4a6   : > { %v3170_v10 = vpop.f32.mrf.mxu2  ;;  %v3098_v46 = vpop.f32.mrf.mxu0  ;;  %v2627_v62 = vsel %vm2583_vm3, %v2562_v6, %v7082_v11  ;;  %v2498_v6 = vsel %vm212_vm0, %v514_v39, %v7091_v18 }
 0x4a7   : > { %v6075_v63 = vadd.f32 %v5592_v3, %v3170_v10  ;;  %v3099_v24 = vadd.f32 %v5592_v3, %v3098_v46  ;;  %v7083_v46 = vld [vmem:[#allocation91_spill] sm:$0xff]  ;;  %v2692_v53 = vsel %vm2648_vm6, %v2627_v62, %v7084_v45  ;;  %v7094_v45 = vld [vmem:[#allocation142_spill] sm:$0xff] }
 0x4a8   : > { %v2347_v15 = vpop.permute.xlu1 %2346  ;;  %v3134_v50 = vpop.f32.mrf.mxu1  ;;  %v2574_v13 = vsel %vm2518_vm4, %v2509_v22, %v7083_v46  ;;  %v2757_v35 = vsel %vm2713_vm5, %v2692_v53, %v6051_v34  ;;  %v7092_v22 = vld [vmem:[#allocation93_spill] sm:$0xff]  ;;  %v7095_v53 = vld [vmem:[#allocation103_spill] sm:$0xff] }
 0x4a9   : > { %3292 = vst.msk [vmem:[%s5613_s12 + $0x118] sm:$0xff] %vm2518_vm4, %v6075_v63  ;;  %v3342_v2 = vsel %vm2518_vm4, %v3099_v24, 0.0  ;;  %v3465_v60 = vmul.f32 %v3099_v24, %v3099_v24  ;;  %v2115_v57 = vpop.permute.xlu0 %2114  ;;  %v6095_v58 = vadd.f32 %v5592_v3, %v3134_v50  ;;  %v2821_v43 = vsel %vm2778_vm7, %v2756_v33, %v2347_v15  ;;  %v7093_v46 = vld [vmem:[#allocation41_spill] sm:$0xff] }
 0x4aa   : > { %3268 = vst.msk [vmem:[%s5613_s12 + $0x58] sm:$0xff] %vm2518_vm4, %v3099_v24  ;;  %v6092_v38 = vadd.f32 %v3342_v2, %v3341_v37  ;;  %v2768_v32 = vsel %vm2713_vm5, %v2703_v49, %v2115_v57  ;;  %3816 = vmatmul.msk.f32.gmra.mxu2 %vm2851_vm8, %v2821_v43  ;;  %v7075_v37 = vld [vmem:[#allocation28_spill] sm:$0xff]  ;;  %v7085_v24 = vld [vmem:[#allocation154_spill] sm:$0xff]  ;;  %v2563_v11 = vsel %vm2518_vm4, %v2498_v6, %v7092_v22 }
 0x4ab   : > { %v3539_v31 = vsel %vm2518_vm4, %v3465_v60, 0.0  ;;  %v2833_v0 = vsel %vm2778_vm7, %v2768_v32, %v6004_v56  ;;  %3280 = vst.msk [vmem:[%s5613_s12 + $0xb8] sm:$0xff] %vm2518_vm4, %v6095_v58  ;;  %v2484_v40 = vsel %vm212_vm0, %v500_v30, %v7075_v37  ;;  %v2639_v26 = vsel %vm2583_vm3, %v2574_v13, %v7085_v24  ;;  %v501_v2 = vld [vmem:[#allocation2 + $0x1f0] sm:$0xff] }
 0x4ac   : > { %v6103_v16 = vadd.f32 %v3539_v31, %v3538_v7  ;;  %3828 = vmatmul.msk.f32.gmra.mxu3 %vm2851_vm8, %v2833_v0  ;;  %v2549_v47 = vsel %vm2518_vm4, %v2484_v40, %v7076_v36  ;;  %v2095_v7 = vpop.permute.xlu2 %2094  ;;  %v2704_v15 = vsel %vm2648_vm6, %v2639_v26, %v7086_v23  ;;  %v7087_v32 = vld [vmem:[#allocation27_spill] sm:$0xff]  ;;  %v7088_v0 = vld [vmem:[#allocation68_spill] sm:$0xff]  ;;  %v7096_v26 = vld [vmem:[#allocation182_spill] sm:$0xff] }
 0x4ad   : > { %v2614_v19 = vsel %vm2583_vm3, %v2549_v47, %v7077_v55  ;;  %v2485_v43 = vsel %vm212_vm0, %v501_v2, %v7087_v32  ;;  %v6167_v55 = vld [vmem:[%s6733_s2] ss:$0 sm:$0xff] }
 0x4ae   : > { %v2679_v56 = vsel %vm2648_vm6, %v2614_v19, %v7078_v48  ;;  %v2550_v37 = vsel %vm2518_vm4, %v2485_v43, %v7088_v0  ;;  %v7090_v48 = vld [vmem:[#allocation180_spill] sm:$0xff] }
 0x4b0   : > { %v2323_v17 = vpop.permute.xlu1 %2322 }
 0x4b1   : > { %v2067_v51 = vpop.permute.xlu0 %2066 }
 0x4b2   : > { %v2744_v52 = vsel %vm2713_vm5, %v2679_v56, %v2067_v51 }
 0x4b3   : > { %v2809_v25 = vsel %vm2778_vm7, %v2744_v52, %v2323_v17 }
 0x4b4   : > { %3804 = vmatmul.msk.f32.gmra.mxu1 %vm2851_vm8, %v2809_v25  ;;  %v2375_v60 = vpop.permute.xlu2 %2374  ;;  %v526_v25 = vld [vmem:[#allocation2 + $0x380] sm:$0xff] }
 0x4b5   : > { %v2510_v13 = vsel %vm212_vm0, %v526_v25, %v7093_v46  ;;  %v7104_v46 = vld [vmem:[#allocation102_spill] sm:$0xff] }
 0x4b6   : > { %v3173_v10 = vpop.f32.mrf.mxu2  ;;  %v2575_v24 = vsel %vm2518_vm4, %v2510_v13, %v7095_v53 }
 0x4b7   : > { %v6133_v42 = vadd.f32 %v5592_v3, %v3173_v10 }
 0x4b8   : > { %v2349_v59 = vpop.permute.xlu1 %2348 }
 0x4b9   : > { %3293 = vst.msk [vmem:[%s5613_s12 + $0x120] sm:$0xff] %vm2518_vm4, %v6133_v42  ;;  %v2117_v50 = vpop.permute.xlu0 %2116  ;;  %v2822_v49 = vsel %vm2778_vm7, %v2757_v35, %v2349_v59  ;;  %v7097_v59 = vld [vmem:[#allocation153_spill] sm:$0xff] }
 0x4ba   : > { %v2769_v33 = vsel %vm2713_vm5, %v2704_v15, %v2117_v50  ;;  %3817 = vmatmul.msk.f32.gmra.mxu2 %vm2851_vm8, %v2822_v49  ;;  %v2640_v23 = vsel %vm2583_vm3, %v2575_v24, %v7097_v59 }
 0x4bb   : > { %v2834_v57 = vsel %vm2778_vm7, %v2769_v33, %v2373_v61  ;;  %v7089_v61 = vld [vmem:[#allocation131_spill] sm:$0xff] }
 0x4bc   : > { %3829 = vmatmul.msk.f32.gmra.mxu3 %vm2851_vm8, %v2834_v57  ;;  %v2615_v47 = vsel %vm2583_vm3, %v2550_v37, %v7089_v61  ;;  %v2353_v62 = vpop.permute.xlu2 %2352 }
 0x4bd   : > { %v3209_v34 = vpop.f32.mrf.mxu3  ;;  %v2680_v56 = vsel %vm2648_vm6, %v2615_v47, %v7090_v48 }
 0x4be   : > { %v6152_v30 = vadd.f32 %v5592_v3, %v3209_v34  ;;  %v3137_v31 = vpop.f32.mrf.mxu1  ;;  %v515_v34 = vld [vmem:[#allocation2 + $0x2d0] sm:$0xff] }
 0x4bf   : > { %v3101_v40 = vpop.f32.mrf.mxu0  ;;  %v6157_v36 = vadd.f32 %v5592_v3, %v3137_v31  ;;  %v7099_v31 = vld [vmem:[#allocation43_spill] sm:$0xff] }
 0x4c0   : > { %3305 = vst.msk [vmem:[%s5613_s12 + $0x180] sm:$0xff] %vm2518_vm4, %v6152_v30  ;;  %v3102_v19 = vadd.f32 %v6167_v55, %v3101_v40  ;;  %v2325_v17 = vpop.permute.xlu1 %2324  ;;  %v2499_v0 = vsel %vm212_vm0, %v515_v34, %v7099_v31  ;;  %v7100_v40 = vld [vmem:[#allocation92_spill] sm:$0xff] }
 0x4c1   : > { %3281 = vst.msk [vmem:[%s5613_s12 + $0xc0] sm:$0xff] %vm2518_vm4, %v6157_v36  ;;  %v2069_v3 = vpop.permute.xlu0 %2068  ;;  %v2564_v61 = vsel %vm2518_vm4, %v2499_v0, %v7100_v40  ;;  %v7110_v31 = vld [vmem:[#allocation156_spill] sm:$0xff] }
 0x4c2   : > { %3269 = vst.msk [vmem:[%s5613_s12 + $0x60] sm:$0xff] %vm2518_vm4, %v3102_v19  ;;  %v3344_v51 = vsel %vm2518_vm4, %v3102_v19, 0.0  ;;  %v3466_v52 = vmul.f32 %v3102_v19, %v3102_v19  ;;  %v2745_v4 = vsel %vm2713_vm5, %v2680_v56, %v2069_v3  ;;  %v7101_v19 = vld [vmem:[#allocation132_spill] sm:$0xff] }
 0x4c3   : > { %v3345_v28 = vadd.f32 %v3344_v51, %v6092_v38  ;;  %v2810_v29 = vsel %vm2778_vm7, %v2745_v4, %v2325_v17  ;;  %v2628_v38 = vsel %vm2583_vm3, %v2563_v11, %v7094_v45  ;;  %v2629_v17 = vsel %vm2583_vm3, %v2564_v61, %v7101_v19  ;;  %v7102_v56 = vld [vmem:[#allocation196_spill] sm:$0xff]  ;;  %v7112_v61 = vld [vmem:[#allocation199_spill] sm:$0xff] }
 0x4c4   : > { %v3541_v5 = vsel %vm2518_vm4, %v3466_v52, 0.0  ;;  %3805 = vmatmul.msk.f32.gmra.mxu1 %vm2851_vm8, %v2810_v29  ;;  %v2693_v35 = vsel %vm2648_vm6, %v2628_v38, %v7096_v26  ;;  %v2123_v47 = vpop.permute.xlu2 %2122  ;;  %v2694_v3 = vsel %vm2648_vm6, %v2629_v17, %v7102_v56  ;;  %v527_v52 = vld [vmem:[#allocation2 + $0x390] sm:$0xff] }
 0x4c5   : > { %v3542_v10 = vadd.f32 %v3541_v5, %v6103_v16  ;;  %v2758_v15 = vsel %vm2713_vm5, %v2693_v35, %v2095_v7  ;;  %v7098_v16 = vld [vmem:[#allocation194_spill] sm:$0xff]  ;;  %v7103_v5 = vld [vmem:[#allocation53_spill] sm:$0xff]  ;;  %v7105_v38 = vld [vmem:[#allocation144_spill] sm:$0xff] }
 0x4c6   : > { %v2705_v49 = vsel %vm2648_vm6, %v2640_v23, %v7098_v16  ;;  %v2511_v22 = vsel %vm212_vm0, %v527_v52, %v7103_v5  ;;  %v516_v16 = vld [vmem:[#allocation2 + $0x2e0] sm:$0xff]  ;;  %v7113_v17 = vld [vmem:[#allocation195_spill] sm:$0xff] }
 0x4c7   : > { %v2576_v13 = vsel %vm2518_vm4, %v2511_v22, %v7104_v46 }
 0x4c8   : > { %v2351_v50 = vpop.permute.xlu1 %2350 }
 0x4c9   : > { %v2119_v33 = vpop.permute.xlu0 %2118  ;;  %v2823_v2 = vsel %vm2778_vm7, %v2758_v15, %v2351_v50 }
 0x4ca   : > { %v2770_v57 = vsel %vm2713_vm5, %v2705_v49, %v2119_v33  ;;  %3818 = vmatmul.msk.f32.gmra.mxu2 %vm2851_vm8, %v2823_v2  ;;  %v7106_v49 = vld [vmem:[#allocation52_spill] sm:$0xff]  ;;  %v7107_v33 = vld [vmem:[#allocation42_spill] sm:$0xff] }
 0x4cb   : > { %v2835_v32 = vsel %vm2778_vm7, %v2770_v57, %v2375_v60  ;;  %v2500_v2 = vsel %vm212_vm0, %v516_v16, %v7107_v33  ;;  %v7108_v57 = vld [vmem:[#allocation94_spill] sm:$0xff] }
 0x4cc   : > { %3830 = vmatmul.msk.f32.gmra.mxu3 %vm2851_vm8, %v2835_v32  ;;  %v3176_v43 = vpop.f32.mrf.mxu2  ;;  %v2101_v23 = vpop.permute.xlu2 %2100  ;;  %v7109_v32 = vld [vmem:[#allocation82_spill] sm:$0xff] }
 0x4cd   : > { %v6207_v7 = vadd.f32 %v6167_v55, %v3176_v43  ;;  %v2565_v43 = vsel %vm2518_vm4, %v2500_v2, %v7109_v32 }
 0x4ce   : > { %v3212_v37 = vpop.f32.mrf.mxu3 }
 0x4cf   : > { %3294 = vst.msk [vmem:[%s5613_s12 + $0x128] sm:$0xff] %vm2518_vm4, %v6207_v7  ;;  %v6217_v60 = vadd.f32 %v6167_v55, %v3212_v37  ;;  %v7111_v37 = vld [vmem:[#allocation146_spill] sm:$0xff] }
 0x4d0   : > { %v2121_v39 = vpop.permute.xlu1 %2120  ;;  %v3104_v48 = vpop.f32.mrf.mxu0  ;;  %v2630_v40 = vsel %vm2583_vm3, %v2565_v43, %v7111_v37 }
 0x4d1   : > { %3306 = vst.msk [vmem:[%s5613_s12 + $0x188] sm:$0xff] %vm2518_vm4, %v6217_v60  ;;  %v2097_v51 = vpop.permute.xlu0 %2096  ;;  %v3105_v25 = vadd.f32 %v6167_v55, %v3104_v48 }
 0x4d2   : > { %v2759_v4 = vsel %vm2713_vm5, %v2694_v3, %v2097_v51  ;;  %v517_v3 = vld [vmem:[#allocation2 + $0x2f0] sm:$0xff] }
 0x4d3   : > { %v2824_v29 = vsel %vm2778_vm7, %v2759_v4, %v2353_v62  ;;  %3270 = vst.msk [vmem:[%s5613_s12 + $0x68] sm:$0xff] %vm2518_vm4, %v3105_v25  ;;  %v3346_v18 = vsel %vm2518_vm4, %v3105_v25, 0.0  ;;  %v3467_v6 = vmul.f32 %v3105_v25, %v3105_v25  ;;  %v2641_v62 = vsel %vm2583_vm3, %v2576_v13, %v7105_v38 }
 0x4d4   : > { %3819 = vmatmul.msk.f32.gmra.mxu2 %vm2851_vm8, %v2824_v29  ;;  %v6235_v11 = vadd.f32 %v3346_v18, %v3345_v28  ;;  %v2706_v26 = vsel %vm2648_vm6, %v2641_v62, %v5261_v54  ;;  %v528_v28 = vld [vmem:[#allocation2 + $0x3a0] sm:$0xff]  ;;  %v2381_v25 = vpop.permute.xlu2 %2380  ;;  %v529_v18 = vld [vmem:[#allocation2 + $0x3b0] sm:$0xff] }
 0x4d5   : > { %v3543_v45 = vsel %vm2518_vm4, %v3467_v6, 0.0  ;;  %v2771_v15 = vsel %vm2713_vm5, %v2706_v26, %v2121_v39  ;;  %v2512_v54 = vsel %vm212_vm0, %v528_v28, %v7106_v49  ;;  %v2695_v39 = vsel %vm2648_vm6, %v2630_v40, %v7113_v17  ;;  %v7114_v6 = vld [vmem:[#allocation32_spill] sm:$0xff]  ;;  %v7117_v62 = vld [vmem:[#allocation145_spill] sm:$0xff]  ;;  %v7120_v49 = vld [vmem:[#allocation155_spill] sm:$0xff] }
 0x4d6   : > { %v6242_v53 = vadd.f32 %v3543_v45, %v3542_v10  ;;  %v2577_v34 = vsel %vm2518_vm4, %v2512_v54, %v7108_v57  ;;  %v2501_v5 = vsel %vm212_vm0, %v517_v3, %v7114_v6  ;;  %v7116_v45 = vld [vmem:[#allocation44_spill] sm:$0xff]  ;;  %v7118_v28 = vld [vmem:[#allocation105_spill] sm:$0xff]  ;;  %v7121_v57 = vld [vmem:[#allocation202_spill] sm:$0xff] }
 0x4d7   : > { %v3140_v24 = vpop.f32.mrf.mxu1  ;;  %v2642_v0 = vsel %vm2583_vm3, %v2577_v34, %v7110_v31  ;;  %v2513_v38 = vsel %vm212_vm0, %v529_v18, %v7116_v45  ;;  %v7124_v18 = vld [vmem:[#allocation147_spill] sm:$0xff] }
 0x4d8   : > { %v6247_v35 = vadd.f32 %v6167_v55, %v3140_v24  ;;  %v2099_v59 = vpop.permute.xlu1 %2098  ;;  %v2707_v19 = vsel %vm2648_vm6, %v2642_v0, %v7112_v61 }
 0x4d9   : > { %v2377_v50 = vpop.permute.xlu0 %2376  ;;  %v2772_v48 = vsel %vm2713_vm5, %v2707_v19, %v2123_v47  ;;  %v2760_v51 = vsel %vm2713_vm5, %v2695_v39, %v2099_v59  ;;  %v7115_v47 = vld [vmem:[#allocation96_spill] sm:$0xff]  ;;  %v530_v39 = vld [vmem:[#allocation2 + $0x3c0] sm:$0xff] }
 0x4da   : > { %3282 = vst.msk [vmem:[%s5613_s12 + $0xc8] sm:$0xff] %vm2518_vm4, %v6247_v35  ;;  %v2836_v10 = vsel %vm2778_vm7, %v2771_v15, %v2377_v50  ;;  %v2566_v22 = vsel %vm2518_vm4, %v2501_v5, %v7115_v47  ;;  %v2578_v15 = vsel %vm2518_vm4, %v2513_v38, %v7118_v28  ;;  %v7119_v50 = vld [vmem:[#allocation185_spill] sm:$0xff] }
 0x4db   : > { %3831 = vmatmul.msk.f32.gmra.mxu3 %vm2851_vm8, %v2836_v10  ;;  %v2631_v24 = vsel %vm2583_vm3, %v2566_v22, %v7117_v62  ;;  %v2643_v54 = vsel %vm2583_vm3, %v2578_v15, %v7120_v49  ;;  %v531_v22 = vld [vmem:[#allocation2 + $0x3d0] sm:$0xff]  ;;  %v7126_v62 = vld [vmem:[#allocation97_spill] sm:$0xff] }
 0x4dc   : > { %v2696_v16 = vsel %vm2648_vm6, %v2631_v24, %v7119_v50  ;;  %v2708_v34 = vsel %vm2648_vm6, %v2643_v54, %v7121_v57  ;;  %v2383_v17 = vpop.permute.xlu2 %2382  ;;  %v7127_v50 = vld [vmem:[#allocation159_spill] sm:$0xff] }
 0x4dd   : > { %v2761_v33 = vsel %vm2713_vm5, %v2696_v16, %v2101_v23 }
 0x4e0   : > { %v2379_v56 = vpop.permute.xlu1 %2378 }
 0x4e1   : > { %v2355_v52 = vpop.permute.xlu0 %2354  ;;  %v2837_v4 = vsel %vm2778_vm7, %v2772_v48, %v2379_v56 }
 0x4e2   : > { %v2825_v29 = vsel %vm2778_vm7, %v2760_v51, %v2355_v52  ;;  %v7122_v51 = vld [vmem:[#allocation55_spill] sm:$0xff] }
 0x4e3   : > { %3820 = vmatmul.msk.f32.gmra.mxu2 %vm2851_vm8, %v2825_v29  ;;  %3832 = vmatmul.msk.f32.gmra.mxu3 %vm2851_vm8, %v2837_v4  ;;  %v2514_v52 = vsel %vm212_vm0, %v530_v39, %v7122_v51  ;;  %v7123_v4 = vld [vmem:[#allocation104_spill] sm:$0xff]  ;;  %v7130_v39 = vld [vmem:[#allocation158_spill] sm:$0xff] }
 0x4e4   : > { %v2579_v29 = vsel %vm2518_vm4, %v2514_v52, %v7123_v4 }
 0x4e5   : > { %v3179_v46 = vpop.f32.mrf.mxu2  ;;  %v3215_v13 = vpop.f32.mrf.mxu3 }
 0x4e6   : > { %v6286_v26 = vadd.f32 %v6167_v55, %v3179_v46  ;;  %v6289_v59 = vadd.f32 %v6167_v55, %v3215_v13  ;;  %v7125_v13 = vld [vmem:[#allocation54_spill] sm:$0xff] }
 0x4e7   : > { %v3107_v10 = vpop.f32.mrf.mxu0  ;;  %v2515_v45 = vsel %vm212_vm0, %v531_v22, %v7125_v13  ;;  %v3352_v22 = vsel %vm2518_vm4, %v5730_v12, 0.0 }
 0x4e8   : > { %3295 = vst.msk [vmem:[%s5613_s12 + $0x130] sm:$0xff] %vm2518_vm4, %v6286_v26  ;;  %v2357_v2 = vpop.permute.xlu1 %2356  ;;  %v3108_v32 = vadd.f32 %v6167_v55, %v3107_v10  ;;  %v2580_v24 = vsel %vm2518_vm4, %v2515_v45, %v7126_v62 }
 0x4e9   : > { %3307 = vst.msk [vmem:[%s5613_s12 + $0x190] sm:$0xff] %vm2518_vm4, %v6289_v59  ;;  %v3143_v43 = vpop.f32.mrf.mxu1  ;;  %v2125_v31 = vpop.permute.xlu0 %2124  ;;  %v2826_v0 = vsel %vm2778_vm7, %v2761_v33, %v2357_v2  ;;  %v2645_v16 = vsel %vm2583_vm3, %v2580_v24, %v7127_v50  ;;  %v532_v33 = vld [vmem:[#allocation2 + $0x3e0] sm:$0xff] }
 0x4ea   : > { %v6309_v37 = vadd.f32 %v6167_v55, %v3143_v43  ;;  %v2773_v23 = vsel %vm2713_vm5, %v2708_v34, %v2125_v31  ;;  %3271 = vst.msk [vmem:[%s5613_s12 + $0x70] sm:$0xff] %vm2518_vm4, %v3108_v32  ;;  %v3348_v40 = vsel %vm2518_vm4, %v3108_v32, 0.0  ;;  %v3468_v61 = vmul.f32 %v3108_v32, %v3108_v32  ;;  %v7128_v34 = vld [vmem:[#allocation47_spill] sm:$0xff] }
 0x4eb   : > { %3821 = vmatmul.msk.f32.gmra.mxu2 %vm2851_vm8, %v2826_v0  ;;  %v2838_v19 = vsel %vm2778_vm7, %v2773_v23, %v2381_v25  ;;  %v3349_v48 = vadd.f32 %v3348_v40, %v6235_v11  ;;  %v2644_v11 = vsel %vm2583_vm3, %v2579_v29, %v7124_v18  ;;  %v2516_v32 = vsel %vm212_vm0, %v532_v33, %v7128_v34  ;;  %v7129_v23 = vld [vmem:[#allocation108_spill] sm:$0xff] }
 0x4ec   : > { %3283 = vst.msk [vmem:[%s5613_s12 + $0xd0] sm:$0xff] %vm2518_vm4, %v6309_v37  ;;  %3833 = vmatmul.msk.f32.gmra.mxu3 %vm2851_vm8, %v2838_v19  ;;  %v3545_v56 = vsel %vm2518_vm4, %v3468_v61, 0.0  ;;  %v2581_v40 = vsel %vm2518_vm4, %v2516_v32, %v7129_v23  ;;  %v3470_v29 = vmul.f32 %v5730_v12, %v5730_v12  ;;  %v3472_v12 = vmul.f32 %v5815_v8, %v5815_v8 }
 0x4ed   : > { %v3546_v3 = vadd.f32 %v3545_v56, %v6242_v53  ;;  %v2385_v53 = vpop.permute.xlu2 %2384  ;;  %v2646_v56 = vsel %vm2583_vm3, %v2581_v40, %v7130_v39  ;;  %v3358_v40 = vsel %vm2518_vm4, %v5853_v14, 0.0 }
 0x4ee   : > { %v3549_v24 = vsel %vm2518_vm4, %v3470_v29, 0.0  ;;  %v3553_v23 = vsel %vm2518_vm4, %v3472_v12, 0.0 }
 0x4f0   : > { %v2127_v25 = vpop.permute.xlu1 %2126 }
 0x4f1   : > { %v1871_v6 = vpop.permute.xlu0 %1870 }
 0x4f2   : > { %v2709_v5 = vsel %vm2648_vm6, %v2644_v11, %v1871_v6  ;;  %v533_v6 = vld [vmem:[#allocation2 + $0x3f0] sm:$0xff] }
 0x4f3   : > { %v2774_v47 = vsel %vm2713_vm5, %v2709_v5, %v2127_v25 }
 0x4f4   : > { %v2839_v46 = vsel %vm2778_vm7, %v2774_v47, %v2383_v17 }
 0x4f5   : > { %3834 = vmatmul.msk.f32.gmra.mxu3 %vm2851_vm8, %v2839_v46  ;;  %v2387_v0 = vpop.permute.xlu2 %2386  ;;  %v3471_v46 = vmul.f32 %v5782_v20, %v5782_v20 }
 0x4f7   : > { %v3182_v38 = vpop.f32.mrf.mxu2  ;;  %v3551_v33 = vsel %vm2518_vm4, %v3471_v46, 0.0 }
 0x4f8   : > { %v6339_v28 = vadd.f32 %v6167_v55, %v3182_v38  ;;  %v2129_v15 = vpop.permute.xlu1 %2128  ;;  %v7131_v38 = vld [vmem:[#allocation57_spill] sm:$0xff] }
 0x4f9   : > { %v1873_v10 = vpop.permute.xlu0 %1872  ;;  %v2517_v62 = vsel %vm212_vm0, %v533_v6, %v7131_v38  ;;  %v3476_v6 = vmul.f32 %v6039_v1, %v6039_v1 }
 0x4fa   : > { %3296 = vst.msk [vmem:[%s5613_s12 + $0x138] sm:$0xff] %vm2518_vm4, %v6339_v28  ;;  %v2710_v49 = vsel %vm2648_vm6, %v2645_v16, %v1873_v10 }
 0x4fb   : > { %v2775_v54 = vsel %vm2713_vm5, %v2710_v49, %v2129_v15  ;;  %v7132_v15 = vld [vmem:[#allocation107_spill] sm:$0xff] }
 0x4fc   : > { %v2840_v2 = vsel %vm2778_vm7, %v2775_v54, %v2385_v53  ;;  %v2582_v50 = vsel %vm2518_vm4, %v2517_v62, %v7132_v15  ;;  %v7133_v54 = vld [vmem:[#allocation150_spill] sm:$0xff] }
 0x4fd   : > { %3835 = vmatmul.msk.f32.gmra.mxu3 %vm2851_vm8, %v2840_v2  ;;  %v3356_v2 = vsel %vm2518_vm4, %v5815_v8, 0.0  ;;  %v2389_v34 = vpop.permute.xlu2 %2388 }
 0x4fe   : > { %v3218_v57 = vpop.f32.mrf.mxu3 }
 0x4ff   : > { %v6353_v43 = vadd.f32 %v6167_v55, %v3218_v57  ;;  %v3146_v31 = vpop.f32.mrf.mxu1 }
 0x500   : > { %v3110_v61 = vpop.f32.mrf.mxu0  ;;  %v6358_v19 = vadd.f32 %v6167_v55, %v3146_v31  ;;  %v2131_v17 = vpop.permute.xlu1 %2130 }
 0x501   : > { %3308 = vst.msk [vmem:[%s5613_s12 + $0x198] sm:$0xff] %vm2518_vm4, %v6353_v43  ;;  %v3111_v51 = vadd.f32 %v6167_v55, %v3110_v61  ;;  %v1875_v52 = vpop.permute.xlu0 %1874  ;;  %v3474_v61 = vmul.f32 %v5910_v44, %v5910_v44 }
 0x502   : > { %3284 = vst.msk [vmem:[%s5613_s12 + $0xd8] sm:$0xff] %vm2518_vm4, %v6358_v19  ;;  %v2711_v4 = vsel %vm2648_vm6, %v2646_v56, %v1875_v52  ;;  %v3360_v52 = vsel %vm2518_vm4, %v5910_v44, 0.0 }
 0x503   : > { %3272 = vst.msk [vmem:[%s5613_s12 + $0x78] sm:$0xff] %vm2518_vm4, %v3111_v51  ;;  %v3350_v25 = vsel %vm2518_vm4, %v3111_v51, 0.0  ;;  %v3469_v18 = vmul.f32 %v3111_v51, %v3111_v51  ;;  %v2776_v11 = vsel %vm2713_vm5, %v2711_v4, %v2131_v17  ;;  %v3475_v4 = vmul.f32 %v5980_v27, %v5980_v27 }
 0x504   : > { %v3351_v5 = vadd.f32 %v3350_v25, %v3349_v48  ;;  %v2841_v47 = vsel %vm2778_vm7, %v2776_v11, %v2387_v0  ;;  %v3354_v48 = vsel %vm2518_vm4, %v5782_v20, 0.0  ;;  %v3473_v20 = vmul.f32 %v5853_v14, %v5853_v14 }
 0x505   : > { %v3547_v53 = vsel %vm2518_vm4, %v3469_v18, 0.0  ;;  %3836 = vmatmul.msk.f32.gmra.mxu3 %vm2851_vm8, %v2841_v47  ;;  %v3557_v18 = vsel %vm2518_vm4, %v3474_v61, 0.0  ;;  %v3362_v11 = vsel %vm2518_vm4, %v5980_v27, 0.0  ;;  %v3477_v27 = vmul.f32 %v6095_v58, %v6095_v58 }
 0x506   : > { %v3353_v13 = vadd.f32 %v3352_v22, %v3351_v5  ;;  %v3548_v45 = vadd.f32 %v3547_v53, %v3546_v3  ;;  %v2647_v3 = vsel %vm2583_vm3, %v2582_v50, %v7133_v54  ;;  %v3555_v51 = vsel %vm2518_vm4, %v3473_v20, 0.0 }
 0x507   : > { %v3559_v53 = vsel %vm2518_vm4, %v3475_v4, 0.0 }
 0x508   : > { %v3355_v16 = vadd.f32 %v3354_v48, %v3353_v13  ;;  %v3550_v10 = vadd.f32 %v3549_v24, %v3548_v45  ;;  %v2133_v49 = vpop.permute.xlu1 %2132  ;;  %v3364_v13 = vsel %vm2518_vm4, %v6039_v1, 0.0  ;;  %v3561_v24 = vsel %vm2518_vm4, %v3476_v6, 0.0 }
 0x509   : > { %v1877_v57 = vpop.permute.xlu0 %1876  ;;  %v3366_v48 = vsel %vm2518_vm4, %v6095_v58, 0.0  ;;  %v3478_v1 = vmul.f32 %v6157_v36, %v6157_v36 }
 0x50a   : > { %v3357_v32 = vadd.f32 %v3356_v2, %v3355_v16  ;;  %v3552_v31 = vadd.f32 %v3551_v33, %v3550_v10  ;;  %v2712_v0 = vsel %vm2648_vm6, %v2647_v3, %v1877_v57  ;;  %v3563_v16 = vsel %vm2518_vm4, %v3477_v27, 0.0 }
 0x50b   : > { %v2777_v17 = vsel %vm2713_vm5, %v2712_v0, %v2133_v49  ;;  %v3368_v10 = vsel %vm2518_vm4, %v6157_v36, 0.0  ;;  %v3479_v49 = vmul.f32 %v6247_v35, %v6247_v35  ;;  %v3565_v58 = vsel %vm2518_vm4, %v3478_v1, 0.0 }
 0x50c   : > { %v3359_v8 = vadd.f32 %v3358_v40, %v3357_v32  ;;  %v3554_v39 = vadd.f32 %v3553_v23, %v3552_v31  ;;  %v2842_v56 = vsel %vm2778_vm7, %v2777_v17, %v2389_v34  ;;  %v3370_v33 = vsel %vm2518_vm4, %v6247_v35, 0.0 }
 0x50d   : > { %3837 = vmatmul.msk.f32.gmra.mxu3 %vm2851_vm8, %v2842_v56  ;;  %v3185_v25 = vpop.f32.mrf.mxu2  ;;  %v3480_v2 = vmul.f32 %v6309_v37, %v6309_v37  ;;  %v3567_v36 = vsel %vm2518_vm4, %v3479_v49, 0.0  ;;  %v3372_v34 = vsel %vm2518_vm4, %v6309_v37, 0.0  ;;  %v3481_v32 = vmul.f32 %v6358_v19, %v6358_v19 }
 0x50e   : > { %v3361_v14 = vadd.f32 %v3360_v52, %v3359_v8  ;;  %v3556_v29 = vadd.f32 %v3555_v51, %v3554_v39  ;;  %v6419_v44 = vadd.f32 %v6167_v55, %v3185_v25  ;;  %v3374_v23 = vsel %vm2518_vm4, %v6358_v19, 0.0 }
 0x50f   : > { %v3221_v5 = vpop.f32.mrf.mxu3  ;;  %v3569_v35 = vsel %vm2518_vm4, %v3480_v2, 0.0  ;;  %v3571_v17 = vsel %vm2518_vm4, %v3481_v32, 0.0 }
 0x510   : > { %v3558_v47 = vadd.f32 %v3557_v18, %v3556_v29  ;;  %v3363_v22 = vadd.f32 %v3362_v11, %v3361_v14  ;;  %v6422_v46 = vadd.f32 %v6167_v55, %v3221_v5  ;;  %3297 = vst.msk [vmem:[%s5613_s12 + $0x140] sm:$0xff] %vm2518_vm4, %v6419_v44 }
 0x511   : > { %v3149_v45 = vpop.f32.mrf.mxu1 }
 0x512   : > { %v3365_v38 = vadd.f32 %v3364_v13, %v3363_v22  ;;  %v3560_v62 = vadd.f32 %v3559_v53, %v3558_v47  ;;  %3309 = vst.msk [vmem:[%s5613_s12 + $0x1a0] sm:$0xff] %vm2518_vm4, %v6422_v46  ;;  %v3150_v12 = vadd.f32 %v6167_v55, %v3149_v45 }
 0x514   : > { %v3367_v15 = vadd.f32 %v3366_v48, %v3365_v38  ;;  %v3562_v50 = vadd.f32 %v3561_v24, %v3560_v62  ;;  %3285 = vst.msk [vmem:[%s5613_s12 + $0xe0] sm:$0xff] %vm2518_vm4, %v3150_v12  ;;  %v3482_v6 = vmul.f32 %v3150_v12, %v3150_v12  ;;  %v3376_v22 = vsel %vm2518_vm4, %v3150_v12, 0.0 }
 0x516   : > { %v3369_v54 = vadd.f32 %v3368_v10, %v3367_v15  ;;  %v3564_v3 = vadd.f32 %v3563_v16, %v3562_v50  ;;  %v3573_v62 = vsel %vm2518_vm4, %v3482_v6, 0.0  ;;  %v3491_v6 = vmul.f32 %v6207_v7, %v6207_v7 }
 0x518   : > { %v3371_v20 = vadd.f32 %v3370_v33, %v3369_v54  ;;  %v3566_v57 = vadd.f32 %v3565_v58, %v3564_v3  ;;  %v3486_v3 = vmul.f32 %v5896_v21, %v5896_v21 }
 0x51a   : > { %v3373_v31 = vadd.f32 %v3372_v34, %v3371_v20  ;;  %v3568_v0 = vadd.f32 %v3567_v36, %v3566_v57  ;;  %v3384_v57 = vsel %vm2518_vm4, %v5896_v21, 0.0  ;;  %v3487_v36 = vmul.f32 %v5959_v41, %v5959_v41 }
 0x51b   : > { %v3388_v21 = vsel %vm2518_vm4, %v6021_v9, 0.0 }
 0x51c   : > { %v3375_v40 = vadd.f32 %v3374_v23, %v3373_v31  ;;  %v3570_v61 = vadd.f32 %v3569_v35, %v3568_v0  ;;  %v3581_v0 = vsel %vm2518_vm4, %v3486_v3, 0.0  ;;  %v3386_v35 = vsel %vm2518_vm4, %v5959_v41, 0.0 }
 0x51d   : > { %v3188_v37 = vpop.f32.mrf.mxu2  ;;  %v3488_v23 = vmul.f32 %v6021_v9, %v6021_v9  ;;  %v3390_v41 = vsel %vm2518_vm4, %v6075_v63, 0.0  ;;  %v3392_v9 = vsel %vm2518_vm4, %v6133_v42, 0.0  ;;  %v3400_v3 = vsel %vm2518_vm4, %v6419_v44, 0.0 }
 0x51e   : > { %v3572_v8 = vadd.f32 %v3571_v17, %v3570_v61  ;;  %v6463_v39 = vadd.f32 %v6167_v55, %v3188_v37  ;;  %v3377_v45 = vadd.f32 %v3376_v22, %v3375_v40  ;;  %v3583_v17 = vsel %vm2518_vm4, %v3487_v36, 0.0 }
 0x51f   : > { %v3224_v56 = vpop.f32.mrf.mxu3 }
 0x520   : > { %v6466_v51 = vadd.f32 %v6167_v55, %v3224_v56  ;;  %3298 = vst.msk [vmem:[%s5613_s12 + $0x148] sm:$0xff] %vm2518_vm4, %v6463_v39  ;;  %v3574_v12 = vadd.f32 %v3573_v62, %v3572_v8  ;;  %v3489_v8 = vmul.f32 %v6075_v63, %v6075_v63 }
 0x521   : > { %v3152_v19 = vpop.f32.mrf.mxu1 }
 0x522   : > { %3310 = vst.msk [vmem:[%s5613_s12 + $0x1a8] sm:$0xff] %vm2518_vm4, %v6466_v51  ;;  %v3153_v52 = vadd.f32 %v6167_v55, %v3152_v19  ;;  %v3585_v19 = vsel %vm2518_vm4, %v3488_v23, 0.0 }
 0x524   : > { %3286 = vst.msk [vmem:[%s5613_s12 + $0xe8] sm:$0xff] %vm2518_vm4, %v3153_v52  ;;  %v3483_v5 = vmul.f32 %v3153_v52, %v3153_v52  ;;  %v3378_v53 = vsel %vm2518_vm4, %v3153_v52, 0.0  ;;  %v3490_v52 = vmul.f32 %v6133_v42, %v6133_v42 }
 0x525   : > { %v3379_v15 = vadd.f32 %v3378_v53, %v3377_v45  ;;  %v3492_v45 = vmul.f32 %v6286_v26, %v6286_v26 }
 0x526   : > { %v3575_v24 = vsel %vm2518_vm4, %v3483_v5, 0.0  ;;  %v3589_v53 = vsel %vm2518_vm4, %v3490_v52, 0.0 }
 0x527   : > { %v3576_v49 = vadd.f32 %v3575_v24, %v3574_v12  ;;  %v3591_v24 = vsel %vm2518_vm4, %v3491_v6, 0.0  ;;  %v3493_v12 = vmul.f32 %v6339_v28, %v6339_v28 }
 0x52d   : > { %v3191_v4 = vpop.f32.mrf.mxu2 }
 0x52e   : > { %v6478_v14 = vadd.f32 %v6167_v55, %v3191_v4 }
 0x52f   : > { %v3227_v29 = vpop.f32.mrf.mxu3 }
 0x530   : > { %v6481_v25 = vadd.f32 %v6167_v55, %v3227_v29  ;;  %3299 = vst.msk [vmem:[%s5613_s12 + $0x150] sm:$0xff] %vm2518_vm4, %v6478_v14 }
 0x531   : > { %v3155_v18 = vpop.f32.mrf.mxu1 }
 0x532   : > { %3311 = vst.msk [vmem:[%s5613_s12 + $0x1b0] sm:$0xff] %vm2518_vm4, %v6481_v25  ;;  %v3156_v11 = vadd.f32 %v6167_v55, %v3155_v18 }
 0x534   : > { %3287 = vst.msk [vmem:[%s5613_s12 + $0xf0] sm:$0xff] %vm2518_vm4, %v3156_v11  ;;  %v3484_v13 = vmul.f32 %v3156_v11, %v3156_v11  ;;  %v3380_v48 = vsel %vm2518_vm4, %v3156_v11, 0.0  ;;  %v3587_v11 = vsel %vm2518_vm4, %v3489_v8, 0.0 }
 0x535   : > { %v3381_v54 = vadd.f32 %v3380_v48, %v3379_v15  ;;  %v3396_v48 = vsel %vm2518_vm4, %v6286_v26, 0.0  ;;  %v3595_v26 = vsel %vm2518_vm4, %v3493_v12, 0.0 }
 0x536   : > { %v3577_v16 = vsel %vm2518_vm4, %v3484_v13, 0.0  ;;  %v3394_v13 = vsel %vm2518_vm4, %v6207_v7, 0.0 }
 0x537   : > { %v3578_v2 = vadd.f32 %v3577_v16, %v3576_v49  ;;  %v3398_v16 = vsel %vm2518_vm4, %v6339_v28, 0.0 }
 0x53d   : > { %v3194_v47 = vpop.f32.mrf.mxu2 }
 0x53e   : > { %v6495_v27 = vadd.f32 %v6167_v55, %v3194_v47 }
 0x53f   : > { %v3230_v38 = vpop.f32.mrf.mxu3 }
 0x540   : > { %3300 = vst.msk [vmem:[%s5613_s12 + $0x158] sm:$0xff] %vm2518_vm4, %v6495_v27  ;;  %v6504_v1 = vadd.f32 %v6167_v55, %v3230_v38  ;;  %v3406_v8 = vsel %vm2518_vm4, %v6495_v27, 0.0 }
 0x541   : > { %v3158_v50 = vpop.f32.mrf.mxu1 }
 0x542   : > { %3312 = vst.msk [vmem:[%s5613_s12 + $0x1b8] sm:$0xff] %vm2518_vm4, %v6504_v1  ;;  %v3159_v10 = vadd.f32 %v6167_v55, %v3158_v50  ;;  %v3593_v50 = vsel %vm2518_vm4, %v3492_v45, 0.0 }
 0x544   : > { %3288 = vst.msk [vmem:[%s5613_s12 + $0xf8] sm:$0xff] %vm2518_vm4, %v3159_v10  ;;  %v3382_v58 = vsel %vm2518_vm4, %v3159_v10, 0.0  ;;  %v3485_v33 = vmul.f32 %v3159_v10, %v3159_v10  ;;  %v3494_v10 = vmul.f32 %v6419_v44, %v6419_v44 }
 0x545   : > { %v3383_v20 = vadd.f32 %v3382_v58, %v3381_v54  ;;  %v3495_v58 = vmul.f32 %v6463_v39, %v6463_v39 }
 0x546   : > { %v3579_v34 = vsel %vm2518_vm4, %v3485_v33, 0.0  ;;  %v3597_v28 = vsel %vm2518_vm4, %v3494_v10, 0.0 }
 0x547   : > { %v3385_v32 = vadd.f32 %v3384_v57, %v3383_v20  ;;  %v3580_v31 = vadd.f32 %v3579_v34, %v3578_v2  ;;  %v3402_v57 = vsel %vm2518_vm4, %v6463_v39, 0.0 }
 0x549   : > { %v3387_v40 = vadd.f32 %v3386_v35, %v3385_v32  ;;  %v3582_v61 = vadd.f32 %v3581_v0, %v3580_v31  ;;  %v3599_v31 = vsel %vm2518_vm4, %v3495_v58, 0.0  ;;  %v3496_v35 = vmul.f32 %v6478_v14, %v6478_v14 }
 0x54b   : > { %v3389_v37 = vadd.f32 %v3388_v21, %v3387_v40  ;;  %v3584_v56 = vadd.f32 %v3583_v17, %v3582_v61  ;;  %v3404_v40 = vsel %vm2518_vm4, %v6478_v14, 0.0  ;;  %v3601_v61 = vsel %vm2518_vm4, %v3496_v35, 0.0 }
 0x54c   : > { %v3497_v17 = vmul.f32 %v6495_v27, %v6495_v27  ;;  %v3506_v35 = vmul.f32 %v6422_v46, %v6422_v46 }
 0x54d   : > { %v3391_v4 = vadd.f32 %v3390_v41, %v3389_v37  ;;  %v3586_v29 = vadd.f32 %v3585_v19, %v3584_v56  ;;  %v3197_v18 = vpop.f32.mrf.mxu2 }
 0x54e   : > { %v3198_v5 = vadd.f32 %v6167_v55, %v3197_v18  ;;  %v3603_v14 = vsel %vm2518_vm4, %v3497_v17, 0.0  ;;  %v3424_v17 = vsel %vm2518_vm4, %v6422_v46, 0.0 }
 0x54f   : > { %v3393_v47 = vadd.f32 %v3392_v9, %v3391_v4  ;;  %v3588_v22 = vadd.f32 %v3587_v11, %v3586_v29  ;;  %v3233_v63 = vpop.f32.mrf.mxu3 }
 0x550   : > { %3301 = vst.msk [vmem:[%s5613_s12 + $0x160] sm:$0xff] %vm2518_vm4, %v3198_v5  ;;  %v6550_v42 = vadd.f32 %v6167_v55, %v3233_v63  ;;  %v3498_v41 = vmul.f32 %v3198_v5, %v3198_v5  ;;  %v3408_v18 = vsel %vm2518_vm4, %v3198_v5, 0.0 }
 0x551   : > { %v3395_v38 = vadd.f32 %v3394_v13, %v3393_v47  ;;  %v3590_v62 = vadd.f32 %v3589_v53, %v3588_v22 }
 0x552   : > { %3313 = vst.msk [vmem:[%s5613_s12 + $0x1c0] sm:$0xff] %vm2518_vm4, %v6550_v42  ;;  %v3605_v27 = vsel %vm2518_vm4, %v3498_v41, 0.0 }
 0x553   : > { %v3592_v7 = vadd.f32 %v3591_v24, %v3590_v62  ;;  %v3397_v15 = vadd.f32 %v3396_v48, %v3395_v38 }
 0x555   : > { %v3399_v49 = vadd.f32 %v3398_v16, %v3397_v15  ;;  %v3594_v54 = vadd.f32 %v3593_v50, %v3592_v7  ;;  %v3502_v7 = vmul.f32 %v6152_v30, %v6152_v30 }
 0x557   : > { %v3401_v33 = vadd.f32 %v3400_v3, %v3399_v49  ;;  %v3596_v2 = vadd.f32 %v3595_v26, %v3594_v54  ;;  %v3200_v20 = vpop.f32.mrf.mxu2  ;;  %v3416_v49 = vsel %vm2518_vm4, %v6152_v30, 0.0  ;;  %v3503_v54 = vmul.f32 %v6217_v60, %v6217_v60 }
 0x558   : > { %v3201_v36 = vadd.f32 %v6167_v55, %v3200_v20  ;;  %v3504_v20 = vmul.f32 %v6289_v59, %v6289_v59 }
 0x559   : > { %v3403_v34 = vadd.f32 %v3402_v57, %v3401_v33  ;;  %v3598_v32 = vadd.f32 %v3597_v28, %v3596_v2  ;;  %v3613_v33 = vsel %vm2518_vm4, %v3502_v7, 0.0  ;;  %v3418_v2 = vsel %vm2518_vm4, %v6217_v60, 0.0 }
 0x55a   : > { %3302 = vst.msk [vmem:[%s5613_s12 + $0x168] sm:$0xff] %vm2518_vm4, %v3201_v36  ;;  %v3499_v9 = vmul.f32 %v3201_v36, %v3201_v36  ;;  %v3410_v22 = vsel %vm2518_vm4, %v3201_v36, 0.0  ;;  %v3615_v30 = vsel %vm2518_vm4, %v3503_v54, 0.0  ;;  %v3420_v36 = vsel %vm2518_vm4, %v6289_v59, 0.0 }
 0x55b   : > { %v3600_v44 = vadd.f32 %v3599_v31, %v3598_v32  ;;  %v3405_v39 = vadd.f32 %v3404_v40, %v3403_v34  ;;  %v3505_v34 = vmul.f32 %v6353_v43, %v6353_v43  ;;  %v3422_v60 = vsel %vm2518_vm4, %v6353_v43, 0.0 }
 0x55c   : > { %v3607_v5 = vsel %vm2518_vm4, %v3499_v9, 0.0  ;;  %v3621_v43 = vsel %vm2518_vm4, %v3506_v35, 0.0 }
 0x55d   : > { %v3602_v21 = vadd.f32 %v3601_v61, %v3600_v44  ;;  %v3407_v37 = vadd.f32 %v3406_v8, %v3405_v39  ;;  %v3619_v59 = vsel %vm2518_vm4, %v3505_v34, 0.0 }
 0x55e   : > { %v3236_v0 = vpop.f32.mrf.mxu3 }
 0x55f   : > { %v6580_v23 = vadd.f32 %v6167_v55, %v3236_v0  ;;  %v3604_v29 = vadd.f32 %v3603_v14, %v3602_v21  ;;  %v3409_v11 = vadd.f32 %v3408_v18, %v3407_v37  ;;  %v3617_v0 = vsel %vm2518_vm4, %v3504_v20, 0.0 }
 0x560   : > { %v3507_v21 = vmul.f32 %v6466_v51, %v6466_v51 }
 0x561   : > { %3314 = vst.msk [vmem:[%s5613_s12 + $0x1c8] sm:$0xff] %vm2518_vm4, %v6580_v23  ;;  %v3606_v47 = vadd.f32 %v3605_v27, %v3604_v29  ;;  %v3411_v53 = vadd.f32 %v3410_v22, %v3409_v11  ;;  %v3509_v29 = vmul.f32 %v6504_v1, %v6504_v1 }
 0x562   : > { %v3623_v46 = vsel %vm2518_vm4, %v3507_v21, 0.0 }
 0x563   : > { %v3608_v24 = vadd.f32 %v3607_v5, %v3606_v47 }
 0x566   : > { %v3203_v56 = vpop.f32.mrf.mxu2  ;;  %v3239_v19 = vpop.f32.mrf.mxu3 }
 0x567   : > { %v3204_v52 = vadd.f32 %v6167_v55, %v3203_v56  ;;  %v6595_v4 = vadd.f32 %v6167_v55, %v3239_v19  ;;  %v3426_v56 = vsel %vm2518_vm4, %v6466_v51, 0.0  ;;  %v3508_v19 = vmul.f32 %v6481_v25, %v6481_v25 }
 0x568   : > { %v3430_v51 = vsel %vm2518_vm4, %v6504_v1, 0.0 }
 0x569   : > { %3303 = vst.msk [vmem:[%s5613_s12 + $0x170] sm:$0xff] %vm2518_vm4, %v3204_v52  ;;  %v3500_v6 = vmul.f32 %v3204_v52, %v3204_v52  ;;  %v3412_v63 = vsel %vm2518_vm4, %v3204_v52, 0.0  ;;  %v3428_v52 = vsel %vm2518_vm4, %v6481_v25, 0.0  ;;  %v3625_v9 = vsel %vm2518_vm4, %v3508_v19, 0.0 }
 0x56a   : > { %3315 = vst.msk [vmem:[%s5613_s12 + $0x1d0] sm:$0xff] %vm2518_vm4, %v6595_v4  ;;  %v3413_v48 = vadd.f32 %v3412_v63, %v3411_v53  ;;  %v3627_v25 = vsel %vm2518_vm4, %v3509_v29, 0.0  ;;  %v3432_v53 = vsel %vm2518_vm4, %v6550_v42, 0.0  ;;  %v3436_v7 = vsel %vm2518_vm4, %v6595_v4, 0.0 }
 0x56b   : > { %v3609_v45 = vsel %vm2518_vm4, %v3500_v6, 0.0  ;;  %v3510_v6 = vmul.f32 %v6550_v42, %v6550_v42 }
 0x56c   : > { %v3610_v16 = vadd.f32 %v3609_v45, %v3608_v24 }
 0x56d   : > { %v3629_v1 = vsel %vm2518_vm4, %v3510_v6, 0.0 }
 0x56e   : > { %v3206_v13 = vpop.f32.mrf.mxu2 }
 0x56f   : > { %v3207_v38 = vadd.f32 %v6167_v55, %v3206_v13  ;;  %v3242_v62 = vpop.f32.mrf.mxu3  ;;  %v3511_v13 = vmul.f32 %v6580_v23, %v6580_v23 }
 0x570   : > { %v6610_v12 = vadd.f32 %v6167_v55, %v3242_v62  ;;  %v3512_v62 = vmul.f32 %v6595_v4, %v6595_v4 }
 0x571   : > { %3304 = vst.msk [vmem:[%s5613_s12 + $0x178] sm:$0xff] %vm2518_vm4, %v3207_v38  ;;  %v3414_v15 = vsel %vm2518_vm4, %v3207_v38, 0.0  ;;  %v3501_v50 = vmul.f32 %v3207_v38, %v3207_v38  ;;  %v3434_v38 = vsel %vm2518_vm4, %v6580_v23, 0.0  ;;  %v3631_v42 = vsel %vm2518_vm4, %v3511_v13, 0.0 }
 0x572   : > { %v3415_v10 = vadd.f32 %v3414_v15, %v3413_v48  ;;  %3316 = vst.msk [vmem:[%s5613_s12 + $0x1d8] sm:$0xff] %vm2518_vm4, %v6610_v12  ;;  %v3513_v15 = vmul.f32 %v6610_v12, %v6610_v12  ;;  %v3438_v23 = vsel %vm2518_vm4, %v6610_v12, 0.0 }
 0x573   : > { %v3611_v26 = vsel %vm2518_vm4, %v3501_v50, 0.0 }
 0x574   : > { %v3417_v3 = vadd.f32 %v3416_v49, %v3415_v10  ;;  %v3612_v58 = vadd.f32 %v3611_v26, %v3610_v16  ;;  %v3633_v49 = vsel %vm2518_vm4, %v3512_v62, 0.0 }
 0x576   : > { %v3419_v28 = vadd.f32 %v3418_v2, %v3417_v3  ;;  %v3614_v57 = vadd.f32 %v3613_v33, %v3612_v58  ;;  %v3635_v33 = vsel %vm2518_vm4, %v3513_v15, 0.0 }
 0x578   : > { %v3421_v32 = vadd.f32 %v3420_v36, %v3419_v28  ;;  %v3616_v31 = vadd.f32 %v3615_v30, %v3614_v57  ;;  %v3245_v44 = vpop.f32.mrf.mxu3 }
 0x579   : > { %v3246_v40 = vadd.f32 %v6167_v55, %v3245_v44 }
 0x57a   : > { %v3423_v39 = vadd.f32 %v3422_v60, %v3421_v32  ;;  %v3618_v61 = vadd.f32 %v3617_v0, %v3616_v31 }
 0x57b   : > { %3317 = vst.msk [vmem:[%s5613_s12 + $0x1e0] sm:$0xff] %vm2518_vm4, %v3246_v40  ;;  %v3514_v54 = vmul.f32 %v3246_v40, %v3246_v40  ;;  %v3440_v4 = vsel %vm2518_vm4, %v3246_v40, 0.0 }
 0x57c   : > { %v3425_v8 = vadd.f32 %v3424_v17, %v3423_v39  ;;  %v3620_v37 = vadd.f32 %v3619_v59, %v3618_v61 }
 0x57d   : > { %v3637_v57 = vsel %vm2518_vm4, %v3514_v54, 0.0 }
 0x57e   : > { %v3622_v14 = vadd.f32 %v3621_v43, %v3620_v37  ;;  %v3427_v41 = vadd.f32 %v3426_v56, %v3425_v8 }
 0x580   : > { %v3429_v18 = vadd.f32 %v3428_v52, %v3427_v41  ;;  %v3624_v11 = vadd.f32 %v3623_v46, %v3622_v14  ;;  %v3248_v27 = vpop.f32.mrf.mxu3 }
 0x581   : > { %v3249_v47 = vadd.f32 %v6167_v55, %v3248_v27 }
 0x582   : > { %v3431_v22 = vadd.f32 %v3430_v51, %v3429_v18  ;;  %v3626_v63 = vadd.f32 %v3625_v9, %v3624_v11 }
 0x583   : > { %3318 = vst.msk [vmem:[%s5613_s12 + $0x1e8] sm:$0xff] %vm2518_vm4, %v3249_v47  ;;  %v3515_v2 = vmul.f32 %v3249_v47, %v3249_v47  ;;  %v3442_v30 = vsel %vm2518_vm4, %v3249_v47, 0.0 }
 0x584   : > { %v3433_v5 = vadd.f32 %v3432_v53, %v3431_v22  ;;  %v3628_v45 = vadd.f32 %v3627_v25, %v3626_v63 }
 0x585   : > { %v3639_v34 = vsel %vm2518_vm4, %v3515_v2, 0.0 }
 0x586   : > { %v3435_v24 = vadd.f32 %v3434_v38, %v3433_v5  ;;  %v3630_v48 = vadd.f32 %v3629_v1, %v3628_v45 }
 0x588   : > { %v3437_v50 = vadd.f32 %v3436_v7, %v3435_v24  ;;  %v3632_v16 = vadd.f32 %v3631_v42, %v3630_v48  ;;  %v3251_v10 = vpop.f32.mrf.mxu3 }
 0x589   : > { %v3252_v26 = vadd.f32 %v6167_v55, %v3251_v10 }
 0x58a   : > { %v3439_v3 = vadd.f32 %v3438_v23, %v3437_v50  ;;  %v3634_v58 = vadd.f32 %v3633_v49, %v3632_v16 }
 0x58b   : > { %3319 = vst.msk [vmem:[%s5613_s12 + $0x1f0] sm:$0xff] %vm2518_vm4, %v3252_v26  ;;  %v3516_v32 = vmul.f32 %v3252_v26, %v3252_v26  ;;  %v3444_v0 = vsel %vm2518_vm4, %v3252_v26, 0.0 }
 0x58c   : > { %v3636_v20 = vadd.f32 %v3635_v33, %v3634_v58  ;;  %v3441_v28 = vadd.f32 %v3440_v4, %v3439_v3 }
 0x58d   : > { %v3641_v40 = vsel %vm2518_vm4, %v3516_v32, 0.0 }
 0x58e   : > { %v3638_v12 = vadd.f32 %v3637_v57, %v3636_v20  ;;  %v3443_v36 = vadd.f32 %v3442_v30, %v3441_v28 }
 0x590   : > { %v3640_v31 = vadd.f32 %v3639_v34, %v3638_v12  ;;  %v3254_v44 = vpop.f32.mrf.mxu3  ;;  %v3445_v35 = vadd.f32 %v3444_v0, %v3443_v36 }
 0x591   : > { %v3255_v60 = vadd.f32 %v6167_v55, %v3254_v44 }
 0x592   : > { %v3642_v59 = vadd.f32 %v3641_v40, %v3640_v31 }
 0x593   : > { %3320 = vst.msk [vmem:[%s5613_s12 + $0x1f8] sm:$0xff] %vm2518_vm4, %v3255_v60  ;;  %v3446_v39 = vsel %vm2518_vm4, %v3255_v60, 0.0  ;;  %v3517_v61 = vmul.f32 %v3255_v60, %v3255_v60 }
 0x594   : > { %v3447_v17 = vadd.f32 %v3446_v39, %v3445_v35 }
 0x595   : > { %v3643_v21 = vsel %vm2518_vm4, %v3517_v61, 0.0 }
 0x596   : > { %v3448_v8 = vrot.slane %v3447_v17, 4  ;;  %v3644_v37 = vadd.f32 %v3643_v21, %v3642_v59 }
 0x598   : > { %v3449_v43 = vadd.f32 %v3448_v8, %v3447_v17  ;;  %v3645_v56 = vrot.slane %v3644_v37, 4 }
 0x59a   : > { %v3450_v19 = vrot.slane %v3449_v43, 2  ;;  %v3646_v55 = vadd.f32 %v3645_v56, %v3644_v37 }
 0x59c   : > { %v3451_v14 = vadd.f32 %v3450_v19, %v3449_v43  ;;  %v3647_v41 = vrot.slane %v3646_v55, 2 }
 0x59e   : > { %v3452_v46 = vrot.slane %v3451_v14, 1  ;;  %v3648_v52 = vadd.f32 %v3647_v41, %v3646_v55 }
 0x5a0   : > { %v3649_v29 = vrot.slane %v3648_v52, 1  ;;  %v3453_v18 = vadd.f32 %v3452_v46, %v3451_v14 }
 0x5a2   : > { %v3650_v11 = vadd.f32 %v3649_v29, %v3648_v52 }
 0x5a4   : > { %v3652_v27 = vsel %vm3651_vm9, %v3453_v18, %v3650_v11 }
 0x5a5   : > { %3654 = vst.msk [vmem:[%s199_s22] sm:$0x3] %vm3653_vm10, %v3652_v27 }
 0x5a6   : > { %3929 = shalt.err (!%p3926_p3)
}
 0x5a7   : > { %3854 = dma.vmem_to_hbm [thread:$0]  (%p4036_p5), %s3678_s23, 32, %s3680_s29, %s3661_s19  }
 0x5a8 PF: > { %p3860_p4 = scmp.ge.s32.totalorder %s3964_s18, 2  ;;  %s3699_s28 = sand.u32 1, %s3952_s15  }
 0x5a9   : > { %s3700_s9 = scalar_lea.sflag [#allocation4], %s3699_s28 }
 0x5aa   : > { %p3857_p7 = pnand %p3860_p4, %p4040_p6 }
 0x5ac   : > { %p3858_p8 = pneg %p3857_p7 }
 0x5ae   : > { %3947 = dma.done.wait (%p3858_p8), %s3700_s9, 32  }
 0x5af   : > { %3949 = vsyncadd (%p3858_p8), %s3700_s9, 4294967264  ;;  %p15_p9 = scmp.ge.s32.totalorder %s4023_s21, 4   ;;  %s7134_s15 = smov %s3956_s16 }
 0x5b0   : > { %s7135_s16 = smov %s3960_s17  ;;  %s7136_s17 = smov %s4034_s24 }
 0x5b1   : > { %s7137_s18 = smov %s4023_s21  ;;  %17 = sbr.rel (!%p15_p9) target bundleno = 3 (0x3), region = 79 }
 0x5b6   :  { %3706 = vsyncpa [#allocation4], 1 }
 0x5b7   :  { %3708 = vsyncpa [#allocation4 + $0x1], 1 }

</bundles_post_ra>
